<compile_context>
chip_gen: v6e
topology: v6e:2x2x1
jax: 0.10.0
libtpu: 0.0.40
codegen_flags: <defaults>
</compile_context>

<pallas_src>
import jax
import jax.numpy as jnp
from jax.experimental import pallas as pl
from jax.experimental.pallas import tpu as pltpu


# ---------------------------------------------------------------------------
# Fused kernel: both graphs, 5 GCN layers, 5 MLP heads, score sum & product
# ---------------------------------------------------------------------------

def gnn_bet4_kernel(adj_ref, w1_ref, wg_ref, bg_ref,
                    wm1_ref, bm1_ref, wm2_ref, bm2_ref, wm3_ref, bm3_ref,
                    out_ref):
    f32 = jnp.float32
    n = adj_ref.shape[1]                                   # nodes per graph

    adj = adj_ref[...]                                     # (2, N, NIN)
    adj_flat = adj.reshape(2 * n, adj.shape[-1])           # (2N, NIN): M = 2N

    def l2norm_rows(h):
        # torch F.normalize(p=2, dim=1): x / max(||x||_2, 1e-12), exact form.
        sq = jnp.sum(h * h, axis=-1, keepdims=True)
        return h / jnp.maximum(jnp.sqrt(sq), 1e-12)

    def mlp_score(xv):
        # MLP score head; dropout == identity (inference).  Final width-1
        # column is a VPU multiply + lane reduce, not a 1-lane MXU pass.
        h = jnp.dot(xv, wm1_ref[...], preferred_element_type=f32) + bm1_ref[...]
        h = jnp.maximum(h, 0.0)
        h = jnp.dot(h, wm2_ref[...], preferred_element_type=f32) + bm2_ref[...]
        h = jnp.maximum(h, 0.0)
        return jnp.sum(h * wm3_ref[...], axis=-1, keepdims=True) + bm3_ref[...]

    # ---- layer 1 (GNN_Layer_Init): relu(adj @ W1 + b1), row-L2 normalized --
    h = jnp.dot(adj_flat, w1_ref[...], preferred_element_type=f32) + bg_ref[0]
    x = l2norm_rows(jnp.maximum(h, 0.0))                   # (2N, HP)
    score = mlp_score(x)                                   # (2N, 1) running sum

    # ---- layers 2..5: relu(adj @ (x @ W) + b); normalize except last -------
    for li in range(4):
        s = jnp.dot(x, wg_ref[li], preferred_element_type=f32)   # (2N, HP)
        h = jnp.einsum('gnm,gmh->gnh', adj, s.reshape(2, n, -1),
                       preferred_element_type=f32).reshape(2 * n, -1)
        h = jnp.maximum(h + bg_ref[li + 1], 0.0)
        x = l2norm_rows(h) if li < 3 else h
        score = score + mlp_score(x)

    # ---- final torch.mul(score1, score2), fused in-kernel -------------------
    out_ref[...] = score[:n] * score[n:]                   # (N, 1)


# ---------------------------------------------------------------------------
# Wrapper: single grid-less pallas_call for the whole forward
# ---------------------------------------------------------------------------

@jax.jit
def gnn_bet4_forward(padded, adj1, adj2):
    n = adj1.shape[0]
    nin = padded["w1"].shape[0]
    hp = padded["w1"].shape[1]
    hp2 = padded["wm1"].shape[1]
    # gc1 consumes adj directly, so adj's feature dim must match W1's rows.
    assert adj1.shape == (n, nin) and adj2.shape == (n, nin)

    adj = jnp.stack([adj1, adj2], axis=0).astype(jnp.float32)    # (2, N, NIN)

    # advisory cost estimate for the XLA scheduler
    m = 2 * n
    flops = (2 * m * nin * hp                       # gc1
             + 4 * (2 * m * hp * hp                 # x @ W   (layers 2..5)
                    + 2 * m * n * hp)               # adj @ s (layers 2..5)
             + 5 * (2 * m * hp * hp2                # MLP fc1 (per layer)
                    + 2 * m * hp2 * hp2             # MLP fc2
                    + 2 * m * hp2))                 # MLP fc3 (VPU dot)
    bytes_accessed = int(adj.size * 4
                         + sum(int(v.size) * 4 for v in padded.values())
                         + n * 4)
    cost = pl.CostEstimate(flops=flops, transcendentals=8 * n,
                           bytes_accessed=bytes_accessed)

    return pl.pallas_call(
        gnn_bet4_kernel,
        out_shape=jax.ShapeDtypeStruct((n, 1), jnp.float32),
        cost_estimate=cost,
    )(adj, padded["w1"], padded["wg"], padded["bg"],
      padded["wm1"], padded["bm1"], padded["wm2"], padded["bm2"],
      padded["wm3"], padded["bm3"])


# ---------------------------------------------------------------------------
# Parameter construction / zero-padding to lane-dense (128) shapes
# ---------------------------------------------------------------------------

def init_params(key, ninput, nhid):
    keys = jax.random.split(key, 16)
    k = iter(keys)

    def uni(rk, shape, scale):
        return jax.random.uniform(rk, shape, jnp.float32, -scale, scale)

    stdv = 1.0 / jnp.sqrt(jnp.float32(nhid))
    gc = [(uni(next(k), (ninput, nhid), stdv), uni(next(k), (1, nhid), stdv))]
    for _ in range(4):
        gc.append((uni(next(k), (nhid, nhid), stdv), uni(next(k), (1, nhid), stdv)))

    s1 = 1.0 / jnp.sqrt(jnp.float32(nhid))
    s2 = 1.0 / jnp.sqrt(jnp.float32(2 * nhid))
    mlp = (
        uni(next(k), (nhid, 2 * nhid), s1), uni(next(k), (1, 2 * nhid), s1),
        uni(next(k), (2 * nhid, 2 * nhid), s2), uni(next(k), (1, 2 * nhid), s2),
        uni(next(k), (2 * nhid, 1), s2), uni(next(k), (1, 1), s2),
    )
    return {"gc": gc, "mlp": mlp}


def _round_up(x, m):
    return ((x + m - 1) // m) * m


def pad_params(params, lane=128):
    """Zero-pad feature/hidden dims to multiples of 128 lanes (exact math)."""
    gc, mlp = params["gc"], params["mlp"]
    ninput, nhid = gc[0][0].shape
    hp = _round_up(nhid, lane)
    hp2 = _round_up(2 * nhid, lane)

    def pad2(a, r, c):
        return jnp.pad(a, ((0, r - a.shape[0]), (0, c - a.shape[1])))

    wm1, bm1, wm2, bm2, wm3, bm3 = mlp
    return {
        "w1": pad2(gc[0][0], ninput, hp),
        "wg": jnp.stack([pad2(gc[i][0], hp, hp) for i in range(1, 5)]),
        "bg": jnp.stack([pad2(gc[i][1], 1, hp) for i in range(5)]),
        "wm1": pad2(wm1, hp, hp2), "bm1": pad2(bm1, 1, hp2),
        "wm2": pad2(wm2, hp2, hp2), "bm2": pad2(bm2, 1, hp2),
        "wm3": pad2(wm3.reshape(1, -1), 1, hp2),   # stored as a row (VPU dot)
        "bm3": bm3,
    }


# ---------------------------------------------------------------------------
# Pure-JAX reference (unpadded) for a correctness check
# ---------------------------------------------------------------------------

def reference_forward(params, adj1, adj2):
    gc, mlp = params["gc"], params["mlp"]

    def norm(h):
        nrm = jnp.sqrt(jnp.sum(h * h, axis=1, keepdims=True))
        return h / jnp.maximum(nrm, 1e-12)

    def score(x):
        w1, b1, w2, b2, w3, b3 = mlp
        h = jnp.maximum(x @ w1 + b1, 0.0)
        h = jnp.maximum(h @ w2 + b2, 0.0)
        return h @ w3 + b3

    def branch(adj):
        w, b = gc[0]
        x = norm(jnp.maximum(adj @ w + b, 0.0))
        xs = [x]
        for li in range(1, 5):
            w, b = gc[li]
            h = jnp.maximum(adj @ (x @ w) + b, 0.0)
            x = norm(h) if li < 4 else h
            xs.append(x)
        return sum(score(x) for x in xs)

    return branch(adj1) * branch(adj2)


# ---------------------------------------------------------------------------
# Demo / self-check
# ---------------------------------------------------------------------------

if __name__ == "__main__":
    N = 32          # number of nodes; ninput == N (gc1 consumes adj directly)
    NHID = 32
    DROPOUT = 0.3   # unused at inference (identity)

    key = jax.random.PRNGKey(0)
    k_adj1, k_adj2, k_par = jax.random.split(key, 3)

    adj1 = (jax.random.uniform(k_adj1, (N, N), jnp.float32) < 0.2).astype(jnp.float32)
    adj2 = (jax.random.uniform(k_adj2, (N, N), jnp.float32) < 0.2).astype(jnp.float32)
    adj1 = adj1 / jnp.maximum(jnp.sum(adj1, axis=1, keepdims=True), 1.0)
    adj2 = adj2 / jnp.maximum(jnp.sum(adj2, axis=1, keepdims=True), 1.0)

    params = init_params(k_par, ninput=N, nhid=NHID)
    padded = pad_params(params)

    out = jax.block_until_ready(gnn_bet4_forward(padded, adj1, adj2))

    ref = reference_forward(params, adj1, adj2)
    assert out.shape == (N, 1) and out.dtype == jnp.float32
    assert jnp.allclose(out, ref, rtol=5e-3, atol=5e-3), \
        float(jnp.max(jnp.abs(out - ref)))
    print("KERNEL_OK")
</pallas_src>

<mosaic_0001>
module attributes {stable_mosaic.version = 11 : i64} {
  func.func @gnn_bet4_kernel(%arg0: memref<2x32x32xf32, #tpu.memory_space<vmem>>, %arg1: memref<32x128xf32, #tpu.memory_space<vmem>>, %arg2: memref<4x128x128xf32, #tpu.memory_space<vmem>>, %arg3: memref<5x1x128xf32, #tpu.memory_space<vmem>>, %arg4: memref<128x128xf32, #tpu.memory_space<vmem>>, %arg5: memref<1x128xf32, #tpu.memory_space<vmem>>, %arg6: memref<128x128xf32, #tpu.memory_space<vmem>>, %arg7: memref<1x128xf32, #tpu.memory_space<vmem>>, %arg8: memref<1x128xf32, #tpu.memory_space<vmem>>, %arg9: memref<1x1xf32, #tpu.memory_space<vmem>>, %arg10: memref<32x1xf32, #tpu.memory_space<vmem>>) attributes {dimension_semantics = [], scalar_prefetch = 0 : i64, scratch_operands = 0 : i64, tpu.core_type = #tpu.core_type<tc>} {
    %c0 = arith.constant 0 : index
    %c0_0 = arith.constant 0 : index
    %c0_1 = arith.constant 0 : index
    %0 = vector.load %arg0[%c0, %c0_0, %c0_1] : memref<2x32x32xf32, #tpu.memory_space<vmem>>, vector<2x32x32xf32>
    %1 = vector.shape_cast %0 : vector<2x32x32xf32> to vector<64x32xf32>
    %c0_2 = arith.constant 0 : index
    %c0_3 = arith.constant 0 : index
    %2 = vector.load %arg1[%c0_2, %c0_3] : memref<32x128xf32, #tpu.memory_space<vmem>>, vector<32x128xf32>
    %cst = arith.constant dense<0.000000e+00> : vector<64x128xf32>
    %3 = tpu.matmul %1, %2, %cst {dimension_numbers = #tpu.dot_dimension_numbers<[1], [0], [0], [1], [0, 0, 1, 1], [], []>} : vector<64x32xf32>, vector<32x128xf32>, vector<64x128xf32> -> vector<64x128xf32>
    %c0_4 = arith.constant 0 : index
    %c0_5 = arith.constant 0 : index
    %c0_6 = arith.constant 0 : index
    %4 = vector.load %arg3[%c0_4, %c0_5, %c0_6] : memref<5x1x128xf32, #tpu.memory_space<vmem>>, vector<1x1x128xf32>
    %5 = vector.shape_cast %4 : vector<1x1x128xf32> to vector<1x128xf32>
    %6 = vector.broadcast %5 : vector<1x128xf32> to vector<64x128xf32>
    %7 = arith.addf %3, %6 : vector<64x128xf32>
    %cst_7 = arith.constant 0.000000e+00 : f32
    %8 = vector.broadcast %cst_7 : f32 to vector<64x128xf32>
    %9 = arith.maximumf %7, %8 : vector<64x128xf32>
    %10 = arith.mulf %9, %9 : vector<64x128xf32>
    %cst_8 = arith.constant dense<0.000000e+00> : vector<64xf32>
    %11 = vector.multi_reduction <add>, %10, %cst_8 [1] : vector<64x128xf32> to vector<64xf32>
    %12 = vector.shape_cast %11 : vector<64xf32> to vector<64x1xf32>
    %13 = math.sqrt %12 : vector<64x1xf32>
    %cst_9 = arith.constant 9.99999996E-13 : f32
    %14 = vector.broadcast %cst_9 : f32 to vector<64x1xf32>
    %15 = arith.maximumf %13, %14 : vector<64x1xf32>
    %16 = vector.broadcast %15 : vector<64x1xf32> to vector<64x128xf32>
    %17 = arith.divf %9, %16 : vector<64x128xf32>
    %c0_10 = arith.constant 0 : index
    %c0_11 = arith.constant 0 : index
    %18 = vector.load %arg4[%c0_10, %c0_11] : memref<128x128xf32, #tpu.memory_space<vmem>>, vector<128x128xf32>
    %cst_12 = arith.constant dense<0.000000e+00> : vector<64x128xf32>
    %19 = tpu.matmul %17, %18, %cst_12 {dimension_numbers = #tpu.dot_dimension_numbers<[1], [0], [0], [1], [0, 0, 1, 1], [], []>} : vector<64x128xf32>, vector<128x128xf32>, vector<64x128xf32> -> vector<64x128xf32>
    %c0_13 = arith.constant 0 : index
    %c0_14 = arith.constant 0 : index
    %20 = vector.load %arg5[%c0_13, %c0_14] : memref<1x128xf32, #tpu.memory_space<vmem>>, vector<1x128xf32>
    %21 = vector.broadcast %20 : vector<1x128xf32> to vector<64x128xf32>
    %22 = arith.addf %19, %21 : vector<64x128xf32>
    %cst_15 = arith.constant 0.000000e+00 : f32
    %23 = vector.broadcast %cst_15 : f32 to vector<64x128xf32>
    %24 = arith.maximumf %22, %23 : vector<64x128xf32>
    %c0_16 = arith.constant 0 : index
    %c0_17 = arith.constant 0 : index
    %25 = vector.load %arg6[%c0_16, %c0_17] : memref<128x128xf32, #tpu.memory_space<vmem>>, vector<128x128xf32>
    %cst_18 = arith.constant dense<0.000000e+00> : vector<64x128xf32>
    %26 = tpu.matmul %24, %25, %cst_18 {dimension_numbers = #tpu.dot_dimension_numbers<[1], [0], [0], [1], [0, 0, 1, 1], [], []>} : vector<64x128xf32>, vector<128x128xf32>, vector<64x128xf32> -> vector<64x128xf32>
    %c0_19 = arith.constant 0 : index
    %c0_20 = arith.constant 0 : index
    %27 = vector.load %arg7[%c0_19, %c0_20] : memref<1x128xf32, #tpu.memory_space<vmem>>, vector<1x128xf32>
    %28 = vector.broadcast %27 : vector<1x128xf32> to vector<64x128xf32>
    %29 = arith.addf %26, %28 : vector<64x128xf32>
    %cst_21 = arith.constant 0.000000e+00 : f32
    %30 = vector.broadcast %cst_21 : f32 to vector<64x128xf32>
    %31 = arith.maximumf %29, %30 : vector<64x128xf32>
    %c0_22 = arith.constant 0 : index
    %c0_23 = arith.constant 0 : index
    %32 = vector.load %arg8[%c0_22, %c0_23] : memref<1x128xf32, #tpu.memory_space<vmem>>, vector<1x128xf32>
    %33 = vector.broadcast %32 : vector<1x128xf32> to vector<64x128xf32>
    %34 = arith.mulf %31, %33 : vector<64x128xf32>
    %cst_24 = arith.constant dense<0.000000e+00> : vector<64xf32>
    %35 = vector.multi_reduction <add>, %34, %cst_24 [1] : vector<64x128xf32> to vector<64xf32>
    %36 = vector.shape_cast %35 : vector<64xf32> to vector<64x1xf32>
    %c0_25 = arith.constant 0 : index
    %c0_26 = arith.constant 0 : index
    %37 = vector.load %arg9[%c0_25, %c0_26] : memref<1x1xf32, #tpu.memory_space<vmem>>, vector<1x1xf32>
    %38 = vector.broadcast %37 : vector<1x1xf32> to vector<64x1xf32>
    %39 = arith.addf %36, %38 : vector<64x1xf32>
    %c0_27 = arith.constant 0 : index
    %c0_28 = arith.constant 0 : index
    %c0_29 = arith.constant 0 : index
    %40 = vector.load %arg2[%c0_27, %c0_28, %c0_29] : memref<4x128x128xf32, #tpu.memory_space<vmem>>, vector<1x128x128xf32>
    %41 = vector.shape_cast %40 : vector<1x128x128xf32> to vector<128x128xf32>
    %cst_30 = arith.constant dense<0.000000e+00> : vector<64x128xf32>
    %42 = tpu.matmul %17, %41, %cst_30 {dimension_numbers = #tpu.dot_dimension_numbers<[1], [0], [0], [1], [0, 0, 1, 1], [], []>} : vector<64x128xf32>, vector<128x128xf32>, vector<64x128xf32> -> vector<64x128xf32>
    %43 = vector.shape_cast %42 : vector<64x128xf32> to vector<2x32x128xf32>
    "tpu.trace_start"() <{level = 10 : i32, message = "gnm,gmh->gnh"}> : () -> ()
    %cst_31 = arith.constant dense<0.000000e+00> : vector<2x32x128xf32>
    %44 = tpu.matmul %0, %43, %cst_31 {dimension_numbers = #tpu.dot_dimension_numbers<[2], [1], [1], [2], [0, 0, 0, 1, 1, 2], [0], [0]>} : vector<2x32x32xf32>, vector<2x32x128xf32>, vector<2x32x128xf32> -> vector<2x32x128xf32>
    "tpu.trace_stop"() : () -> ()
    %45 = vector.shape_cast %44 : vector<2x32x128xf32> to vector<64x128xf32>
    %c1 = arith.constant 1 : index
    %c0_32 = arith.constant 0 : index
    %c0_33 = arith.constant 0 : index
    %46 = vector.load %arg3[%c1, %c0_32, %c0_33] : memref<5x1x128xf32, #tpu.memory_space<vmem>>, vector<1x1x128xf32>
    %47 = vector.shape_cast %46 : vector<1x1x128xf32> to vector<1x128xf32>
    %48 = vector.broadcast %47 : vector<1x128xf32> to vector<64x128xf32>
    %49 = arith.addf %45, %48 : vector<64x128xf32>
    %cst_34 = arith.constant 0.000000e+00 : f32
    %50 = vector.broadcast %cst_34 : f32 to vector<64x128xf32>
    %51 = arith.maximumf %49, %50 : vector<64x128xf32>
    %52 = arith.mulf %51, %51 : vector<64x128xf32>
    %cst_35 = arith.constant dense<0.000000e+00> : vector<64xf32>
    %53 = vector.multi_reduction <add>, %52, %cst_35 [1] : vector<64x128xf32> to vector<64xf32>
    %54 = vector.shape_cast %53 : vector<64xf32> to vector<64x1xf32>
    %55 = math.sqrt %54 : vector<64x1xf32>
    %cst_36 = arith.constant 9.99999996E-13 : f32
    %56 = vector.broadcast %cst_36 : f32 to vector<64x1xf32>
    %57 = arith.maximumf %55, %56 : vector<64x1xf32>
    %58 = vector.broadcast %57 : vector<64x1xf32> to vector<64x128xf32>
    %59 = arith.divf %51, %58 : vector<64x128xf32>
    %c0_37 = arith.constant 0 : index
    %c0_38 = arith.constant 0 : index
    %60 = vector.load %arg4[%c0_37, %c0_38] : memref<128x128xf32, #tpu.memory_space<vmem>>, vector<128x128xf32>
    %cst_39 = arith.constant dense<0.000000e+00> : vector<64x128xf32>
    %61 = tpu.matmul %59, %60, %cst_39 {dimension_numbers = #tpu.dot_dimension_numbers<[1], [0], [0], [1], [0, 0, 1, 1], [], []>} : vector<64x128xf32>, vector<128x128xf32>, vector<64x128xf32> -> vector<64x128xf32>
    %c0_40 = arith.constant 0 : index
    %c0_41 = arith.constant 0 : index
    %62 = vector.load %arg5[%c0_40, %c0_41] : memref<1x128xf32, #tpu.memory_space<vmem>>, vector<1x128xf32>
    %63 = vector.broadcast %62 : vector<1x128xf32> to vector<64x128xf32>
    %64 = arith.addf %61, %63 : vector<64x128xf32>
    %cst_42 = arith.constant 0.000000e+00 : f32
    %65 = vector.broadcast %cst_42 : f32 to vector<64x128xf32>
    %66 = arith.maximumf %64, %65 : vector<64x128xf32>
    %c0_43 = arith.constant 0 : index
    %c0_44 = arith.constant 0 : index
    %67 = vector.load %arg6[%c0_43, %c0_44] : memref<128x128xf32, #tpu.memory_space<vmem>>, vector<128x128xf32>
    %cst_45 = arith.constant dense<0.000000e+00> : vector<64x128xf32>
    %68 = tpu.matmul %66, %67, %cst_45 {dimension_numbers = #tpu.dot_dimension_numbers<[1], [0], [0], [1], [0, 0, 1, 1], [], []>} : vector<64x128xf32>, vector<128x128xf32>, vector<64x128xf32> -> vector<64x128xf32>
    %c0_46 = arith.constant 0 : index
    %c0_47 = arith.constant 0 : index
    %69 = vector.load %arg7[%c0_46, %c0_47] : memref<1x128xf32, #tpu.memory_space<vmem>>, vector<1x128xf32>
    %70 = vector.broadcast %69 : vector<1x128xf32> to vector<64x128xf32>
    %71 = arith.addf %68, %70 : vector<64x128xf32>
    %cst_48 = arith.constant 0.000000e+00 : f32
    %72 = vector.broadcast %cst_48 : f32 to vector<64x128xf32>
    %73 = arith.maximumf %71, %72 : vector<64x128xf32>
    %c0_49 = arith.constant 0 : index
    %c0_50 = arith.constant 0 : index
    %74 = vector.load %arg8[%c0_49, %c0_50] : memref<1x128xf32, #tpu.memory_space<vmem>>, vector<1x128xf32>
    %75 = vector.broadcast %74 : vector<1x128xf32> to vector<64x128xf32>
    %76 = arith.mulf %73, %75 : vector<64x128xf32>
    %cst_51 = arith.constant dense<0.000000e+00> : vector<64xf32>
    %77 = vector.multi_reduction <add>, %76, %cst_51 [1] : vector<64x128xf32> to vector<64xf32>
    %78 = vector.shape_cast %77 : vector<64xf32> to vector<64x1xf32>
    %c0_52 = arith.constant 0 : index
    %c0_53 = arith.constant 0 : index
    %79 = vector.load %arg9[%c0_52, %c0_53] : memref<1x1xf32, #tpu.memory_space<vmem>>, vector<1x1xf32>
    %80 = vector.broadcast %79 : vector<1x1xf32> to vector<64x1xf32>
    %81 = arith.addf %78, %80 : vector<64x1xf32>
    %82 = arith.addf %39, %81 : vector<64x1xf32>
    %c1_54 = arith.constant 1 : index
    %c0_55 = arith.constant 0 : index
    %c0_56 = arith.constant 0 : index
    %83 = vector.load %arg2[%c1_54, %c0_55, %c0_56] : memref<4x128x128xf32, #tpu.memory_space<vmem>>, vector<1x128x128xf32>
    %84 = vector.shape_cast %83 : vector<1x128x128xf32> to vector<128x128xf32>
    %cst_57 = arith.constant dense<0.000000e+00> : vector<64x128xf32>
    %85 = tpu.matmul %59, %84, %cst_57 {dimension_numbers = #tpu.dot_dimension_numbers<[1], [0], [0], [1], [0, 0, 1, 1], [], []>} : vector<64x128xf32>, vector<128x128xf32>, vector<64x128xf32> -> vector<64x128xf32>
    %86 = vector.shape_cast %85 : vector<64x128xf32> to vector<2x32x128xf32>
    "tpu.trace_start"() <{level = 10 : i32, message = "gnm,gmh->gnh"}> : () -> ()
    %cst_58 = arith.constant dense<0.000000e+00> : vector<2x32x128xf32>
    %87 = tpu.matmul %0, %86, %cst_58 {dimension_numbers = #tpu.dot_dimension_numbers<[2], [1], [1], [2], [0, 0, 0, 1, 1, 2], [0], [0]>} : vector<2x32x32xf32>, vector<2x32x128xf32>, vector<2x32x128xf32> -> vector<2x32x128xf32>
    "tpu.trace_stop"() : () -> ()
    %88 = vector.shape_cast %87 : vector<2x32x128xf32> to vector<64x128xf32>
    %c2 = arith.constant 2 : index
    %c0_59 = arith.constant 0 : index
    %c0_60 = arith.constant 0 : index
    %89 = vector.load %arg3[%c2, %c0_59, %c0_60] : memref<5x1x128xf32, #tpu.memory_space<vmem>>, vector<1x1x128xf32>
    %90 = vector.shape_cast %89 : vector<1x1x128xf32> to vector<1x128xf32>
    %91 = vector.broadcast %90 : vector<1x128xf32> to vector<64x128xf32>
    %92 = arith.addf %88, %91 : vector<64x128xf32>
    %cst_61 = arith.constant 0.000000e+00 : f32
    %93 = vector.broadcast %cst_61 : f32 to vector<64x128xf32>
    %94 = arith.maximumf %92, %93 : vector<64x128xf32>
    %95 = arith.mulf %94, %94 : vector<64x128xf32>
    %cst_62 = arith.constant dense<0.000000e+00> : vector<64xf32>
    %96 = vector.multi_reduction <add>, %95, %cst_62 [1] : vector<64x128xf32> to vector<64xf32>
    %97 = vector.shape_cast %96 : vector<64xf32> to vector<64x1xf32>
    %98 = math.sqrt %97 : vector<64x1xf32>
    %cst_63 = arith.constant 9.99999996E-13 : f32
    %99 = vector.broadcast %cst_63 : f32 to vector<64x1xf32>
    %100 = arith.maximumf %98, %99 : vector<64x1xf32>
    %101 = vector.broadcast %100 : vector<64x1xf32> to vector<64x128xf32>
    %102 = arith.divf %94, %101 : vector<64x128xf32>
    %c0_64 = arith.constant 0 : index
    %c0_65 = arith.constant 0 : index
    %103 = vector.load %arg4[%c0_64, %c0_65] : memref<128x128xf32, #tpu.memory_space<vmem>>, vector<128x128xf32>
    %cst_66 = arith.constant dense<0.000000e+00> : vector<64x128xf32>
    %104 = tpu.matmul %102, %103, %cst_66 {dimension_numbers = #tpu.dot_dimension_numbers<[1], [0], [0], [1], [0, 0, 1, 1], [], []>} : vector<64x128xf32>, vector<128x128xf32>, vector<64x128xf32> -> vector<64x128xf32>
    %c0_67 = arith.constant 0 : index
    %c0_68 = arith.constant 0 : index
    %105 = vector.load %arg5[%c0_67, %c0_68] : memref<1x128xf32, #tpu.memory_space<vmem>>, vector<1x128xf32>
    %106 = vector.broadcast %105 : vector<1x128xf32> to vector<64x128xf32>
    %107 = arith.addf %104, %106 : vector<64x128xf32>
    %cst_69 = arith.constant 0.000000e+00 : f32
    %108 = vector.broadcast %cst_69 : f32 to vector<64x128xf32>
    %109 = arith.maximumf %107, %108 : vector<64x128xf32>
    %c0_70 = arith.constant 0 : index
    %c0_71 = arith.constant 0 : index
    %110 = vector.load %arg6[%c0_70, %c0_71] : memref<128x128xf32, #tpu.memory_space<vmem>>, vector<128x128xf32>
    %cst_72 = arith.constant dense<0.000000e+00> : vector<64x128xf32>
    %111 = tpu.matmul %109, %110, %cst_72 {dimension_numbers = #tpu.dot_dimension_numbers<[1], [0], [0], [1], [0, 0, 1, 1], [], []>} : vector<64x128xf32>, vector<128x128xf32>, vector<64x128xf32> -> vector<64x128xf32>
    %c0_73 = arith.constant 0 : index
    %c0_74 = arith.constant 0 : index
    %112 = vector.load %arg7[%c0_73, %c0_74] : memref<1x128xf32, #tpu.memory_space<vmem>>, vector<1x128xf32>
    %113 = vector.broadcast %112 : vector<1x128xf32> to vector<64x128xf32>
    %114 = arith.addf %111, %113 : vector<64x128xf32>
    %cst_75 = arith.constant 0.000000e+00 : f32
    %115 = vector.broadcast %cst_75 : f32 to vector<64x128xf32>
    %116 = arith.maximumf %114, %115 : vector<64x128xf32>
    %c0_76 = arith.constant 0 : index
    %c0_77 = arith.constant 0 : index
    %117 = vector.load %arg8[%c0_76, %c0_77] : memref<1x128xf32, #tpu.memory_space<vmem>>, vector<1x128xf32>
    %118 = vector.broadcast %117 : vector<1x128xf32> to vector<64x128xf32>
    %119 = arith.mulf %116, %118 : vector<64x128xf32>
    %cst_78 = arith.constant dense<0.000000e+00> : vector<64xf32>
    %120 = vector.multi_reduction <add>, %119, %cst_78 [1] : vector<64x128xf32> to vector<64xf32>
    %121 = vector.shape_cast %120 : vector<64xf32> to vector<64x1xf32>
    %c0_79 = arith.constant 0 : index
    %c0_80 = arith.constant 0 : index
    %122 = vector.load %arg9[%c0_79, %c0_80] : memref<1x1xf32, #tpu.memory_space<vmem>>, vector<1x1xf32>
    %123 = vector.broadcast %122 : vector<1x1xf32> to vector<64x1xf32>
    %124 = arith.addf %121, %123 : vector<64x1xf32>
    %125 = arith.addf %82, %124 : vector<64x1xf32>
    %c2_81 = arith.constant 2 : index
    %c0_82 = arith.constant 0 : index
    %c0_83 = arith.constant 0 : index
    %126 = vector.load %arg2[%c2_81, %c0_82, %c0_83] : memref<4x128x128xf32, #tpu.memory_space<vmem>>, vector<1x128x128xf32>
    %127 = vector.shape_cast %126 : vector<1x128x128xf32> to vector<128x128xf32>
    %cst_84 = arith.constant dense<0.000000e+00> : vector<64x128xf32>
    %128 = tpu.matmul %102, %127, %cst_84 {dimension_numbers = #tpu.dot_dimension_numbers<[1], [0], [0], [1], [0, 0, 1, 1], [], []>} : vector<64x128xf32>, vector<128x128xf32>, vector<64x128xf32> -> vector<64x128xf32>
    %129 = vector.shape_cast %128 : vector<64x128xf32> to vector<2x32x128xf32>
    "tpu.trace_start"() <{level = 10 : i32, message = "gnm,gmh->gnh"}> : () -> ()
    %cst_85 = arith.constant dense<0.000000e+00> : vector<2x32x128xf32>
    %130 = tpu.matmul %0, %129, %cst_85 {dimension_numbers = #tpu.dot_dimension_numbers<[2], [1], [1], [2], [0, 0, 0, 1, 1, 2], [0], [0]>} : vector<2x32x32xf32>, vector<2x32x128xf32>, vector<2x32x128xf32> -> vector<2x32x128xf32>
    "tpu.trace_stop"() : () -> ()
    %131 = vector.shape_cast %130 : vector<2x32x128xf32> to vector<64x128xf32>
    %c3 = arith.constant 3 : index
    %c0_86 = arith.constant 0 : index
    %c0_87 = arith.constant 0 : index
    %132 = vector.load %arg3[%c3, %c0_86, %c0_87] : memref<5x1x128xf32, #tpu.memory_space<vmem>>, vector<1x1x128xf32>
    %133 = vector.shape_cast %132 : vector<1x1x128xf32> to vector<1x128xf32>
    %134 = vector.broadcast %133 : vector<1x128xf32> to vector<64x128xf32>
    %135 = arith.addf %131, %134 : vector<64x128xf32>
    %cst_88 = arith.constant 0.000000e+00 : f32
    %136 = vector.broadcast %cst_88 : f32 to vector<64x128xf32>
    %137 = arith.maximumf %135, %136 : vector<64x128xf32>
    %138 = arith.mulf %137, %137 : vector<64x128xf32>
    %cst_89 = arith.constant dense<0.000000e+00> : vector<64xf32>
    %139 = vector.multi_reduction <add>, %138, %cst_89 [1] : vector<64x128xf32> to vector<64xf32>
    %140 = vector.shape_cast %139 : vector<64xf32> to vector<64x1xf32>
    %141 = math.sqrt %140 : vector<64x1xf32>
    %cst_90 = arith.constant 9.99999996E-13 : f32
    %142 = vector.broadcast %cst_90 : f32 to vector<64x1xf32>
    %143 = arith.maximumf %141, %142 : vector<64x1xf32>
    %144 = vector.broadcast %143 : vector<64x1xf32> to vector<64x128xf32>
    %145 = arith.divf %137, %144 : vector<64x128xf32>
    %c0_91 = arith.constant 0 : index
    %c0_92 = arith.constant 0 : index
    %146 = vector.load %arg4[%c0_91, %c0_92] : memref<128x128xf32, #tpu.memory_space<vmem>>, vector<128x128xf32>
    %cst_93 = arith.constant dense<0.000000e+00> : vector<64x128xf32>
    %147 = tpu.matmul %145, %146, %cst_93 {dimension_numbers = #tpu.dot_dimension_numbers<[1], [0], [0], [1], [0, 0, 1, 1], [], []>} : vector<64x128xf32>, vector<128x128xf32>, vector<64x128xf32> -> vector<64x128xf32>
    %c0_94 = arith.constant 0 : index
    %c0_95 = arith.constant 0 : index
    %148 = vector.load %arg5[%c0_94, %c0_95] : memref<1x128xf32, #tpu.memory_space<vmem>>, vector<1x128xf32>
    %149 = vector.broadcast %148 : vector<1x128xf32> to vector<64x128xf32>
    %150 = arith.addf %147, %149 : vector<64x128xf32>
    %cst_96 = arith.constant 0.000000e+00 : f32
    %151 = vector.broadcast %cst_96 : f32 to vector<64x128xf32>
    %152 = arith.maximumf %150, %151 : vector<64x128xf32>
    %c0_97 = arith.constant 0 : index
    %c0_98 = arith.constant 0 : index
    %153 = vector.load %arg6[%c0_97, %c0_98] : memref<128x128xf32, #tpu.memory_space<vmem>>, vector<128x128xf32>
    %cst_99 = arith.constant dense<0.000000e+00> : vector<64x128xf32>
    %154 = tpu.matmul %152, %153, %cst_99 {dimension_numbers = #tpu.dot_dimension_numbers<[1], [0], [0], [1], [0, 0, 1, 1], [], []>} : vector<64x128xf32>, vector<128x128xf32>, vector<64x128xf32> -> vector<64x128xf32>
    %c0_100 = arith.constant 0 : index
    %c0_101 = arith.constant 0 : index
    %155 = vector.load %arg7[%c0_100, %c0_101] : memref<1x128xf32, #tpu.memory_space<vmem>>, vector<1x128xf32>
    %156 = vector.broadcast %155 : vector<1x128xf32> to vector<64x128xf32>
    %157 = arith.addf %154, %156 : vector<64x128xf32>
    %cst_102 = arith.constant 0.000000e+00 : f32
    %158 = vector.broadcast %cst_102 : f32 to vector<64x128xf32>
    %159 = arith.maximumf %157, %158 : vector<64x128xf32>
    %c0_103 = arith.constant 0 : index
    %c0_104 = arith.constant 0 : index
    %160 = vector.load %arg8[%c0_103, %c0_104] : memref<1x128xf32, #tpu.memory_space<vmem>>, vector<1x128xf32>
    %161 = vector.broadcast %160 : vector<1x128xf32> to vector<64x128xf32>
    %162 = arith.mulf %159, %161 : vector<64x128xf32>
    %cst_105 = arith.constant dense<0.000000e+00> : vector<64xf32>
    %163 = vector.multi_reduction <add>, %162, %cst_105 [1] : vector<64x128xf32> to vector<64xf32>
    %164 = vector.shape_cast %163 : vector<64xf32> to vector<64x1xf32>
    %c0_106 = arith.constant 0 : index
    %c0_107 = arith.constant 0 : index
    %165 = vector.load %arg9[%c0_106, %c0_107] : memref<1x1xf32, #tpu.memory_space<vmem>>, vector<1x1xf32>
    %166 = vector.broadcast %165 : vector<1x1xf32> to vector<64x1xf32>
    %167 = arith.addf %164, %166 : vector<64x1xf32>
    %168 = arith.addf %125, %167 : vector<64x1xf32>
    %c3_108 = arith.constant 3 : index
    %c0_109 = arith.constant 0 : index
    %c0_110 = arith.constant 0 : index
    %169 = vector.load %arg2[%c3_108, %c0_109, %c0_110] : memref<4x128x128xf32, #tpu.memory_space<vmem>>, vector<1x128x128xf32>
    %170 = vector.shape_cast %169 : vector<1x128x128xf32> to vector<128x128xf32>
    %cst_111 = arith.constant dense<0.000000e+00> : vector<64x128xf32>
    %171 = tpu.matmul %145, %170, %cst_111 {dimension_numbers = #tpu.dot_dimension_numbers<[1], [0], [0], [1], [0, 0, 1, 1], [], []>} : vector<64x128xf32>, vector<128x128xf32>, vector<64x128xf32> -> vector<64x128xf32>
    %172 = vector.shape_cast %171 : vector<64x128xf32> to vector<2x32x128xf32>
    "tpu.trace_start"() <{level = 10 : i32, message = "gnm,gmh->gnh"}> : () -> ()
    %cst_112 = arith.constant dense<0.000000e+00> : vector<2x32x128xf32>
    %173 = tpu.matmul %0, %172, %cst_112 {dimension_numbers = #tpu.dot_dimension_numbers<[2], [1], [1], [2], [0, 0, 0, 1, 1, 2], [0], [0]>} : vector<2x32x32xf32>, vector<2x32x128xf32>, vector<2x32x128xf32> -> vector<2x32x128xf32>
    "tpu.trace_stop"() : () -> ()
    %174 = vector.shape_cast %173 : vector<2x32x128xf32> to vector<64x128xf32>
    %c4 = arith.constant 4 : index
    %c0_113 = arith.constant 0 : index
    %c0_114 = arith.constant 0 : index
    %175 = vector.load %arg3[%c4, %c0_113, %c0_114] : memref<5x1x128xf32, #tpu.memory_space<vmem>>, vector<1x1x128xf32>
    %176 = vector.shape_cast %175 : vector<1x1x128xf32> to vector<1x128xf32>
    %177 = vector.broadcast %176 : vector<1x128xf32> to vector<64x128xf32>
    %178 = arith.addf %174, %177 : vector<64x128xf32>
    %cst_115 = arith.constant 0.000000e+00 : f32
    %179 = vector.broadcast %cst_115 : f32 to vector<64x128xf32>
    %180 = arith.maximumf %178, %179 : vector<64x128xf32>
    %c0_116 = arith.constant 0 : index
    %c0_117 = arith.constant 0 : index
    %181 = vector.load %arg4[%c0_116, %c0_117] : memref<128x128xf32, #tpu.memory_space<vmem>>, vector<128x128xf32>
    %cst_118 = arith.constant dense<0.000000e+00> : vector<64x128xf32>
    %182 = tpu.matmul %180, %181, %cst_118 {dimension_numbers = #tpu.dot_dimension_numbers<[1], [0], [0], [1], [0, 0, 1, 1], [], []>} : vector<64x128xf32>, vector<128x128xf32>, vector<64x128xf32> -> vector<64x128xf32>
    %c0_119 = arith.constant 0 : index
    %c0_120 = arith.constant 0 : index
    %183 = vector.load %arg5[%c0_119, %c0_120] : memref<1x128xf32, #tpu.memory_space<vmem>>, vector<1x128xf32>
    %184 = vector.broadcast %183 : vector<1x128xf32> to vector<64x128xf32>
    %185 = arith.addf %182, %184 : vector<64x128xf32>
    %cst_121 = arith.constant 0.000000e+00 : f32
    %186 = vector.broadcast %cst_121 : f32 to vector<64x128xf32>
    %187 = arith.maximumf %185, %186 : vector<64x128xf32>
    %c0_122 = arith.constant 0 : index
    %c0_123 = arith.constant 0 : index
    %188 = vector.load %arg6[%c0_122, %c0_123] : memref<128x128xf32, #tpu.memory_space<vmem>>, vector<128x128xf32>
    %cst_124 = arith.constant dense<0.000000e+00> : vector<64x128xf32>
    %189 = tpu.matmul %187, %188, %cst_124 {dimension_numbers = #tpu.dot_dimension_numbers<[1], [0], [0], [1], [0, 0, 1, 1], [], []>} : vector<64x128xf32>, vector<128x128xf32>, vector<64x128xf32> -> vector<64x128xf32>
    %c0_125 = arith.constant 0 : index
    %c0_126 = arith.constant 0 : index
    %190 = vector.load %arg7[%c0_125, %c0_126] : memref<1x128xf32, #tpu.memory_space<vmem>>, vector<1x128xf32>
    %191 = vector.broadcast %190 : vector<1x128xf32> to vector<64x128xf32>
    %192 = arith.addf %189, %191 : vector<64x128xf32>
    %cst_127 = arith.constant 0.000000e+00 : f32
    %193 = vector.broadcast %cst_127 : f32 to vector<64x128xf32>
    %194 = arith.maximumf %192, %193 : vector<64x128xf32>
    %c0_128 = arith.constant 0 : index
    %c0_129 = arith.constant 0 : index
    %195 = vector.load %arg8[%c0_128, %c0_129] : memref<1x128xf32, #tpu.memory_space<vmem>>, vector<1x128xf32>
    %196 = vector.broadcast %195 : vector<1x128xf32> to vector<64x128xf32>
    %197 = arith.mulf %194, %196 : vector<64x128xf32>
    %cst_130 = arith.constant dense<0.000000e+00> : vector<64xf32>
    %198 = vector.multi_reduction <add>, %197, %cst_130 [1] : vector<64x128xf32> to vector<64xf32>
    %199 = vector.shape_cast %198 : vector<64xf32> to vector<64x1xf32>
    %c0_131 = arith.constant 0 : index
    %c0_132 = arith.constant 0 : index
    %200 = vector.load %arg9[%c0_131, %c0_132] : memref<1x1xf32, #tpu.memory_space<vmem>>, vector<1x1xf32>
    %201 = vector.broadcast %200 : vector<1x1xf32> to vector<64x1xf32>
    %202 = arith.addf %199, %201 : vector<64x1xf32>
    %203 = arith.addf %168, %202 : vector<64x1xf32>
    %204 = vector.extract_strided_slice %203 {offsets = [0, 0], sizes = [32, 1], strides = [1, 1]} : vector<64x1xf32> to vector<32x1xf32>
    %205 = vector.extract_strided_slice %203 {offsets = [32, 0], sizes = [32, 1], strides = [1, 1]} : vector<64x1xf32> to vector<32x1xf32>
    %206 = arith.mulf %204, %205 : vector<32x1xf32>
    %c0_133 = arith.constant 0 : index
    %c0_134 = arith.constant 0 : index
    %207 = vector.load %arg10[%c0_133, %c0_134] : memref<32x1xf32, #tpu.memory_space<vmem>>, vector<32x1xf32>
    tpu.vector_store %arg10[%c0_133, %c0_134], %206 {strides = array<i32>} : memref<32x1xf32, #tpu.memory_space<vmem>>, vector<32x1xf32>,
    return
  }
}

</mosaic_0001>

<bundles_post_ra>
// kernel: gnn_bet4_forward.1
= control target key start
LH: loop header
LB: loop body
LE: loop exit
PB: predicated region body
PF: predicated region fallthrough
CT: control target
= control target key end

     0   :  { %s6307_s0 = inlined_call_operand.vmem [shape: f32[2,32,32], index: 0, kind: input, shape index: {}]   ;;  %s6308_s1 = inlined_call_operand.hbm [shape: f32[32,128], index: 1, kind: input, shape index: {}]   ;;  %s6309_s2 = inlined_call_operand.hbm [shape: f32[4,128,128], index: 2, kind: input, shape index: {}]   ;;  %s6310_s3 = inlined_call_operand.vmem [shape: f32[5,1,128], index: 3, kind: input, shape index: {}]   ;;  %s6311_s4 = inlined_call_operand.vmem [shape: f32[128,128], index: 4, kind: input, shape index: {}]   ;;  %s6312_s5 = inlined_call_operand.vmem [shape: f32[1,128], index: 5, kind: input, shape index: {}]   ;;  %s6313_s6 = inlined_call_operand.hbm [shape: f32[128,128], index: 6, kind: input, shape index: {}]   ;;  %s6314_s7 = inlined_call_operand.vmem [shape: f32[1,128], index: 7, kind: input, shape index: {}]   ;;  %s6315_s8 = inlined_call_operand.vmem [shape: f32[1,128], index: 8, kind: input, shape index: {}]   ;;  %s6316_s9 = inlined_call_operand.<no memory space> [shape: f32[1,1], index: 9, kind: input, shape index: {}]   ;;  %s6317_s10 = inlined_call_operand.vmem [shape: f32[32,1], index: 10, kind: output, shape index: {}]  }
   0x1   :  { %v15_v0 = vstv %s6316_s9 }
   0x2   :  { %16 = vst [vmem:[#allocation2] sm:$0x1] %v15_v0 }
   0x3   :  { %17 = vsyncpa [#allocation4], 0 }
   0x4   :  { %18 = vsyncpa [#allocation6], 0  ;;  %s4993_s15 = smov [#allocation5]   ;;  %s4994_s17 = smov [#allocation3]  }
   0x5   :  { %s38_s16 = sshll.u32 %s4993_s15, 4  ;;  %s26_s18 = sshll.u32 %s4994_s17, 4  ;;  %s39_s16 = int_to_ptr.vmem [resolvable:$true] %s38_s16  ;;  %s27_s18 = int_to_ptr.vmem [resolvable:$true] %s26_s18 }
   0x6   :  { %s4937_s19 = scalar_lea.vmem %s39_s16, 8192  ;;  %p4942_p1 = scmp.lt.s32.totalorder %s39_s16, %s39_s16 }
   0x7   :  { %p4938_p0 = scmp.ne.s32.totalorder %s39_s16, %s4937_s19  ;;  %p4943_p2 = scmp.lt.s32.totalorder %s4937_s19, %s4937_s19 }
   0x9   :  { %p4944_p3 = por %p4943_p2, %p4942_p1 }
   0xb   :  { %p4945_p4 = pnand %p4944_p3, %p4938_p0 }
   0xd   :  { %4948 = shalt.err (!%p4945_p4)
}
   0xe   :  { %s4995_s20 = smov 128   ;;  %s4996_s21 = smov 8  }
   0xf   :  { %44 = dma.hbm_to_vmem [thread:$0]  %s6309_s2, 8192, %s39_s16, [#allocation6], %s4995_s20, %s4995_s20, %s4996_s21  }
  0x10   :  { %s4957_s23 = scalar_lea.vmem %s27_s18, 512  ;;  %p4962_p6 = scmp.lt.s32.totalorder %s27_s18, %s27_s18 }
  0x11   :  { %p4958_p5 = scmp.ne.s32.totalorder %s27_s18, %s4957_s23  ;;  %p4963_p7 = scmp.lt.s32.totalorder %s4957_s23, %s4957_s23 }
  0x13   :  { %p4964_p8 = por %p4963_p7, %p4962_p6 }
  0x15   :  { %p4965_p9 = pnand %p4964_p8, %p4958_p5 }
  0x17   :  { %4968 = shalt.err (!%p4965_p9)
}
  0x18   :  { %32 = dma.hbm_to_vmem [thread:$0]  %s6308_s1, 512, %s27_s18, [#allocation4], %s4995_s20, %s4995_s20, %s4996_s21  }
  0x19   :  { %s4997_s26 = smov [#allocation7]  }
  0x1a   :  { %s56_s27 = sshll.u32 %s4997_s26, 4  ;;  %s57_s27 = int_to_ptr.vmem [resolvable:$true] %s56_s27 }
  0x1b   :  { %s4977_s28 = scalar_lea.vmem %s57_s27, 2048  ;;  %p4982_p11 = scmp.lt.s32.totalorder %s57_s27, %s57_s27 }
  0x1c   :  { %p4978_p10 = scmp.ne.s32.totalorder %s57_s27, %s4977_s28  ;;  %p4983_p12 = scmp.lt.s32.totalorder %s4977_s28, %s4977_s28 }
  0x1e   :  { %p4984_p13 = por %p4983_p12, %p4982_p11 }
  0x20   :  { %p4985_p0 = pnand %p4984_p13, %p4978_p10 }
  0x22   :  { %4988 = shalt.err (!%p4985_p0)
}
  0x23   :  { %62 = dma.hbm_to_vmem [thread:$0]  %s6313_s6, 2048, %s57_s27, [#allocation6], %s4995_s20, %s4995_s20, %s4996_s21  }
  0x24   :  { %4989 = dma.done.wait [#allocation4], 512  }
  0x25   :  { %4990 = vsyncadd [#allocation4], 4294966784 }
  0x26   :  { %4991 = dma.done.wait [#allocation6], 10240  }
  0x27   :  { %4992 = vsyncadd [#allocation6], 4294957056  ;;  %vm97_vm0 = vcmask 261120   ;;  %v89_v1 = vld [vmem:[#allocation3 + $0x18] sm:$0xff]  ;;  %v88_v2 = vld [vmem:[#allocation3 + $0x10] sm:$0xff] }
  0x28   :  { %4032 = vmatprep.subr.mxu0 %v89_v1  ;;  %v5068_v3 = vld [vmem:[%s6307_s0] sm:$0xff]  ;;  %v87_v4 = vld [vmem:[#allocation3 + $0x8] sm:$0xff]  ;;  %v5089_v8 = vld [vmem:[%s6307_s0 + $0x18] sm:$0xff] }
  0x29   :  { %4033 = vmatpush3.msra.mxu0 %v89_v1  ;;  %4040 = vmatprep.mubr.msk.f32.mxu0 %vm97_vm0, %v5068_v3  ;;  %v86_v5 = vld [vmem:[#allocation3] sm:$0xff]  ;;  %v5080_v7 = vld [vmem:[%s6307_s0 + $0x10] sm:$0xff]  ;;  %v5117_v12 = vld [vmem:[%s6307_s0 + $0x38] sm:$0xff] }
  0x2a   :  { %4034 = vmatprep.subr.mxu0 %v88_v2  ;;  %v5075_v6 = vld [vmem:[%s6307_s0 + $0x8] sm:$0xff]  ;;  %v5094_v9 = vld [vmem:[%s6307_s0 + $0x20] sm:$0xff]  ;;  %v5108_v11 = vld [vmem:[%s6307_s0 + $0x30] sm:$0xff] }
  0x2b   :  { %4035 = vmatpush3.msra.mxu0 %v88_v2  ;;  %v5103_v10 = vld [vmem:[%s6307_s0 + $0x28] sm:$0xff]  ;;  %v3551_v14 = vld [vmem:[%s6310_s3] ss:$0 sm:$0xff]  ;;  %v5159_v46 = vld [vmem:[%s6311_s4 + $0x78] sm:$0xff] }
  0x2c   :  { %4036 = vmatprep.subr.mxu0 %v87_v4  ;;  %4052 = vmatprep.subr.mxu1 %v5159_v46  ;;  %v5166_v47 = vld [vmem:[%s6311_s4 + $0x70] sm:$0xff]  ;;  %v5173_v48 = vld [vmem:[%s6311_s4 + $0x68] sm:$0xff]  ;;  %v5180_v49 = vld [vmem:[%s6311_s4 + $0x60] sm:$0xff] }
  0x2d   :  { %4037 = vmatpush3.msra.mxu0 %v87_v4  ;;  %4053 = vmatpush3.msra.mxu1 %v5159_v46  ;;  %v5187_v50 = vld [vmem:[%s6311_s4 + $0x58] sm:$0xff]  ;;  %v5194_v51 = vld [vmem:[%s6311_s4 + $0x50] sm:$0xff]  ;;  %v5201_v52 = vld [vmem:[%s6311_s4 + $0x48] sm:$0xff] }
  0x2e   :  { %4038 = vmatprep.subr.mxu0 %v86_v5  ;;  %4054 = vmatprep.subr.mxu1 %v5166_v47  ;;  %v5208_v53 = vld [vmem:[%s6311_s4 + $0x40] sm:$0xff]  ;;  %v5215_v54 = vld [vmem:[%s6311_s4 + $0x38] sm:$0xff]  ;;  %v5222_v55 = vld [vmem:[%s6311_s4 + $0x30] sm:$0xff] }
  0x2f   :  { %4039 = vmatpush3.msra.mxu0 %v86_v5  ;;  %4055 = vmatpush3.msra.mxu1 %v5166_v47  ;;  %v5229_v56 = vld [vmem:[%s6311_s4 + $0x28] sm:$0xff]  ;;  %v5236_v57 = vld [vmem:[%s6311_s4 + $0x20] sm:$0xff]  ;;  %v5243_v58 = vld [vmem:[%s6311_s4 + $0x18] sm:$0xff] }
  0x30   :  { %4041 = vmatmul.mubr.msk.f32.vlgmr.msra.gmra.mxu0 %vm97_vm0, %v5075_v6  ;;  %4056 = vmatprep.subr.mxu1 %v5173_v48  ;;  %6342 = vst [vmem:[#allocation10_spill] sm:$0xff] %v5229_v56  ;;  %6343 = vst [vmem:[#allocation11_spill] sm:$0xff] %v5236_v57  ;;  %v5250_v59 = vld [vmem:[%s6311_s4 + $0x10] sm:$0xff]  ;;  %v5257_v60 = vld [vmem:[%s6311_s4 + $0x8] sm:$0xff] }
  0x31   :  { %4043 = vmatprep.mubr.msk.f32.mxu0 %vm97_vm0, %v5080_v7  ;;  %4057 = vmatpush3.msra.mxu1 %v5173_v48  ;;  %6344 = vst [vmem:[#allocation12_spill] sm:$0xff] %v5243_v58  ;;  %6345 = vst [vmem:[#allocation13_spill] sm:$0xff] %v5250_v59  ;;  %v5263_v61 = vld [vmem:[%s6311_s4] sm:$0xff]  ;;  %v5273_v0 = vld [vmem:[#allocation7 + $0x70] sm:$0xff] }
  0x32   :  { %4058 = vmatprep.subr.mxu1 %v5180_v49  ;;  %6346 = vst [vmem:[#allocation14_spill] sm:$0xff] %v5257_v60  ;;  %6347 = vst [vmem:[#allocation15_spill] sm:$0xff] %v5263_v61  ;;  %v5266_v62 = vld [vmem:[#allocation5 + $0x78] sm:$0xff]  ;;  %v5277_v1 = vld [vmem:[#allocation7 + $0x68] sm:$0xff] }
  0x33   :  { %4059 = vmatpush3.msra.mxu1 %v5180_v49  ;;  %v5271_v63 = vld [vmem:[#allocation7 + $0x78] sm:$0xff]  ;;  %v5281_v2 = vld [vmem:[#allocation7 + $0x60] sm:$0xff]  ;;  %v5289_v5 = vld [vmem:[#allocation7 + $0x50] sm:$0xff] }
  0x34   :  { %4044 = vmatmul.mubr.msk.f32.gmra.mxu0 %vm97_vm0, %v5089_v8  ;;  %4060 = vmatprep.subr.mxu1 %v5187_v50  ;;  %v5285_v4 = vld [vmem:[#allocation7 + $0x58] sm:$0xff] }
  0x35   :  { %4046 = vmatprep.mubr.msk.f32.mxu0 %vm97_vm0, %v5094_v9  ;;  %4061 = vmatpush3.msra.mxu1 %v5187_v50 }
  0x36   :  { %4062 = vmatprep.subr.mxu1 %v5194_v51  ;;  %4096 = vmatprep.subr.mxu0 %v5271_v63 }
  0x37   :  { %4063 = vmatpush3.msra.mxu1 %v5194_v51  ;;  %4097 = vmatpush3.msra.mxu0 %v5271_v63 }
  0x38   :  { %4047 = vmatmul.mubr.msk.f32.gmra.mxu0 %vm97_vm0, %v5103_v10  ;;  %4064 = vmatprep.subr.mxu1 %v5201_v52 }
  0x39   :  { %4049 = vmatprep.mubr.msk.f32.mxu0 %vm97_vm0, %v5108_v11  ;;  %4065 = vmatpush3.msra.mxu1 %v5201_v52 }
  0x3a   :  { %4066 = vmatprep.subr.mxu1 %v5208_v53  ;;  %4098 = vmatprep.subr.mxu0 %v5273_v0 }
  0x3b   :  { %4067 = vmatpush3.msra.mxu1 %v5208_v53  ;;  %4099 = vmatpush3.msra.mxu0 %v5273_v0 }
  0x3c   :  { %4050 = vmatmul.mubr.msk.f32.gmra.mxu0 %vm97_vm0, %v5117_v12  ;;  %4068 = vmatprep.subr.mxu1 %v5215_v54 }
  0x3d   :  { %4069 = vmatpush3.msra.mxu1 %v5215_v54  ;;  %4100 = vmatprep.subr.mxu0 %v5277_v1 }
  0x3e   :  { %4070 = vmatprep.subr.mxu1 %v5222_v55  ;;  %4101 = vmatpush3.msra.mxu0 %v5277_v1 }
  0x3f   :  { %4071 = vmatpush3.msra.mxu1 %v5222_v55  ;;  %4102 = vmatprep.subr.mxu0 %v5281_v2 }
  0x40   :  { %4072 = vmatprep.subr.mxu1 %v5229_v56  ;;  %4103 = vmatpush3.msra.mxu0 %v5281_v2 }
  0x41   :  { %4073 = vmatpush3.msra.mxu1 %v5229_v56  ;;  %4104 = vmatprep.subr.mxu0 %v5285_v4 }
  0x42   :  { %4074 = vmatprep.subr.mxu1 %v5236_v57  ;;  %4105 = vmatpush3.msra.mxu0 %v5285_v4 }
  0x43   :  { %4075 = vmatpush3.msra.mxu1 %v5236_v57  ;;  %4106 = vmatprep.subr.mxu0 %v5289_v5 }
  0x44   :  { %4076 = vmatprep.subr.mxu1 %v5243_v58  ;;  %4107 = vmatpush3.msra.mxu0 %v5289_v5 }
  0x45   :  { %4077 = vmatpush3.msra.mxu1 %v5243_v58 }
  0x46   :  { %4078 = vmatprep.subr.mxu1 %v5250_v59 }
  0x47   :  { %4079 = vmatpush3.msra.mxu1 %v5250_v59 }
  0x48   :  { %4080 = vmatprep.subr.mxu1 %v5257_v60 }
  0x49   :  { %4081 = vmatpush3.msra.mxu1 %v5257_v60 }
  0x4a   :  { %4082 = vmatprep.subr.mxu1 %v5263_v61 }
  0x4b   :  { %4083 = vmatpush3.msra.mxu1 %v5263_v61 }
  0x4c   :  { %4140 = vmatprep.subr.mxu1 %v5266_v62 }
  0xf0   :  { %v4042_v13 = vpop.f32.mrf.mxu0 }
  0xf1   :  { %v194_v16 = vadd.f32 %v4042_v13, %v3551_v14  ;;  %v5293_v13 = vld [vmem:[#allocation7 + $0x48] sm:$0xff] }
  0xf2   :  { %v188_v15 = vpop.f32.mrf.mxu0  ;;  %4108 = vmatprep.subr.mxu0 %v5293_v13 }
  0xf3   :  { %v189_v17 = vadd.f32 %v3551_v14, %v188_v15  ;;  %v5126_v22 = vmax.f32 %v194_v16, 0.0  ;;  %4109 = vmatpush3.msra.mxu0 %v5293_v13  ;;  %v5301_v15 = vld [vmem:[#allocation7 + $0x38] sm:$0xff]  ;;  %v5305_v16 = vld [vmem:[#allocation7 + $0x30] sm:$0xff] }
  0xf4   :  { %v4045_v18 = vpop.f32.mrf.mxu0 }
  0xf5   :  { %v5124_v19 = vmax.f32 %v189_v17, 0.0  ;;  %v204_v20 = vadd.f32 %v4045_v18, %v3551_v14  ;;  %v236_v32 = vmul.f32 %v5126_v22, %v5126_v22  ;;  %v5309_v17 = vld [vmem:[#allocation7 + $0x28] sm:$0xff]  ;;  %v5313_v18 = vld [vmem:[#allocation7 + $0x20] sm:$0xff] }
  0xf6   :  { %v198_v21 = vpop.f32.mrf.mxu0 }
  0xf7   :  { %v199_v23 = vadd.f32 %v3551_v14, %v198_v21  ;;  %v235_v24 = vmul.f32 %v5124_v19, %v5124_v19  ;;  %v5130_v26 = vmax.f32 %v204_v20, 0.0 }
  0xf8   :  { %v4048_v25 = vpop.f32.mrf.mxu0 }
  0xf9   :  { %v5132_v27 = vmax.f32 %v199_v23, 0.0  ;;  %v214_v28 = vadd.f32 %v4048_v25, %v3551_v14  ;;  %243 = vadd.xlane.f32.xlu0 %v235_v24  ;;  %v238_v37 = vmul.f32 %v5130_v26, %v5130_v26 }
  0xfa   :  { %v208_v29 = vpop.f32.mrf.mxu0 }
  0xfb   :  { %v209_v30 = vadd.f32 %v3551_v14, %v208_v29  ;;  %v237_v31 = vmul.f32 %v5132_v27, %v5132_v27  ;;  %v5138_v34 = vmax.f32 %v214_v28, 0.0 }
  0xfc   :  { %v4051_v33 = vpop.f32.mrf.mxu0 }
  0xfd   :  { %v5140_v35 = vmax.f32 %v209_v30, 0.0  ;;  %v224_v36 = vadd.f32 %v4051_v33, %v3551_v14  ;;  %247 = vadd.xlane.f32.xlu1 %v237_v31  ;;  %245 = vadd.xlane.f32.xlu0 %v236_v32  ;;  %v240_v43 = vmul.f32 %v5138_v34, %v5138_v34 }
  0xfe   :  { %v218_v38 = vpop.f32.mrf.mxu0 }
  0xff   :  { %v219_v39 = vadd.f32 %v3551_v14, %v218_v38  ;;  %v239_v40 = vmul.f32 %v5140_v35, %v5140_v35  ;;  %v5146_v41 = vmax.f32 %v224_v36, 0.0  ;;  %v5297_v14 = vld [vmem:[#allocation7 + $0x40] sm:$0xff] }
 0x100   :  { %4110 = vmatprep.subr.mxu0 %v5297_v14 }
 0x101   :  { %v5148_v42 = vmax.f32 %v219_v39, 0.0  ;;  %249 = vadd.xlane.f32.xlu1 %v238_v37  ;;  %251 = vadd.xlane.f32.xlu0 %v239_v40  ;;  %v242_v45 = vmul.f32 %v5146_v41, %v5146_v41 }
 0x102   :  { %4111 = vmatpush3.msra.mxu0 %v5297_v14 }
 0x103   :  { %v241_v44 = vmul.f32 %v5148_v42, %v5148_v42  ;;  %4112 = vmatprep.subr.mxu0 %v5301_v15 }
 0x104   :  { %4113 = vmatpush3.msra.mxu0 %v5301_v15 }
 0x105   :  { %253 = vadd.xlane.f32.xlu1 %v240_v43  ;;  %255 = vadd.xlane.f32.xlu0 %v241_v44 }
 0x106   :  { %4114 = vmatprep.subr.mxu0 %v5305_v16 }
 0x107   :  { %4115 = vmatpush3.msra.mxu0 %v5305_v16 }
 0x108   :  { %4116 = vmatprep.subr.mxu0 %v5309_v17 }
 0x109   :  { %257 = vadd.xlane.f32.xlu1 %v242_v45  ;;  %4117 = vmatpush3.msra.mxu0 %v5309_v17 }
 0x10a   :  { %4118 = vmatprep.subr.mxu0 %v5313_v18 }
 0x10b   :  { %4119 = vmatpush3.msra.mxu0 %v5313_v18 }
 0x182   :  { %v244_v20 = vpop.xlane.xlu0 %243 }
 0x183   :  { %4785 = vrsqrt.f32 %v244_v20  ;;  %vm261_vm1 = vcmp.eq.f32.partialorder %v244_v20, inf  ;;  %v264_v32 = vand.u32 2147483648, %v244_v20  ;;  %vm263_vm2 = vcmp.eq.f32.partialorder %v244_v20, 0.0 }
 0x186   :  { %v248_v21 = vpop.xlane.xlu1 %247  ;;  %v246_v23 = vpop.xlane.xlu0 %245 }
 0x187   :  { %4787 = vrsqrt.f32 %v248_v21  ;;  %vm275_vm3 = vcmp.eq.f32.partialorder %v248_v21, inf  ;;  %vm277_vm4 = vcmp.eq.f32.partialorder %v248_v21, 0.0  ;;  %v278_v44 = vand.u32 2147483648, %v248_v21 }
 0x188   :  { %4789 = vrsqrt.f32 %v246_v23  ;;  %vm268_vm5 = vcmp.eq.f32.partialorder %v246_v23, inf  ;;  %vm270_vm6 = vcmp.eq.f32.partialorder %v246_v23, 0.0  ;;  %v271_v61 = vand.u32 2147483648, %v246_v23 }
 0x18a   :  { %v250_v24 = vpop.xlane.xlu1 %249  ;;  %v252_v25 = vpop.xlane.xlu0 %251 }
 0x18b   :  { %4791 = vrsqrt.f32 %v250_v24  ;;  %vm282_vm7 = vcmp.eq.f32.partialorder %v250_v24, inf  ;;  %vm289_vm8 = vcmp.eq.f32.partialorder %v252_v25, inf  ;;  %v285_v57 = vand.u32 2147483648, %v250_v24 }
 0x18c   :  { %4793 = vrsqrt.f32 %v252_v25  ;;  %vm291_vm9 = vcmp.eq.f32.partialorder %v252_v25, 0.0  ;;  %vm284_vm10 = vcmp.eq.f32.partialorder %v250_v24, 0.0 }
 0x18e   :  { %v5319_v28 = vpop.xlane.xlu1 %253  ;;  %v5321_v29 = vpop.xlane.xlu0 %255 }
 0x18f   :  { %4795 = vrsqrt.f32 %v5319_v28  ;;  %vm296_vm11 = vcmp.eq.f32.partialorder %v5319_v28, inf  ;;  %vm303_vm12 = vcmp.eq.f32.partialorder %v5321_v29, inf  ;;  %vm305_vm13 = vcmp.eq.f32.partialorder %v5321_v29, 0.0 }
 0x190   :  { %v4786_v30 = vpop.eup %4785  ;;  %4797 = vrsqrt.f32 %v5321_v29  ;;  %vm298_vm14 = vcmp.eq.f32.partialorder %v5319_v28, 0.0 }
 0x191   :  { %v260_v31 = vmul.f32 %v4786_v30, %v244_v20 }
 0x192   :  { %v5325_v33 = vpop.xlane.xlu1 %257 }
 0x193   :  { %v262_v36 = vsel %vm261_vm1, %v244_v20, %v260_v31  ;;  %4799 = vrsqrt.f32 %v5325_v33  ;;  %vm310_vm15 = vcmp.eq.f32.partialorder %v5325_v33, inf  ;;  %vm312_vm1 = vcmp.eq.f32.partialorder %v5325_v33, 0.0 }
 0x194   :  { %v4788_v37 = vpop.eup %4787  ;;  %v265_v38 = vsel %vm263_vm2, %v264_v32, %v262_v36 }
 0x195   :  { %v4790_v39 = vpop.eup %4789  ;;  %v315_v40 = vmax.f32 %v265_v38, 1e-12  ;;  %v274_v43 = vmul.f32 %v4788_v37, %v248_v21  ;;  %v292_v38 = vand.u32 2147483648, %v252_v25 }
 0x196   :  { %v267_v45 = vmul.f32 %v4790_v39, %v246_v23 }
 0x197   :  { %4801 = vrcp.f32 %v315_v40  ;;  %v276_v30 = vsel %vm275_vm3, %v248_v21, %v274_v43 }
 0x198   :  { %v4792_v60 = vpop.eup %4791  ;;  %v279_v59 = vsel %vm277_vm4, %v278_v44, %v276_v30  ;;  %v269_v31 = vsel %vm268_vm5, %v246_v23, %v267_v45  ;;  %v306_v44 = vand.u32 2147483648, %v5321_v29 }
 0x199   :  { %v4794_v20 = vpop.eup %4793  ;;  %v317_v58 = vmax.f32 %v279_v59, 1e-12  ;;  %v272_v32 = vsel %vm270_vm6, %v271_v61, %v269_v31  ;;  %v281_v36 = vmul.f32 %v4792_v60, %v250_v24 }
 0x19a   :  { %v316_v37 = vmax.f32 %v272_v32, 1e-12  ;;  %v288_v56 = vmul.f32 %v4794_v20, %v252_v25 }
 0x19b   :  { %4803 = vrcp.f32 %v317_v58  ;;  %v283_v39 = vsel %vm282_vm7, %v250_v24, %v281_v36  ;;  %v299_v58 = vand.u32 2147483648, %v5319_v28 }
 0x19c   :  { %v4796_v21 = vpop.eup %4795  ;;  %4805 = vrcp.f32 %v316_v37  ;;  %v286_v40 = vsel %vm284_vm10, %v285_v57, %v283_v39  ;;  %v290_v23 = vsel %vm289_vm8, %v252_v25, %v288_v56 }
 0x19d   :  { %v4798_v59 = vpop.eup %4797  ;;  %v318_v61 = vmax.f32 %v286_v40, 1e-12  ;;  %v293_v60 = vsel %vm291_vm9, %v292_v38, %v290_v23  ;;  %v295_v43 = vmul.f32 %v4796_v21, %v5319_v28  ;;  %v313_v38 = vand.u32 2147483648, %v5325_v33 }
 0x19e   :  { %v319_v45 = vmax.f32 %v293_v60, 1e-12  ;;  %v302_v24 = vmul.f32 %v4798_v59, %v5321_v29  ;;  %v671_v60 = vld [vmem:[#allocation5 + $0x70] sm:$0xff] }
 0x19f   :  { %4807 = vrcp.f32 %v318_v61  ;;  %v297_v56 = vsel %vm296_vm11, %v5319_v28, %v295_v43 }
 0x1a0   :  { %v4800_v57 = vpop.eup %4799  ;;  %4809 = vrcp.f32 %v319_v45  ;;  %v300_v25 = vsel %vm298_vm14, %v299_v58, %v297_v56  ;;  %v304_v30 = vsel %vm303_vm12, %v5321_v29, %v302_v24  ;;  %v668_v24 = vld [vmem:[#allocation5 + $0x58] sm:$0xff] }
 0x1a1   :  { %v320_v31 = vmax.f32 %v300_v25, 1e-12  ;;  %v307_v20 = vsel %vm305_vm13, %v306_v44, %v304_v30  ;;  %v309_v32 = vmul.f32 %v4800_v57, %v5325_v33  ;;  %v667_v57 = vld [vmem:[#allocation5 + $0x50] sm:$0xff]  ;;  %v665_v30 = vld [vmem:[#allocation5 + $0x40] sm:$0xff] }
 0x1a2   :  { %v321_v36 = vmax.f32 %v307_v20, 1e-12  ;;  %v661_v20 = vld [vmem:[#allocation5 + $0x20] sm:$0xff] }
 0x1a3   :  { %4811 = vrcp.f32 %v320_v31  ;;  %v311_v37 = vsel %vm310_vm15, %v5325_v33, %v309_v32  ;;  %v662_v31 = vld [vmem:[#allocation5 + $0x28] sm:$0xff]  ;;  %v659_v32 = vld [vmem:[#allocation5 + $0x10] sm:$0xff] }
 0x1a4   :  { %v4802_v28 = vpop.eup %4801  ;;  %4813 = vrcp.f32 %v321_v36  ;;  %v314_v39 = vsel %vm312_vm1, %v313_v38, %v311_v37  ;;  %v658_v36 = vld [vmem:[#allocation5 + $0x8] sm:$0xff]  ;;  %v657_v38 = vld [vmem:[#allocation5] sm:$0xff] }
 0x1a5   :  { %v322_v21 = vmax.f32 %v314_v39, 1e-12  ;;  %v324_v29 = vmul.f32 %v4802_v28, %v5124_v19  ;;  %v670_v19 = vld [vmem:[#allocation5 + $0x68] sm:$0xff] }
 0x1a7   :  { %4815 = vrcp.f32 %v322_v21  ;;  %4084 = vmatprep.mubr.f32.mxu1 %v324_v29 }
 0x1a8   :  { %v4804_v40 = vpop.eup %4803 }
 0x1a9   :  { %v4806_v23 = vpop.eup %4805  ;;  %v5350_v59 = vmul.f32 %v4804_v40, %v5132_v27  ;;  %v669_v27 = vld [vmem:[#allocation5 + $0x60] sm:$0xff] }
 0x1aa   :  { %v5353_v61 = vmul.f32 %v4806_v23, %v5126_v22 }
 0x1ac   :  { %v4808_v43 = vpop.eup %4807  ;;  %4085 = vmatmul.mubr.f32.vlgmr.msra.gmra.mxu1 %v5353_v61 }
 0x1ad   :  { %v4810_v33 = vpop.eup %4809  ;;  %4141 = vmatpush3.msra.mxu1 %v5266_v62  ;;  %4087 = vmatprep.mubr.f32.mxu1 %v5350_v59  ;;  %v330_v44 = vmul.f32 %v4808_v43, %v5130_v26 }
 0x1ae   :  { %4142 = vmatprep.subr.mxu1 %v671_v60  ;;  %v332_v45 = vmul.f32 %v4810_v33, %v5140_v35  ;;  %v666_v35 = vld [vmem:[#allocation5 + $0x48] sm:$0xff] }
 0x1af   :  { %4143 = vmatpush3.msra.mxu1 %v671_v60 }
 0x1b0   :  { %v4812_v58 = vpop.eup %4811  ;;  %4144 = vmatprep.subr.mxu1 %v670_v19  ;;  %4088 = vmatmul.mubr.f32.gmra.mxu1 %v330_v44 }
 0x1b1   :  { %v4814_v22 = vpop.eup %4813  ;;  %4145 = vmatpush3.msra.mxu1 %v670_v19  ;;  %4090 = vmatprep.mubr.f32.mxu1 %v332_v45  ;;  %v334_v56 = vmul.f32 %v4812_v58, %v5138_v34  ;;  %v664_v34 = vld [vmem:[#allocation5 + $0x38] sm:$0xff] }
 0x1b2   :  { %4146 = vmatprep.subr.mxu1 %v669_v27  ;;  %v336_v62 = vmul.f32 %v4814_v22, %v5148_v42  ;;  %v663_v42 = vld [vmem:[#allocation5 + $0x30] sm:$0xff] }
 0x1b3   :  { %4147 = vmatpush3.msra.mxu1 %v669_v27 }
 0x1b4   :  { %v4816_v26 = vpop.eup %4815  ;;  %4148 = vmatprep.subr.mxu1 %v668_v24  ;;  %4091 = vmatmul.mubr.f32.gmra.mxu1 %v334_v56 }
 0x1b5   :  { %4149 = vmatpush3.msra.mxu1 %v668_v24  ;;  %4093 = vmatprep.mubr.f32.mxu1 %v336_v62  ;;  %v338_v25 = vmul.f32 %v4816_v26, %v5146_v41  ;;  %v660_v41 = vld [vmem:[#allocation5 + $0x18] sm:$0xff] }
 0x1b6   :  { %4150 = vmatprep.subr.mxu1 %v667_v57 }
 0x1b7   :  { %4151 = vmatpush3.msra.mxu1 %v667_v57 }
 0x1b8   :  { %4152 = vmatprep.subr.mxu1 %v666_v35  ;;  %4094 = vmatmul.mubr.f32.gmra.mxu1 %v338_v25 }
 0x1b9   :  { %4153 = vmatpush3.msra.mxu1 %v666_v35  ;;  %4172 = vmatprep.mubr.f32.mxu1 %v324_v29 }
 0x1ba   :  { %4154 = vmatprep.subr.mxu1 %v665_v30 }
 0x1bb   :  { %4155 = vmatpush3.msra.mxu1 %v665_v30 }
 0x1bc   :  { %4156 = vmatprep.subr.mxu1 %v664_v34 }
 0x1bd   :  { %4157 = vmatpush3.msra.mxu1 %v664_v34 }
 0x1be   :  { %4158 = vmatprep.subr.mxu1 %v663_v42 }
 0x1bf   :  { %4159 = vmatpush3.msra.mxu1 %v663_v42 }
 0x1c0   :  { %4160 = vmatprep.subr.mxu1 %v662_v31 }
 0x1c1   :  { %4161 = vmatpush3.msra.mxu1 %v662_v31 }
 0x1c2   :  { %4162 = vmatprep.subr.mxu1 %v661_v20 }
 0x1c3   :  { %4163 = vmatpush3.msra.mxu1 %v661_v20 }
 0x1c4   :  { %4164 = vmatprep.subr.mxu1 %v660_v41 }
 0x1c5   :  { %4165 = vmatpush3.msra.mxu1 %v660_v41 }
 0x1c6   :  { %4166 = vmatprep.subr.mxu1 %v659_v32 }
 0x1c7   :  { %4167 = vmatpush3.msra.mxu1 %v659_v32 }
 0x1c8   :  { %4168 = vmatprep.subr.mxu1 %v658_v36 }
 0x1c9   :  { %4169 = vmatpush3.msra.mxu1 %v658_v36 }
 0x1ca   :  { %4170 = vmatprep.subr.mxu1 %v657_v38 }
 0x1cb   :  { %4171 = vmatpush3.msra.mxu1 %v657_v38 }
 0x1cc   :  { %4173 = vmatmul.mubr.f32.vlgmr.msra.gmra.mxu1 %v5353_v61  ;;  %4256 = vmatprep.subr.mxu1 %v5271_v63 }
 0x1cd   :  { %4175 = vmatprep.mubr.f32.mxu1 %v5350_v59  ;;  %4257 = vmatpush3.msra.mxu1 %v5271_v63  ;;  %v478_v63 = vld [vmem:[#allocation7 + $0x18] sm:$0xff] }
 0x1ce   :  { %4258 = vmatprep.subr.mxu1 %v5273_v0  ;;  %4120 = vmatprep.subr.mxu0 %v478_v63 }
 0x1cf   :  { %4259 = vmatpush3.msra.mxu1 %v5273_v0  ;;  %4121 = vmatpush3.msra.mxu0 %v478_v63  ;;  %v477_v0 = vld [vmem:[#allocation7 + $0x10] sm:$0xff] }
 0x1d0   :  { %4176 = vmatmul.mubr.f32.gmra.mxu1 %v330_v44  ;;  %4260 = vmatprep.subr.mxu1 %v5277_v1 }
 0x1d1   :  { %4178 = vmatprep.mubr.f32.mxu1 %v332_v45  ;;  %4261 = vmatpush3.msra.mxu1 %v5277_v1  ;;  %v476_v1 = vld [vmem:[#allocation7 + $0x8] sm:$0xff] }
 0x1d2   :  { %4262 = vmatprep.subr.mxu1 %v5281_v2  ;;  %4122 = vmatprep.subr.mxu0 %v477_v0 }
 0x1d3   :  { %4263 = vmatpush3.msra.mxu1 %v5281_v2  ;;  %4123 = vmatpush3.msra.mxu0 %v477_v0  ;;  %v475_v2 = vld [vmem:[#allocation7] sm:$0xff] }
 0x1d4   :  { %4179 = vmatmul.mubr.f32.gmra.mxu1 %v334_v56  ;;  %4264 = vmatprep.subr.mxu1 %v5285_v4 }
 0x1d5   :  { %4181 = vmatprep.mubr.f32.mxu1 %v336_v62  ;;  %4265 = vmatpush3.msra.mxu1 %v5285_v4  ;;  %v5392_v4 = vld [vmem:[%s6312_s5] ss:$0 sm:$0xff] }
 0x1d6   :  { %4266 = vmatprep.subr.mxu1 %v5289_v5  ;;  %4124 = vmatprep.subr.mxu0 %v476_v1 }
 0x1d7   :  { %4267 = vmatpush3.msra.mxu1 %v5289_v5  ;;  %4125 = vmatpush3.msra.mxu0 %v476_v1 }
 0x1d8   :  { %4182 = vmatmul.mubr.f32.gmra.mxu1 %v338_v25  ;;  %4268 = vmatprep.subr.mxu1 %v5293_v13 }
 0x1d9   :  { %4269 = vmatpush3.msra.mxu1 %v5293_v13  ;;  %4126 = vmatprep.subr.mxu0 %v475_v2 }
 0x1da   :  { %4270 = vmatprep.subr.mxu1 %v5297_v14  ;;  %4127 = vmatpush3.msra.mxu0 %v475_v2 }
 0x1db   :  { %4271 = vmatpush3.msra.mxu1 %v5297_v14 }
 0x1dc   :  { %4272 = vmatprep.subr.mxu1 %v5301_v15 }
 0x1dd   :  { %4273 = vmatpush3.msra.mxu1 %v5301_v15 }
 0x1de   :  { %4274 = vmatprep.subr.mxu1 %v5305_v16 }
 0x1df   :  { %4275 = vmatpush3.msra.mxu1 %v5305_v16 }
 0x1e0   :  { %4276 = vmatprep.subr.mxu1 %v5309_v17 }
 0x1e1   :  { %4277 = vmatpush3.msra.mxu1 %v5309_v17 }
 0x1e2   :  { %4278 = vmatprep.subr.mxu1 %v5313_v18 }
 0x1e3   :  { %4279 = vmatpush3.msra.mxu1 %v5313_v18 }
 0x1e4   :  { %4280 = vmatprep.subr.mxu1 %v478_v63 }
 0x1e5   :  { %4281 = vmatpush3.msra.mxu1 %v478_v63 }
 0x1e6   :  { %4282 = vmatprep.subr.mxu1 %v477_v0 }
 0x1e7   :  { %4283 = vmatpush3.msra.mxu1 %v477_v0 }
 0x1e8   :  { %4284 = vmatprep.subr.mxu1 %v476_v1 }
 0x1e9   :  { %4285 = vmatpush3.msra.mxu1 %v476_v1 }
 0x1ea   :  { %4286 = vmatprep.subr.mxu1 %v475_v2 }
 0x1eb   :  { %4287 = vmatpush3.msra.mxu1 %v475_v2 }
 0x26c   :  { %v4086_v5 = vpop.f32.mrf.mxu1 }
 0x26d   :  { %v434_v13 = vadd.f32 %v4086_v5, %v5392_v4 }
 0x26e   :  { %v428_v14 = vpop.f32.mrf.mxu1 }
 0x26f   :  { %v429_v15 = vadd.f32 %v5392_v4, %v428_v14  ;;  %v468_v18 = vmax.f32 %v434_v13, 0.0 }
 0x270   :  { %v4089_v16 = vpop.f32.mrf.mxu1 }
 0x271   :  { %v467_v17 = vmax.f32 %v429_v15, 0.0  ;;  %v444_v37 = vadd.f32 %v4089_v16, %v5392_v4 }
 0x272   :  { %v438_v28 = vpop.f32.mrf.mxu1 }
 0x273   :  { %v439_v39 = vadd.f32 %v5392_v4, %v438_v28  ;;  %4128 = vmatprep.mubr.f32.mxu0 %v467_v17  ;;  %v470_v40 = vmax.f32 %v444_v37, 0.0 }
 0x274   :  { %v4092_v21 = vpop.f32.mrf.mxu1  ;;  %4129 = vmatmul.mubr.f32.vlgmr.msra.gmra.mxu0 %v468_v18 }
 0x275   :  { %v469_v29 = vmax.f32 %v439_v39, 0.0  ;;  %v454_v23 = vadd.f32 %v4092_v21, %v5392_v4 }
 0x276   :  { %v448_v59 = vpop.f32.mrf.mxu1 }
 0x277   :  { %v449_v61 = vadd.f32 %v5392_v4, %v448_v59  ;;  %4131 = vmatprep.mubr.f32.mxu0 %v469_v29  ;;  %v472_v33 = vmax.f32 %v454_v23, 0.0 }
 0x278   :  { %v4095_v60 = vpop.f32.mrf.mxu1  ;;  %4132 = vmatmul.mubr.f32.gmra.mxu0 %v470_v40 }
 0x279   :  { %v471_v43 = vmax.f32 %v449_v61, 0.0  ;;  %v464_v19 = vadd.f32 %v4095_v60, %v5392_v4  ;;  %v5501_v60 = vld [vmem:[#allocation5 + $0xf8] sm:$0xff] }
 0x27a   :  { %v458_v44 = vpop.f32.mrf.mxu1 }
 0x27b   :  { %v459_v45 = vadd.f32 %v5392_v4, %v458_v44  ;;  %4134 = vmatprep.mubr.f32.mxu0 %v471_v43  ;;  %v474_v58 = vmax.f32 %v464_v19, 0.0 }
 0x27c   :  { %4135 = vmatmul.mubr.f32.gmra.mxu0 %v472_v33 }
 0x27d   :  { %v473_v27 = vmax.f32 %v459_v45, 0.0 }
 0x27f   :  { %4137 = vmatprep.mubr.f32.mxu0 %v473_v27 }
 0x280   :  { %4138 = vmatmul.mubr.f32.gmra.mxu0 %v474_v58 }
 0x281   :  { %4192 = vmatprep.mubr.msk.f32.mxu0 %vm97_vm0, %v5068_v3 }
 0x28c   :  { %v4174_v22 = vpop.f32.mrf.mxu1 }
 0x28e   :  { %v739_v24 = vpop.f32.mrf.mxu1 }
 0x290   :  { %v4177_v56 = vpop.f32.mrf.mxu1 }
 0x291   :  { %4184 = vmatprep.subr.mxu0 %v4177_v56 }
 0x292   :  { %v749_v62 = vpop.f32.mrf.mxu1  ;;  %4185 = vmatpush3.msra.mxu0 %v4177_v56 }
 0x293   :  { %4186 = vmatprep.subr.mxu0 %v749_v62 }
 0x294   :  { %v4180_v57 = vpop.f32.mrf.mxu1  ;;  %4187 = vmatpush3.msra.mxu0 %v749_v62 }
 0x295   :  { %4188 = vmatprep.subr.mxu0 %v4174_v22 }
 0x296   :  { %v759_v26 = vpop.f32.mrf.mxu1  ;;  %4189 = vmatpush3.msra.mxu0 %v4174_v22 }
 0x297   :  { %4190 = vmatprep.subr.mxu0 %v739_v24 }
 0x298   :  { %v4183_v35 = vpop.f32.mrf.mxu1  ;;  %4191 = vmatpush3.msra.mxu0 %v739_v24 }
 0x299   :  { %4193 = vmatmul.mubr.msk.f32.vlgmr.msra.gmra.mxu0 %vm97_vm0, %v5075_v6  ;;  %4198 = vmatprep.subr.mxu0 %v4183_v35  ;;  %v6348_v6 = vld [vmem:[#allocation10_spill] sm:$0xff] }
 0x29a   :  { %v769_v3 = vpop.f32.mrf.mxu1  ;;  %4199 = vmatpush3.msra.mxu0 %v4183_v35  ;;  %4195 = vmatprep.mubr.msk.f32.mxu0 %vm97_vm0, %v5080_v7  ;;  %v6349_v7 = vld [vmem:[#allocation11_spill] sm:$0xff] }
 0x29b   :  { %4200 = vmatprep.subr.mxu0 %v769_v3 }
 0x29c   :  { %4201 = vmatpush3.msra.mxu0 %v769_v3 }
 0x29d   :  { %4196 = vmatmul.mubr.msk.f32.gmra.mxu0 %vm97_vm0, %v5089_v8  ;;  %4202 = vmatprep.subr.mxu0 %v4180_v57  ;;  %v6350_v8 = vld [vmem:[#allocation12_spill] sm:$0xff] }
 0x29e   :  { %4203 = vmatpush3.msra.mxu0 %v4180_v57  ;;  %4206 = vmatprep.mubr.msk.f32.mxu0 %vm97_vm0, %v5094_v9  ;;  %v6351_v9 = vld [vmem:[#allocation13_spill] sm:$0xff] }
 0x29f   :  { %4204 = vmatprep.subr.mxu0 %v759_v26 }
 0x2a0   :  { %4205 = vmatpush3.msra.mxu0 %v759_v26 }
 0x2a1   :  { %4207 = vmatmul.mubr.msk.f32.vlgmr.msra.gmra.mxu0 %vm97_vm0, %v5103_v10  ;;  %4212 = vmatprep.subr.mxu0 %v5159_v46  ;;  %v6352_v10 = vld [vmem:[#allocation14_spill] sm:$0xff] }
 0x2a2   :  { %4209 = vmatprep.mubr.msk.f32.mxu0 %vm97_vm0, %v5108_v11  ;;  %4213 = vmatpush3.msra.mxu0 %v5159_v46  ;;  %v6353_v11 = vld [vmem:[#allocation15_spill] sm:$0xff] }
 0x2a3   :  { %4214 = vmatprep.subr.mxu0 %v5166_v47 }
 0x2a4   :  { %4215 = vmatpush3.msra.mxu0 %v5166_v47 }
 0x2a5   :  { %4210 = vmatmul.mubr.msk.f32.gmra.mxu0 %vm97_vm0, %v5117_v12  ;;  %4216 = vmatprep.subr.mxu0 %v5173_v48 }
 0x2a6   :  { %4217 = vmatpush3.msra.mxu0 %v5173_v48 }
 0x2a7   :  { %4218 = vmatprep.subr.mxu0 %v5180_v49 }
 0x2a8   :  { %4219 = vmatpush3.msra.mxu0 %v5180_v49 }
 0x2a9   :  { %4220 = vmatprep.subr.mxu0 %v5187_v50 }
 0x2aa   :  { %4221 = vmatpush3.msra.mxu0 %v5187_v50 }
 0x2ab   :  { %4222 = vmatprep.subr.mxu0 %v5194_v51 }
 0x2ac   :  { %4223 = vmatpush3.msra.mxu0 %v5194_v51 }
 0x2ad   :  { %4224 = vmatprep.subr.mxu0 %v5201_v52 }
 0x2ae   :  { %4225 = vmatpush3.msra.mxu0 %v5201_v52 }
 0x2af   :  { %4226 = vmatprep.subr.mxu0 %v5208_v53 }
 0x2b0   :  { %4227 = vmatpush3.msra.mxu0 %v5208_v53  ;;  %v3573_v53 = vld [vmem:[%s6310_s3 + $0x1] ss:$0 sm:$0xff] }
 0x2b1   :  { %4228 = vmatprep.subr.mxu0 %v5215_v54 }
 0x2b2   :  { %4229 = vmatpush3.msra.mxu0 %v5215_v54 }
 0x2b3   :  { %4230 = vmatprep.subr.mxu0 %v5222_v55 }
 0x2b4   :  { %4231 = vmatpush3.msra.mxu0 %v5222_v55 }
 0x2b5   :  { %4232 = vmatprep.subr.mxu0 %v6348_v6 }
 0x2b6   :  { %4233 = vmatpush3.msra.mxu0 %v6348_v6 }
 0x2b7   :  { %4234 = vmatprep.subr.mxu0 %v6349_v7 }
 0x2b8   :  { %4235 = vmatpush3.msra.mxu0 %v6349_v7 }
 0x2b9   :  { %4236 = vmatprep.subr.mxu0 %v6350_v8 }
 0x2ba   :  { %4237 = vmatpush3.msra.mxu0 %v6350_v8 }
 0x2bb   :  { %4238 = vmatprep.subr.mxu0 %v6351_v9 }
 0x2bc   :  { %4239 = vmatpush3.msra.mxu0 %v6351_v9 }
 0x2bd   :  { %4240 = vmatprep.subr.mxu0 %v6352_v10 }
 0x2be   :  { %4241 = vmatpush3.msra.mxu0 %v6352_v10 }
 0x2bf   :  { %4242 = vmatprep.subr.mxu0 %v6353_v11 }
 0x2c0   :  { %4243 = vmatpush3.msra.mxu0 %v6353_v11 }
 0x2c1   :  { %4300 = vmatprep.subr.mxu0 %v5501_v60 }
 0x334   :  { %v5450_v12 = vpop.f32.mrf.mxu0 }
 0x335   :  { %6354 = vst [vmem:[#allocation10_spill] sm:$0xff] %v5450_v12 }
 0x336   :  { %v5452_v46 = vpop.f32.mrf.mxu0 }
 0x337   :  { %6355 = vst [vmem:[#allocation11_spill] sm:$0xff] %v5452_v46 }
 0x338   :  { %v5454_v47 = vpop.f32.mrf.mxu0 }
 0x339   :  { %6356 = vst [vmem:[#allocation12_spill] sm:$0xff] %v5454_v47 }
 0x33a   :  { %v5456_v48 = vpop.f32.mrf.mxu0 }
 0x33b   :  { %6357 = vst [vmem:[#allocation13_spill] sm:$0xff] %v5456_v48 }
 0x33c   :  { %v5458_v49 = vpop.f32.mrf.mxu0 }
 0x33d   :  { %6358 = vst [vmem:[#allocation14_spill] sm:$0xff] %v5458_v49 }
 0x33e   :  { %v5460_v50 = vpop.f32.mrf.mxu0 }
 0x33f   :  { %6359 = vst [vmem:[#allocation15_spill] sm:$0xff] %v5460_v50 }
 0x340   :  { %v5462_v51 = vpop.f32.mrf.mxu0 }
 0x341   :  { %6360 = vst [vmem:[#allocation16_spill] sm:$0xff] %v5462_v51 }
 0x342   :  { %v5464_v52 = vpop.f32.mrf.mxu0 }
 0x343   :  { %6361 = vst [vmem:[#allocation17_spill] sm:$0xff] %v5464_v52 }
 0x359   :  { %v4194_v54 = vpop.f32.mrf.mxu0 }
 0x35a   :  { %v957_v55 = vadd.f32 %v4194_v54, %v3573_v53 }
 0x35b   :  { %v844_v25 = vpop.f32.mrf.mxu0 }
 0x35c   :  { %v5469_v30 = vmax.f32 %v957_v55, 0.0  ;;  %v956_v34 = vadd.f32 %v3573_v53, %v844_v25 }
 0x35d   :  { %v4197_v42 = vpop.f32.mrf.mxu0 }
 0x35e   :  { %v5471_v31 = vmax.f32 %v956_v34, 0.0  ;;  %v959_v20 = vadd.f32 %v4197_v42, %v3573_v53  ;;  %v973_v41 = vmul.f32 %v5469_v30, %v5469_v30 }
 0x35f   :  { %v854_v32 = vpop.f32.mrf.mxu0 }
 0x360   :  { %v5475_v36 = vmax.f32 %v959_v20, 0.0  ;;  %v958_v38 = vadd.f32 %v3573_v53, %v854_v32  ;;  %982 = vadd.xlane.f32.xlu1 %v973_v41  ;;  %v972_v63 = vmul.f32 %v5471_v31, %v5471_v31 }
 0x361   :  { %v4208_v0 = vpop.f32.mrf.mxu0 }
 0x362   :  { %v5479_v1 = vmax.f32 %v958_v38, 0.0  ;;  %v961_v2 = vadd.f32 %v4208_v0, %v3573_v53  ;;  %980 = vadd.xlane.f32.xlu0 %v972_v63  ;;  %v975_v5 = vmul.f32 %v5475_v36, %v5475_v36 }
 0x363   :  { %v929_v13 = vpop.f32.mrf.mxu0 }
 0x364   :  { %v5483_v14 = vmax.f32 %v961_v2, 0.0  ;;  %v960_v15 = vadd.f32 %v3573_v53, %v929_v13  ;;  %986 = vadd.xlane.f32.xlu1 %v975_v5  ;;  %v974_v16 = vmul.f32 %v5479_v1, %v5479_v1 }
 0x365   :  { %v4211_v17 = vpop.f32.mrf.mxu0 }
 0x366   :  { %v5487_v18 = vmax.f32 %v960_v15, 0.0  ;;  %v963_v37 = vadd.f32 %v4211_v17, %v3573_v53  ;;  %984 = vadd.xlane.f32.xlu0 %v974_v16  ;;  %v977_v28 = vmul.f32 %v5483_v14, %v5483_v14 }
 0x367   :  { %v939_v39 = vpop.f32.mrf.mxu0 }
 0x368   :  { %v5491_v21 = vmax.f32 %v963_v37, 0.0  ;;  %v962_v29 = vadd.f32 %v3573_v53, %v939_v39  ;;  %990 = vadd.xlane.f32.xlu1 %v977_v28  ;;  %v976_v40 = vmul.f32 %v5487_v18, %v5487_v18 }
 0x36a   :  { %v5495_v23 = vmax.f32 %v962_v29, 0.0  ;;  %988 = vadd.xlane.f32.xlu0 %v976_v40  ;;  %v979_v59 = vmul.f32 %v5491_v21, %v5491_v21 }
 0x36c   :  { %994 = vadd.xlane.f32.xlu1 %v979_v59  ;;  %v978_v61 = vmul.f32 %v5495_v23, %v5495_v23 }
 0x36e   :  { %992 = vadd.xlane.f32.xlu0 %v978_v61 }
 0x3e9   :  { %v983_v43 = vpop.xlane.xlu1 %982 }
 0x3ea   :  { %4817 = vrsqrt.f32 %v983_v43  ;;  %vm1005_vm2 = vcmp.eq.f32.partialorder %v983_v43, inf  ;;  %vm1007_vm3 = vcmp.eq.f32.partialorder %v983_v43, 0.0  ;;  %v1008_v57 = vand.u32 2147483648, %v983_v43 }
 0x3eb   :  { %v981_v33 = vpop.xlane.xlu0 %980 }
 0x3ec   :  { %4819 = vrsqrt.f32 %v981_v33  ;;  %vm998_vm4 = vcmp.eq.f32.partialorder %v981_v33, inf  ;;  %vm1000_vm5 = vcmp.eq.f32.partialorder %v981_v33, 0.0  ;;  %v1001_v7 = vand.u32 2147483648, %v981_v33 }
 0x3ed   :  { %v987_v19 = vpop.xlane.xlu1 %986 }
 0x3ee   :  { %4821 = vrsqrt.f32 %v987_v19  ;;  %vm1019_vm6 = vcmp.eq.f32.partialorder %v987_v19, inf  ;;  %v1022_v8 = vand.u32 2147483648, %v987_v19  ;;  %vm1021_vm7 = vcmp.eq.f32.partialorder %v987_v19, 0.0 }
 0x3ef   :  { %v985_v44 = vpop.xlane.xlu0 %984 }
 0x3f0   :  { %4823 = vrsqrt.f32 %v985_v44  ;;  %vm1012_vm8 = vcmp.eq.f32.partialorder %v985_v44, inf  ;;  %vm1014_vm9 = vcmp.eq.f32.partialorder %v985_v44, 0.0  ;;  %v1015_v55 = vand.u32 2147483648, %v985_v44 }
 0x3f1   :  { %v991_v45 = vpop.xlane.xlu1 %990 }
 0x3f2   :  { %4825 = vrsqrt.f32 %v991_v45  ;;  %vm1033_vm10 = vcmp.eq.f32.partialorder %v991_v45, inf  ;;  %vm1035_vm11 = vcmp.eq.f32.partialorder %v991_v45, 0.0  ;;  %v1036_v32 = vand.u32 2147483648, %v991_v45 }
 0x3f3   :  { %v5504_v27 = vpop.xlane.xlu0 %988 }
 0x3f4   :  { %4827 = vrsqrt.f32 %v5504_v27  ;;  %vm1026_vm12 = vcmp.eq.f32.partialorder %v5504_v27, inf  ;;  %vm1028_vm13 = vcmp.eq.f32.partialorder %v5504_v27, 0.0  ;;  %v1029_v13 = vand.u32 2147483648, %v5504_v27 }
 0x3f5   :  { %v5507_v58 = vpop.xlane.xlu1 %994 }
 0x3f6   :  { %4829 = vrsqrt.f32 %v5507_v58  ;;  %vm1047_vm14 = vcmp.eq.f32.partialorder %v5507_v58, inf  ;;  %vm1049_vm15 = vcmp.eq.f32.partialorder %v5507_v58, 0.0  ;;  %v1050_v39 = vand.u32 2147483648, %v5507_v58 }
 0x3f7   :  { %v4818_v22 = vpop.eup %4817  ;;  %v5510_v24 = vpop.xlane.xlu0 %992 }
 0x3f8   :  { %v1004_v56 = vmul.f32 %v4818_v22, %v983_v43  ;;  %4831 = vrsqrt.f32 %v5510_v24  ;;  %vm1040_vm1 = vcmp.eq.f32.partialorder %v5510_v24, inf  ;;  %v1043_v22 = vand.u32 2147483648, %v5510_v24 }
 0x3f9   :  { %v4820_v62 = vpop.eup %4819 }
 0x3fa   :  { %v1006_v26 = vsel %vm1005_vm2, %v983_v43, %v1004_v56  ;;  %v997_v35 = vmul.f32 %v4820_v62, %v981_v33  ;;  %vm1042_vm2 = vcmp.eq.f32.partialorder %v5510_v24, 0.0 }
 0x3fb   :  { %v4822_v3 = vpop.eup %4821  ;;  %v1009_v6 = vsel %vm1007_vm3, %v1008_v57, %v1006_v26 }
 0x3fc   :  { %v1053_v9 = vmax.f32 %v1009_v6, 1e-12  ;;  %v999_v10 = vsel %vm998_vm4, %v981_v33, %v997_v35  ;;  %v1018_v11 = vmul.f32 %v4822_v3, %v987_v19 }
 0x3fd   :  { %v4824_v53 = vpop.eup %4823  ;;  %v1002_v54 = vsel %vm1000_vm5, %v1001_v7, %v999_v10  ;;  %v1417_v7 = vld [vmem:[#allocation5 + $0xf0] sm:$0xff] }
 0x3fe   :  { %v1052_v25 = vmax.f32 %v1002_v54, 1e-12  ;;  %v1020_v34 = vsel %vm1019_vm6, %v987_v19, %v1018_v11  ;;  %v1011_v42 = vmul.f32 %v4824_v53, %v985_v44  ;;  %4833 = vrcp.f32 %v1053_v9  ;;  %v1416_v9 = vld [vmem:[#allocation5 + $0xe8] sm:$0xff]  ;;  %v1414_v54 = vld [vmem:[#allocation5 + $0xd8] sm:$0xff] }
 0x3ff   :  { %v4826_v20 = vpop.eup %4825  ;;  %v1023_v41 = vsel %vm1021_vm7, %v1022_v8, %v1020_v34  ;;  %v1412_v34 = vld [vmem:[#allocation5 + $0xc8] sm:$0xff] }
 0x400   :  { %4835 = vrcp.f32 %v1052_v25  ;;  %v1055_v38 = vmax.f32 %v1023_v41, 1e-12  ;;  %v1013_v63 = vsel %vm1012_vm8, %v985_v44, %v1011_v42  ;;  %v1032_v0 = vmul.f32 %v4826_v20, %v991_v45  ;;  %v1409_v20 = vld [vmem:[#allocation5 + $0xb0] sm:$0xff]  ;;  %v1408_v41 = vld [vmem:[#allocation5 + $0xa8] sm:$0xff] }
 0x401   :  { %v4828_v2 = vpop.eup %4827  ;;  %v1016_v5 = vsel %vm1014_vm9, %v1015_v55, %v1013_v63  ;;  %v1403_v63 = vld [vmem:[#allocation5 + $0x80] sm:$0xff] }
 0x402   :  { %v1054_v15 = vmax.f32 %v1016_v5, 1e-12  ;;  %v1034_v16 = vsel %vm1033_vm10, %v991_v45, %v1032_v0  ;;  %v1025_v17 = vmul.f32 %v4828_v2, %v5504_v27  ;;  %4837 = vrcp.f32 %v1055_v38  ;;  %v1404_v38 = vld [vmem:[#allocation5 + $0x88] sm:$0xff] }
 0x403   :  { %v4830_v37 = vpop.eup %4829  ;;  %v1037_v28 = vsel %vm1035_vm11, %v1036_v32, %v1034_v16  ;;  %v1405_v32 = vld [vmem:[#allocation5 + $0x90] sm:$0xff] }
 0x404   :  { %4839 = vrcp.f32 %v1054_v15  ;;  %v1057_v29 = vmax.f32 %v1037_v28, 1e-12  ;;  %v1027_v40 = vsel %vm1026_vm12, %v5504_v27, %v1025_v17  ;;  %v1046_v59 = vmul.f32 %v4830_v37, %v5507_v58 }
 0x405   :  { %v4832_v61 = vpop.eup %4831  ;;  %v1030_v43 = vsel %vm1028_vm13, %v1029_v13, %v1027_v40 }
 0x406   :  { %v1056_v33 = vmax.f32 %v1030_v43, 1e-12  ;;  %v1048_v19 = vsel %vm1047_vm14, %v5507_v58, %v1046_v59  ;;  %v1039_v44 = vmul.f32 %v4832_v61, %v5510_v24  ;;  %4841 = vrcp.f32 %v1057_v29 }
 0x407   :  { %v1051_v45 = vsel %vm1049_vm15, %v1050_v39, %v1048_v19 }
 0x408   :  { %4843 = vrcp.f32 %v1056_v33  ;;  %v1059_v56 = vmax.f32 %v1051_v45, 1e-12  ;;  %v1041_v62 = vsel %vm1040_vm1, %v5510_v24, %v1039_v44 }
 0x409   :  { %v1044_v57 = vsel %vm1042_vm2, %v1043_v22, %v1041_v62 }
 0x40a   :  { %v1058_v27 = vmax.f32 %v1044_v57, 1e-12  ;;  %4845 = vrcp.f32 %v1059_v56 }
 0x40b   :  { %v4834_v26 = vpop.eup %4833 }
 0x40c   :  { %4847 = vrcp.f32 %v1058_v27  ;;  %v5535_v3 = vmul.f32 %v4834_v26, %v5469_v30  ;;  %v5557_v26 = vld [vmem:[%s6307_s0] sm:$0xff] }
 0x40d   :  { %v4836_v58 = vpop.eup %4835 }
 0x40e   :  { %v1061_v35 = vmul.f32 %v4836_v58, %v5471_v31  ;;  %v1415_v31 = vld [vmem:[#allocation5 + $0xe0] sm:$0xff] }
 0x40f   :  { %v4838_v6 = vpop.eup %4837 }
 0x410   :  { %4244 = vmatprep.mubr.f32.mxu0 %v1061_v35  ;;  %v1067_v10 = vmul.f32 %v4838_v6, %v5475_v36 }
 0x411   :  { %v4840_v8 = vpop.eup %4839  ;;  %4245 = vmatmul.mubr.f32.vlgmr.msra.gmra.mxu0 %v5535_v3 }
 0x412   :  { %4301 = vmatpush3.msra.mxu0 %v5501_v60  ;;  %v1065_v24 = vmul.f32 %v4840_v8, %v5479_v1  ;;  %v1413_v1 = vld [vmem:[#allocation5 + $0xd0] sm:$0xff] }
 0x413   :  { %4302 = vmatprep.subr.mxu0 %v1417_v7  ;;  %v4842_v11 = vpop.eup %4841 }
 0x414   :  { %4303 = vmatpush3.msra.mxu0 %v1417_v7  ;;  %4247 = vmatprep.mubr.f32.mxu0 %v1065_v24  ;;  %v1071_v60 = vmul.f32 %v4842_v11, %v5483_v14  ;;  %v1410_v14 = vld [vmem:[#allocation5 + $0xb8] sm:$0xff] }
 0x415   :  { %v4844_v30 = vpop.eup %4843  ;;  %4304 = vmatprep.subr.mxu0 %v1416_v9  ;;  %4248 = vmatmul.mubr.f32.gmra.mxu0 %v1067_v10  ;;  %v5578_v11 = vld [vmem:[%s6307_s0 + $0x18] sm:$0xff] }
 0x416   :  { %4305 = vmatpush3.msra.mxu0 %v1416_v9  ;;  %v1069_v53 = vmul.f32 %v4844_v30, %v5487_v18  ;;  %v1411_v18 = vld [vmem:[#allocation5 + $0xc0] sm:$0xff] }
 0x417   :  { %4306 = vmatprep.subr.mxu0 %v1415_v31  ;;  %v4846_v55 = vpop.eup %4845  ;;  %v5592_v30 = vld [vmem:[%s6307_s0 + $0x28] sm:$0xff] }
 0x418   :  { %4307 = vmatpush3.msra.mxu0 %v1415_v31  ;;  %4250 = vmatprep.mubr.f32.mxu0 %v1069_v53  ;;  %v1075_v42 = vmul.f32 %v4846_v55, %v5491_v21  ;;  %v1406_v21 = vld [vmem:[#allocation5 + $0x98] sm:$0xff] }
 0x419   :  { %v4848_v25 = vpop.eup %4847  ;;  %4308 = vmatprep.subr.mxu0 %v1414_v54  ;;  %4251 = vmatmul.mubr.f32.gmra.mxu0 %v1071_v60  ;;  %v5585_v31 = vld [vmem:[%s6307_s0 + $0x20] sm:$0xff] }
 0x41a   :  { %4309 = vmatpush3.msra.mxu0 %v1414_v54  ;;  %v1073_v36 = vmul.f32 %v4848_v25, %v5495_v23  ;;  %v1407_v23 = vld [vmem:[#allocation5 + $0xa0] sm:$0xff]  ;;  %v5606_v54 = vld [vmem:[%s6307_s0 + $0x38] sm:$0xff] }
 0x41b   :  { %4310 = vmatprep.subr.mxu0 %v1413_v1 }
 0x41c   :  { %4311 = vmatpush3.msra.mxu0 %v1413_v1  ;;  %4253 = vmatprep.mubr.f32.mxu0 %v1073_v36 }
 0x41d   :  { %4312 = vmatprep.subr.mxu0 %v1412_v34  ;;  %4254 = vmatmul.mubr.f32.gmra.mxu0 %v1075_v42 }
 0x41e   :  { %4313 = vmatpush3.msra.mxu0 %v1412_v34  ;;  %4332 = vmatprep.mubr.f32.mxu0 %v1061_v35 }
 0x41f   :  { %4314 = vmatprep.subr.mxu0 %v1411_v18 }
 0x420   :  { %4315 = vmatpush3.msra.mxu0 %v1411_v18 }
 0x421   :  { %4316 = vmatprep.subr.mxu0 %v1410_v14 }
 0x422   :  { %4317 = vmatpush3.msra.mxu0 %v1410_v14  ;;  %v3587_v14 = vld [vmem:[%s6310_s3 + $0x2] ss:$0 sm:$0xff] }
 0x423   :  { %4318 = vmatprep.subr.mxu0 %v1409_v20 }
 0x424   :  { %4319 = vmatpush3.msra.mxu0 %v1409_v20 }
 0x425   :  { %4320 = vmatprep.subr.mxu0 %v1408_v41 }
 0x426   :  { %4321 = vmatpush3.msra.mxu0 %v1408_v41 }
 0x427   :  { %4322 = vmatprep.subr.mxu0 %v1407_v23 }
 0x428   :  { %4323 = vmatpush3.msra.mxu0 %v1407_v23 }
 0x429   :  { %4324 = vmatprep.subr.mxu0 %v1406_v21 }
 0x42a   :  { %4325 = vmatpush3.msra.mxu0 %v1406_v21 }
 0x42b   :  { %4326 = vmatprep.subr.mxu0 %v1405_v32 }
 0x42c   :  { %4327 = vmatpush3.msra.mxu0 %v1405_v32 }
 0x42d   :  { %4328 = vmatprep.subr.mxu0 %v1404_v38 }
 0x42e   :  { %4329 = vmatpush3.msra.mxu0 %v1404_v38 }
 0x42f   :  { %4330 = vmatprep.subr.mxu0 %v1403_v63 }
 0x430   :  { %4331 = vmatpush3.msra.mxu0 %v1403_v63 }
 0x431   :  { %4333 = vmatmul.mubr.f32.vlgmr.msra.gmra.mxu0 %v5535_v3 }
 0x432   :  { %4335 = vmatprep.mubr.f32.mxu0 %v1065_v24  ;;  %v5564_v24 = vld [vmem:[%s6307_s0 + $0x8] sm:$0xff] }
 0x435   :  { %4336 = vmatmul.mubr.f32.gmra.mxu0 %v1067_v10  ;;  %v5571_v10 = vld [vmem:[%s6307_s0 + $0x10] sm:$0xff] }
 0x436   :  { %4338 = vmatprep.mubr.f32.mxu0 %v1069_v53  ;;  %v5599_v53 = vld [vmem:[%s6307_s0 + $0x30] sm:$0xff] }
 0x439   :  { %4339 = vmatmul.mubr.f32.gmra.mxu0 %v1071_v60 }
 0x43a   :  { %4341 = vmatprep.mubr.f32.mxu0 %v1073_v36 }
 0x43d   :  { %4342 = vmatmul.mubr.f32.gmra.mxu0 %v1075_v42 }
 0x4d1   :  { %v4246_v0 = vpop.f32.mrf.mxu0 }
 0x4d2   :  { %v1171_v2 = vadd.f32 %v4246_v0, %v5392_v4 }
 0x4d3   :  { %v1165_v5 = vpop.f32.mrf.mxu0 }
 0x4d4   :  { %v1166_v13 = vadd.f32 %v5392_v4, %v1165_v5  ;;  %v1205_v17 = vmax.f32 %v1171_v2, 0.0 }
 0x4d5   :  { %v4249_v15 = vpop.f32.mrf.mxu0 }
 0x4d6   :  { %v1204_v16 = vmax.f32 %v1166_v13, 0.0  ;;  %v1181_v37 = vadd.f32 %v4249_v15, %v5392_v4 }
 0x4d7   :  { %v1175_v28 = vpop.f32.mrf.mxu0 }
 0x4d8   :  { %v1176_v39 = vadd.f32 %v5392_v4, %v1175_v28  ;;  %4288 = vmatprep.mubr.f32.mxu1 %v1204_v16  ;;  %v1207_v59 = vmax.f32 %v1181_v37, 0.0 }
 0x4d9   :  { %v4252_v29 = vpop.f32.mrf.mxu0  ;;  %4289 = vmatmul.mubr.f32.vlgmr.msra.gmra.mxu1 %v1205_v17 }
 0x4da   :  { %v1206_v40 = vmax.f32 %v1176_v39, 0.0  ;;  %v1191_v61 = vadd.f32 %v4252_v29, %v5392_v4 }
 0x4db   :  { %v1185_v43 = vpop.f32.mrf.mxu0 }
 0x4dc   :  { %v1186_v33 = vadd.f32 %v5392_v4, %v1185_v43  ;;  %4291 = vmatprep.mubr.f32.mxu1 %v1206_v40  ;;  %v1209_v45 = vmax.f32 %v1191_v61, 0.0 }
 0x4dd   :  { %v4255_v19 = vpop.f32.mrf.mxu0  ;;  %4292 = vmatmul.mubr.f32.gmra.mxu1 %v1207_v59 }
 0x4de   :  { %v1208_v44 = vmax.f32 %v1186_v33, 0.0  ;;  %v1201_v22 = vadd.f32 %v4255_v19, %v5392_v4 }
 0x4df   :  { %v1195_v56 = vpop.f32.mrf.mxu0 }
 0x4e0   :  { %v1196_v62 = vadd.f32 %v5392_v4, %v1195_v56  ;;  %4294 = vmatprep.mubr.f32.mxu1 %v1208_v44  ;;  %v1211_v27 = vmax.f32 %v1201_v22, 0.0 }
 0x4e1   :  { %4295 = vmatmul.mubr.f32.gmra.mxu1 %v1209_v45 }
 0x4e2   :  { %v1210_v57 = vmax.f32 %v1196_v62, 0.0 }
 0x4e4   :  { %4297 = vmatprep.mubr.f32.mxu1 %v1210_v57 }
 0x4e5   :  { %4298 = vmatmul.mubr.f32.gmra.mxu1 %v1211_v27 }
 0x4e6   :  { %4352 = vmatprep.mubr.msk.f32.mxu1 %vm97_vm0, %v5557_v26 }
 0x4f1   :  { %v4334_v58 = vpop.f32.mrf.mxu0 }
 0x4f3   :  { %v1485_v35 = vpop.f32.mrf.mxu0 }
 0x4f5   :  { %v4337_v3 = vpop.f32.mrf.mxu0 }
 0x4f6   :  { %4344 = vmatprep.subr.mxu1 %v4337_v3 }
 0x4f7   :  { %v1495_v6 = vpop.f32.mrf.mxu0  ;;  %4345 = vmatpush3.msra.mxu1 %v4337_v3  ;;  %v5671_v3 = vld [vmem:[%s6311_s4 + $0x70] sm:$0xff] }
 0x4f8   :  { %4346 = vmatprep.subr.mxu1 %v1495_v6 }
 0x4f9   :  { %v4340_v4 = vpop.f32.mrf.mxu0  ;;  %4347 = vmatpush3.msra.mxu1 %v1495_v6  ;;  %v5678_v6 = vld [vmem:[%s6311_s4 + $0x68] sm:$0xff] }
 0x4fa   :  { %4348 = vmatprep.subr.mxu1 %v4334_v58 }
 0x4fb   :  { %v1505_v7 = vpop.f32.mrf.mxu0  ;;  %4349 = vmatpush3.msra.mxu1 %v4334_v58 }
 0x4fc   :  { %4350 = vmatprep.subr.mxu1 %v1485_v35 }
 0x4fd   :  { %v4343_v8 = vpop.f32.mrf.mxu0  ;;  %4351 = vmatpush3.msra.mxu1 %v1485_v35  ;;  %v5664_v35 = vld [vmem:[%s6311_s4 + $0x78] sm:$0xff] }
 0x4fe   :  { %4353 = vmatmul.mubr.msk.f32.vlgmr.msra.gmra.mxu1 %vm97_vm0, %v5564_v24  ;;  %4358 = vmatprep.subr.mxu1 %v4343_v8 }
 0x4ff   :  { %v1515_v9 = vpop.f32.mrf.mxu0  ;;  %4359 = vmatpush3.msra.mxu1 %v4343_v8  ;;  %4355 = vmatprep.mubr.msk.f32.mxu1 %vm97_vm0, %v5571_v10  ;;  %v5699_v8 = vld [vmem:[%s6311_s4 + $0x50] sm:$0xff] }
 0x500   :  { %4360 = vmatprep.subr.mxu1 %v1515_v9 }
 0x501   :  { %4361 = vmatpush3.msra.mxu1 %v1515_v9  ;;  %v5706_v9 = vld [vmem:[%s6311_s4 + $0x48] sm:$0xff] }
 0x502   :  { %4356 = vmatmul.mubr.msk.f32.gmra.mxu1 %vm97_vm0, %v5578_v11  ;;  %4362 = vmatprep.subr.mxu1 %v4340_v4 }
 0x503   :  { %4363 = vmatpush3.msra.mxu1 %v4340_v4  ;;  %4366 = vmatprep.mubr.msk.f32.mxu1 %vm97_vm0, %v5585_v31  ;;  %v5685_v4 = vld [vmem:[%s6311_s4 + $0x60] sm:$0xff] }
 0x504   :  { %4364 = vmatprep.subr.mxu1 %v1505_v7 }
 0x505   :  { %4365 = vmatpush3.msra.mxu1 %v1505_v7  ;;  %v5692_v7 = vld [vmem:[%s6311_s4 + $0x58] sm:$0xff] }
 0x506   :  { %4367 = vmatmul.mubr.msk.f32.vlgmr.msra.gmra.mxu1 %vm97_vm0, %v5592_v30  ;;  %4372 = vmatprep.subr.mxu1 %v5664_v35 }
 0x507   :  { %4369 = vmatprep.mubr.msk.f32.mxu1 %vm97_vm0, %v5599_v53  ;;  %4373 = vmatpush3.msra.mxu1 %v5664_v35 }
 0x508   :  { %4374 = vmatprep.subr.mxu1 %v5671_v3 }
 0x509   :  { %4375 = vmatpush3.msra.mxu1 %v5671_v3 }
 0x50a   :  { %4370 = vmatmul.mubr.msk.f32.gmra.mxu1 %vm97_vm0, %v5606_v54  ;;  %4376 = vmatprep.subr.mxu1 %v5678_v6 }
 0x50b   :  { %4377 = vmatpush3.msra.mxu1 %v5678_v6 }
 0x50c   :  { %4378 = vmatprep.subr.mxu1 %v5685_v4 }
 0x50d   :  { %4379 = vmatpush3.msra.mxu1 %v5685_v4 }
 0x50e   :  { %4380 = vmatprep.subr.mxu1 %v5692_v7 }
 0x50f   :  { %4381 = vmatpush3.msra.mxu1 %v5692_v7 }
 0x510   :  { %4382 = vmatprep.subr.mxu1 %v5699_v8 }
 0x511   :  { %4383 = vmatpush3.msra.mxu1 %v5699_v8 }
 0x512   :  { %4384 = vmatprep.subr.mxu1 %v5706_v9 }
 0x513   :  { %4385 = vmatpush3.msra.mxu1 %v5706_v9 }
 0x599   :  { %v5610_v60 = vpop.f32.mrf.mxu1 }
 0x59a   :  { %6362 = vst [vmem:[#allocation18_spill] sm:$0xff] %v5610_v60 }
 0x59b   :  { %v5612_v55 = vpop.f32.mrf.mxu1 }
 0x59c   :  { %6363 = vst [vmem:[#allocation19_spill] sm:$0xff] %v5612_v55 }
 0x59d   :  { %v5614_v1 = vpop.f32.mrf.mxu1 }
 0x59e   :  { %6364 = vst [vmem:[#allocation20_spill] sm:$0xff] %v5614_v1 }
 0x59f   :  { %v5616_v25 = vpop.f32.mrf.mxu1 }
 0x5a0   :  { %6365 = vst [vmem:[#allocation21_spill] sm:$0xff] %v5616_v25 }
 0x5a1   :  { %v5618_v36 = vpop.f32.mrf.mxu1 }
 0x5a2   :  { %6366 = vst [vmem:[#allocation22_spill] sm:$0xff] %v5618_v36 }
 0x5a3   :  { %v5620_v34 = vpop.f32.mrf.mxu1 }
 0x5a4   :  { %6367 = vst [vmem:[#allocation23_spill] sm:$0xff] %v5620_v34 }
 0x5a5   :  { %v5622_v42 = vpop.f32.mrf.mxu1 }
 0x5a6   :  { %6368 = vst [vmem:[#allocation24_spill] sm:$0xff] %v5622_v42 }
 0x5a7   :  { %v5624_v18 = vpop.f32.mrf.mxu1 }
 0x5a8   :  { %6369 = vst [vmem:[#allocation25_spill] sm:$0xff] %v5624_v18 }
 0x5be   :  { %v4354_v20 = vpop.f32.mrf.mxu1 }
 0x5bf   :  { %v1703_v41 = vadd.f32 %v4354_v20, %v3587_v14  ;;  %v5720_v20 = vld [vmem:[%s6311_s4 + $0x38] sm:$0xff] }
 0x5c0   :  { %v1590_v23 = vpop.f32.mrf.mxu1 }
 0x5c1   :  { %v5629_v21 = vmax.f32 %v1703_v41, 0.0  ;;  %v1702_v32 = vadd.f32 %v3587_v14, %v1590_v23  ;;  %v5727_v41 = vld [vmem:[%s6311_s4 + $0x30] sm:$0xff]  ;;  %v5734_v23 = vld [vmem:[%s6311_s4 + $0x28] sm:$0xff] }
 0x5c2   :  { %v4357_v38 = vpop.f32.mrf.mxu1  ;;  %6370 = vst [vmem:[#allocation26_spill] sm:$0xff] %v5734_v23 }
 0x5c3   :  { %v5631_v63 = vmax.f32 %v1702_v32, 0.0  ;;  %v1705_v0 = vadd.f32 %v4357_v38, %v3587_v14  ;;  %v1719_v2 = vmul.f32 %v5629_v21, %v5629_v21  ;;  %v5741_v32 = vld [vmem:[%s6311_s4 + $0x20] sm:$0xff]  ;;  %v5748_v38 = vld [vmem:[%s6311_s4 + $0x18] sm:$0xff] }
 0x5c4   :  { %v1600_v5 = vpop.f32.mrf.mxu1  ;;  %6371 = vst [vmem:[#allocation27_spill] sm:$0xff] %v5741_v32  ;;  %6372 = vst [vmem:[#allocation28_spill] sm:$0xff] %v5748_v38 }
 0x5c5   :  { %v5635_v13 = vmax.f32 %v1705_v0, 0.0  ;;  %v1704_v15 = vadd.f32 %v3587_v14, %v1600_v5  ;;  %1728 = vadd.xlane.f32.xlu1 %v1719_v2  ;;  %v1718_v16 = vmul.f32 %v5631_v63, %v5631_v63  ;;  %v5755_v0 = vld [vmem:[%s6311_s4 + $0x10] sm:$0xff]  ;;  %v5762_v2 = vld [vmem:[%s6311_s4 + $0x8] sm:$0xff]  ;;  %v5768_v5 = vld [vmem:[%s6311_s4] sm:$0xff] }
 0x5c6   :  { %v4368_v17 = vpop.f32.mrf.mxu1  ;;  %6373 = vst [vmem:[#allocation29_spill] sm:$0xff] %v5755_v0  ;;  %6374 = vst [vmem:[#allocation30_spill] sm:$0xff] %v5762_v2 }
 0x5c7   :  { %v5639_v37 = vmax.f32 %v1704_v15, 0.0  ;;  %v1707_v28 = vadd.f32 %v4368_v17, %v3587_v14  ;;  %1726 = vadd.xlane.f32.xlu0 %v1718_v16  ;;  %v1721_v39 = vmul.f32 %v5635_v13, %v5635_v13  ;;  %6375 = vst [vmem:[#allocation31_spill] sm:$0xff] %v5768_v5  ;;  %v5773_v15 = vld [vmem:[#allocation5 + $0x178] sm:$0xff]  ;;  %v5778_v17 = vld [vmem:[#allocation7 + $0x70] sm:$0xff] }
 0x5c8   :  { %v1675_v29 = vpop.f32.mrf.mxu1  ;;  %v5776_v16 = vld [vmem:[#allocation7 + $0x78] sm:$0xff] }
 0x5c9   :  { %v5643_v40 = vmax.f32 %v1707_v28, 0.0  ;;  %v1706_v59 = vadd.f32 %v3587_v14, %v1675_v29  ;;  %1732 = vadd.xlane.f32.xlu1 %v1721_v39  ;;  %v1720_v61 = vmul.f32 %v5639_v37, %v5639_v37  ;;  %4416 = vmatprep.subr.mxu0 %v5776_v16  ;;  %v5782_v28 = vld [vmem:[#allocation7 + $0x68] sm:$0xff]  ;;  %v5786_v39 = vld [vmem:[#allocation7 + $0x60] sm:$0xff]  ;;  %v5790_v29 = vld [vmem:[#allocation7 + $0x58] sm:$0xff] }
 0x5ca   :  { %v4371_v43 = vpop.f32.mrf.mxu1  ;;  %4417 = vmatpush3.msra.mxu0 %v5776_v16 }
 0x5cb   :  { %v5647_v33 = vmax.f32 %v1706_v59, 0.0  ;;  %v1709_v19 = vadd.f32 %v4371_v43, %v3587_v14  ;;  %1730 = vadd.xlane.f32.xlu0 %v1720_v61  ;;  %v1723_v44 = vmul.f32 %v5643_v40, %v5643_v40  ;;  %4418 = vmatprep.subr.mxu0 %v5778_v17  ;;  %v5794_v59 = vld [vmem:[#allocation7 + $0x50] sm:$0xff]  ;;  %v5798_v61 = vld [vmem:[#allocation7 + $0x48] sm:$0xff]  ;;  %v5802_v43 = vld [vmem:[#allocation7 + $0x40] sm:$0xff] }
 0x5cc   :  { %v1685_v45 = vpop.f32.mrf.mxu1  ;;  %4419 = vmatpush3.msra.mxu0 %v5778_v17 }
 0x5cd   :  { %v5651_v22 = vmax.f32 %v1709_v19, 0.0  ;;  %v1708_v56 = vadd.f32 %v3587_v14, %v1685_v45  ;;  %1736 = vadd.xlane.f32.xlu1 %v1723_v44  ;;  %v1722_v62 = vmul.f32 %v5647_v33, %v5647_v33  ;;  %v5713_v14 = vld [vmem:[%s6311_s4 + $0x40] sm:$0xff]  ;;  %4420 = vmatprep.subr.mxu0 %v5782_v28  ;;  %v5810_v44 = vld [vmem:[#allocation7 + $0x30] sm:$0xff]  ;;  %v5814_v45 = vld [vmem:[#allocation7 + $0x28] sm:$0xff] }
 0x5ce   :  { %4386 = vmatprep.subr.mxu1 %v5713_v14  ;;  %4421 = vmatpush3.msra.mxu0 %v5782_v28  ;;  %v5806_v19 = vld [vmem:[#allocation7 + $0x38] sm:$0xff] }
 0x5cf   :  { %v5655_v57 = vmax.f32 %v1708_v56, 0.0  ;;  %1734 = vadd.xlane.f32.xlu0 %v1722_v62  ;;  %v1725_v27 = vmul.f32 %v5651_v22, %v5651_v22  ;;  %4387 = vmatpush3.msra.mxu1 %v5713_v14  ;;  %v5818_v56 = vld [vmem:[#allocation7 + $0x20] sm:$0xff] }
 0x5d0   :  { %4388 = vmatprep.subr.mxu1 %v5720_v20  ;;  %4422 = vmatprep.subr.mxu0 %v5786_v39 }
 0x5d1   :  { %1740 = vadd.xlane.f32.xlu1 %v1725_v27  ;;  %v1724_v58 = vmul.f32 %v5655_v57, %v5655_v57  ;;  %4389 = vmatpush3.msra.mxu1 %v5720_v20 }
 0x5d2   :  { %4390 = vmatprep.subr.mxu1 %v5727_v41  ;;  %4423 = vmatpush3.msra.mxu0 %v5786_v39 }
 0x5d3   :  { %1738 = vadd.xlane.f32.xlu0 %v1724_v58  ;;  %4391 = vmatpush3.msra.mxu1 %v5727_v41 }
 0x5d4   :  { %4392 = vmatprep.subr.mxu1 %v5734_v23  ;;  %4424 = vmatprep.subr.mxu0 %v5790_v29 }
 0x5d5   :  { %4393 = vmatpush3.msra.mxu1 %v5734_v23  ;;  %4425 = vmatpush3.msra.mxu0 %v5790_v29 }
 0x5d6   :  { %4394 = vmatprep.subr.mxu1 %v5741_v32  ;;  %4426 = vmatprep.subr.mxu0 %v5794_v59 }
 0x5d7   :  { %4395 = vmatpush3.msra.mxu1 %v5741_v32  ;;  %4427 = vmatpush3.msra.mxu0 %v5794_v59 }
 0x5d8   :  { %4396 = vmatprep.subr.mxu1 %v5748_v38  ;;  %4428 = vmatprep.subr.mxu0 %v5798_v61 }
 0x5d9   :  { %4397 = vmatpush3.msra.mxu1 %v5748_v38  ;;  %4429 = vmatpush3.msra.mxu0 %v5798_v61 }
 0x5da   :  { %4398 = vmatprep.subr.mxu1 %v5755_v0  ;;  %4430 = vmatprep.subr.mxu0 %v5802_v43 }
 0x5db   :  { %4399 = vmatpush3.msra.mxu1 %v5755_v0  ;;  %4431 = vmatpush3.msra.mxu0 %v5802_v43 }
 0x5dc   :  { %4400 = vmatprep.subr.mxu1 %v5762_v2  ;;  %4432 = vmatprep.subr.mxu0 %v5806_v19 }
 0x5dd   :  { %4401 = vmatpush3.msra.mxu1 %v5762_v2  ;;  %4433 = vmatpush3.msra.mxu0 %v5806_v19 }
 0x5de   :  { %4402 = vmatprep.subr.mxu1 %v5768_v5  ;;  %4434 = vmatprep.subr.mxu0 %v5810_v44 }
 0x5df   :  { %4403 = vmatpush3.msra.mxu1 %v5768_v5  ;;  %4435 = vmatpush3.msra.mxu0 %v5810_v44 }
 0x5e0   :  { %4460 = vmatprep.subr.mxu1 %v5773_v15  ;;  %4436 = vmatprep.subr.mxu0 %v5814_v45 }
 0x5e1   :  { %4437 = vmatpush3.msra.mxu0 %v5814_v45 }
 0x5e2   :  { %4438 = vmatprep.subr.mxu0 %v5818_v56 }
 0x5e3   :  { %4439 = vmatpush3.msra.mxu0 %v5818_v56 }
 0x64e   :  { %v1729_v62 = vpop.xlane.xlu1 %1728 }
 0x64f   :  { %4849 = vrsqrt.f32 %v1729_v62  ;;  %vm1751_vm3 = vcmp.eq.f32.partialorder %v1729_v62, inf  ;;  %vm1753_vm4 = vcmp.eq.f32.partialorder %v1729_v62, 0.0  ;;  %v1754_v52 = vand.u32 2147483648, %v1729_v62 }
 0x650   :  { %v1727_v27 = vpop.xlane.xlu0 %1726 }
 0x651   :  { %4851 = vrsqrt.f32 %v1727_v27  ;;  %vm1744_vm5 = vcmp.eq.f32.partialorder %v1727_v27, inf  ;;  %vm1746_vm6 = vcmp.eq.f32.partialorder %v1727_v27, 0.0  ;;  %v1747_v47 = vand.u32 2147483648, %v1727_v27 }
 0x652   :  { %v1733_v58 = vpop.xlane.xlu1 %1732 }
 0x653   :  { %4853 = vrsqrt.f32 %v1733_v58  ;;  %vm1765_vm7 = vcmp.eq.f32.partialorder %v1733_v58, inf  ;;  %v1768_v46 = vand.u32 2147483648, %v1733_v58  ;;  %vm1767_vm8 = vcmp.eq.f32.partialorder %v1733_v58, 0.0 }
 0x654   :  { %v1731_v18 = vpop.xlane.xlu0 %1730 }
 0x655   :  { %4855 = vrsqrt.f32 %v1731_v18  ;;  %vm1758_vm9 = vcmp.eq.f32.partialorder %v1731_v18, inf  ;;  %vm1760_vm10 = vcmp.eq.f32.partialorder %v1731_v18, 0.0  ;;  %v1761_v38 = vand.u32 2147483648, %v1731_v18 }
 0x656   :  { %v1737_v42 = vpop.xlane.xlu1 %1736 }
 0x657   :  { %4857 = vrsqrt.f32 %v1737_v42  ;;  %vm1779_vm11 = vcmp.eq.f32.partialorder %v1737_v42, inf  ;;  %vm1781_vm12 = vcmp.eq.f32.partialorder %v1737_v42, 0.0 }
 0x658   :  { %v5824_v34 = vpop.xlane.xlu0 %1734 }
 0x659   :  { %4859 = vrsqrt.f32 %v5824_v34  ;;  %vm1772_vm13 = vcmp.eq.f32.partialorder %v5824_v34, inf  ;;  %vm1774_vm14 = vcmp.eq.f32.partialorder %v5824_v34, 0.0 }
 0x65a   :  { %v5827_v36 = vpop.xlane.xlu1 %1740 }
 0x65b   :  { %4861 = vrsqrt.f32 %v5827_v36  ;;  %vm1793_vm15 = vcmp.eq.f32.partialorder %v5827_v36, inf  ;;  %vm1795_vm1 = vcmp.eq.f32.partialorder %v5827_v36, 0.0 }
 0x65c   :  { %v4850_v25 = vpop.eup %4849  ;;  %v5830_v1 = vpop.xlane.xlu0 %1738 }
 0x65d   :  { %v1750_v55 = vmul.f32 %v4850_v25, %v1729_v62  ;;  %4863 = vrsqrt.f32 %v5830_v1  ;;  %vm1786_vm2 = vcmp.eq.f32.partialorder %v5830_v1, inf }
 0x65e   :  { %v4852_v60 = vpop.eup %4851 }
 0x65f   :  { %v1752_v51 = vsel %vm1751_vm3, %v1729_v62, %v1750_v55  ;;  %v1743_v50 = vmul.f32 %v4852_v60, %v1727_v27  ;;  %vm1788_vm3 = vcmp.eq.f32.partialorder %v5830_v1, 0.0 }
 0x660   :  { %v4854_v49 = vpop.eup %4853  ;;  %v1755_v48 = vsel %vm1753_vm4, %v1754_v52, %v1752_v51  ;;  %v1782_v51 = vand.u32 2147483648, %v1737_v42 }
 0x661   :  { %v1799_v12 = vmax.f32 %v1755_v48, 1e-12  ;;  %v1745_v5 = vsel %vm1744_vm5, %v1727_v27, %v1743_v50  ;;  %v1764_v2 = vmul.f32 %v4854_v49, %v1733_v58 }
 0x662   :  { %v4856_v25 = vpop.eup %4855  ;;  %v1748_v0 = vsel %vm1746_vm6, %v1747_v47, %v1745_v5  ;;  %v1775_v47 = vand.u32 2147483648, %v5824_v34 }
 0x663   :  { %v1798_v32 = vmax.f32 %v1748_v0, 1e-12  ;;  %v1766_v23 = vsel %vm1765_vm7, %v1733_v58, %v1764_v2  ;;  %v1757_v55 = vmul.f32 %v4856_v25, %v1731_v18  ;;  %4865 = vrcp.f32 %v1799_v12 }
 0x664   :  { %v4858_v60 = vpop.eup %4857  ;;  %v1769_v62 = vsel %vm1767_vm8, %v1768_v46, %v1766_v23 }
 0x665   :  { %4867 = vrcp.f32 %v1798_v32  ;;  %v1801_v52 = vmax.f32 %v1769_v62, 1e-12  ;;  %v1759_v48 = vsel %vm1758_vm9, %v1731_v18, %v1757_v55  ;;  %v1778_v50 = vmul.f32 %v4858_v60, %v1737_v42 }
 0x666   :  { %v4860_v49 = vpop.eup %4859  ;;  %v1762_v27 = vsel %vm1760_vm10, %v1761_v38, %v1759_v48  ;;  %v1796_v18 = vand.u32 2147483648, %v5827_v36 }
 0x667   :  { %v1800_v0 = vmax.f32 %v1762_v27, 1e-12  ;;  %v1780_v2 = vsel %vm1779_vm11, %v1737_v42, %v1778_v50  ;;  %v1771_v12 = vmul.f32 %v4860_v49, %v5824_v34  ;;  %4869 = vrcp.f32 %v1801_v52 }
 0x668   :  { %v4862_v46 = vpop.eup %4861  ;;  %v1783_v23 = vsel %vm1781_vm12, %v1782_v51, %v1780_v2  ;;  %v1789_v51 = vand.u32 2147483648, %v5830_v1  ;;  %v2163_v2 = vld [vmem:[#allocation5 + $0x170] sm:$0xff] }
 0x669   :  { %4871 = vrcp.f32 %v1800_v0  ;;  %v1803_v32 = vmax.f32 %v1783_v23, 1e-12  ;;  %v1773_v38 = vsel %vm1772_vm13, %v5824_v34, %v1771_v12  ;;  %v1792_v5 = vmul.f32 %v4862_v46, %v5827_v36  ;;  %v2162_v46 = vld [vmem:[#allocation5 + $0x168] sm:$0xff] }
 0x66a   :  { %v4864_v58 = vpop.eup %4863  ;;  %v1776_v25 = vsel %vm1774_vm14, %v1775_v47, %v1773_v38  ;;  %v2160_v38 = vld [vmem:[#allocation5 + $0x158] sm:$0xff] }
 0x66b   :  { %v1802_v55 = vmax.f32 %v1776_v25, 1e-12  ;;  %v1794_v60 = vsel %vm1793_vm15, %v5827_v36, %v1792_v5  ;;  %v1785_v42 = vmul.f32 %v4864_v58, %v5830_v1  ;;  %4873 = vrcp.f32 %v1803_v32  ;;  %v2158_v25 = vld [vmem:[#allocation5 + $0x148] sm:$0xff] }
 0x66c   :  { %v1797_v62 = vsel %vm1795_vm1, %v1796_v18, %v1794_v60  ;;  %v2155_v60 = vld [vmem:[#allocation5 + $0x130] sm:$0xff] }
 0x66d   :  { %4875 = vrcp.f32 %v1802_v55  ;;  %v1805_v52 = vmax.f32 %v1797_v62, 1e-12  ;;  %v1787_v48 = vsel %vm1786_vm2, %v5830_v1, %v1785_v42  ;;  %v2154_v42 = vld [vmem:[#allocation5 + $0x128] sm:$0xff]  ;;  %v2151_v62 = vld [vmem:[#allocation5 + $0x110] sm:$0xff] }
 0x66e   :  { %v1790_v50 = vsel %vm1788_vm3, %v1789_v51, %v1787_v48  ;;  %v2150_v51 = vld [vmem:[#allocation5 + $0x108] sm:$0xff] }
 0x66f   :  { %v1804_v34 = vmax.f32 %v1790_v50, 1e-12  ;;  %4877 = vrcp.f32 %v1805_v52  ;;  %v2149_v52 = vld [vmem:[#allocation5 + $0x100] sm:$0xff] }
 0x670   :  { %v4866_v49 = vpop.eup %4865 }
 0x671   :  { %4879 = vrcp.f32 %v1804_v34  ;;  %v5855_v47 = vmul.f32 %v4866_v49, %v5629_v21  ;;  %v2161_v21 = vld [vmem:[#allocation5 + $0x160] sm:$0xff] }
 0x672   :  { %v4868_v36 = vpop.eup %4867 }
 0x673   :  { %v1807_v27 = vmul.f32 %v4868_v36, %v5631_v63 }
 0x674   :  { %v4870_v0 = vpop.eup %4869 }
 0x675   :  { %4404 = vmatprep.mubr.f32.mxu1 %v1807_v27  ;;  %v5861_v23 = vmul.f32 %v4870_v0, %v5635_v13  ;;  %v2159_v13 = vld [vmem:[#allocation5 + $0x150] sm:$0xff] }
 0x676   :  { %v4872_v12 = vpop.eup %4871  ;;  %4405 = vmatmul.mubr.f32.vlgmr.msra.gmra.mxu1 %v5855_v47 }
 0x677   :  { %4461 = vmatpush3.msra.mxu1 %v5773_v15  ;;  %v1811_v1 = vmul.f32 %v4872_v12, %v5639_v37 }
 0x678   :  { %4462 = vmatprep.subr.mxu1 %v2163_v2  ;;  %v4874_v18 = vpop.eup %4873 }
 0x679   :  { %4463 = vmatpush3.msra.mxu1 %v2163_v2  ;;  %4407 = vmatprep.mubr.f32.mxu1 %v1811_v1  ;;  %v1817_v37 = vmul.f32 %v4874_v18, %v5643_v40  ;;  %v2156_v40 = vld [vmem:[#allocation5 + $0x138] sm:$0xff] }
 0x67a   :  { %v4876_v63 = vpop.eup %4875  ;;  %4464 = vmatprep.subr.mxu1 %v2162_v46  ;;  %4408 = vmatmul.mubr.f32.gmra.mxu1 %v5861_v23 }
 0x67b   :  { %4465 = vmatpush3.msra.mxu1 %v2162_v46  ;;  %v1815_v32 = vmul.f32 %v4876_v63, %v5647_v33  ;;  %v2157_v33 = vld [vmem:[#allocation5 + $0x140] sm:$0xff] }
 0x67c   :  { %4466 = vmatprep.subr.mxu1 %v2161_v21  ;;  %v4878_v15 = vpop.eup %4877 }
 0x67d   :  { %4467 = vmatpush3.msra.mxu1 %v2161_v21  ;;  %4410 = vmatprep.mubr.f32.mxu1 %v1815_v32  ;;  %v1821_v55 = vmul.f32 %v4878_v15, %v5651_v22  ;;  %v2152_v22 = vld [vmem:[#allocation5 + $0x118] sm:$0xff] }
 0x67e   :  { %v4880_v5 = vpop.eup %4879  ;;  %4468 = vmatprep.subr.mxu1 %v2160_v38  ;;  %4411 = vmatmul.mubr.f32.gmra.mxu1 %v1817_v37 }
 0x67f   :  { %4469 = vmatpush3.msra.mxu1 %v2160_v38  ;;  %v1819_v58 = vmul.f32 %v4880_v5, %v5655_v57  ;;  %v2153_v57 = vld [vmem:[#allocation5 + $0x120] sm:$0xff] }
 0x680   :  { %4470 = vmatprep.subr.mxu1 %v2159_v13 }
 0x681   :  { %4471 = vmatpush3.msra.mxu1 %v2159_v13  ;;  %4413 = vmatprep.mubr.f32.mxu1 %v1819_v58 }
 0x682   :  { %4472 = vmatprep.subr.mxu1 %v2158_v25  ;;  %4414 = vmatmul.mubr.f32.gmra.mxu1 %v1821_v55 }
 0x683   :  { %4473 = vmatpush3.msra.mxu1 %v2158_v25  ;;  %4492 = vmatprep.mubr.f32.mxu1 %v1807_v27 }
 0x684   :  { %4474 = vmatprep.subr.mxu1 %v2157_v33 }
 0x685   :  { %4475 = vmatpush3.msra.mxu1 %v2157_v33 }
 0x686   :  { %4476 = vmatprep.subr.mxu1 %v2156_v40 }
 0x687   :  { %4477 = vmatpush3.msra.mxu1 %v2156_v40 }
 0x688   :  { %4478 = vmatprep.subr.mxu1 %v2155_v60 }
 0x689   :  { %4479 = vmatpush3.msra.mxu1 %v2155_v60 }
 0x68a   :  { %4480 = vmatprep.subr.mxu1 %v2154_v42 }
 0x68b   :  { %4481 = vmatpush3.msra.mxu1 %v2154_v42 }
 0x68c   :  { %4482 = vmatprep.subr.mxu1 %v2153_v57 }
 0x68d   :  { %4483 = vmatpush3.msra.mxu1 %v2153_v57 }
 0x68e   :  { %4484 = vmatprep.subr.mxu1 %v2152_v22 }
 0x68f   :  { %4485 = vmatpush3.msra.mxu1 %v2152_v22 }
 0x690   :  { %4486 = vmatprep.subr.mxu1 %v2151_v62 }
 0x691   :  { %4487 = vmatpush3.msra.mxu1 %v2151_v62 }
 0x692   :  { %4488 = vmatprep.subr.mxu1 %v2150_v51 }
 0x693   :  { %4489 = vmatpush3.msra.mxu1 %v2150_v51 }
 0x694   :  { %4490 = vmatprep.subr.mxu1 %v2149_v52 }
 0x695   :  { %4491 = vmatpush3.msra.mxu1 %v2149_v52 }
 0x696   :  { %4493 = vmatmul.mubr.f32.vlgmr.msra.gmra.mxu1 %v5855_v47  ;;  %4576 = vmatprep.subr.mxu1 %v5776_v16 }
 0x697   :  { %4495 = vmatprep.mubr.f32.mxu1 %v1811_v1  ;;  %4577 = vmatpush3.msra.mxu1 %v5776_v16  ;;  %v1961_v16 = vld [vmem:[#allocation7 + $0x18] sm:$0xff] }
 0x698   :  { %4578 = vmatprep.subr.mxu1 %v5778_v17  ;;  %4440 = vmatprep.subr.mxu0 %v1961_v16 }
 0x699   :  { %4579 = vmatpush3.msra.mxu1 %v5778_v17  ;;  %4441 = vmatpush3.msra.mxu0 %v1961_v16  ;;  %v1960_v17 = vld [vmem:[#allocation7 + $0x10] sm:$0xff] }
 0x69a   :  { %4496 = vmatmul.mubr.f32.gmra.mxu1 %v5861_v23  ;;  %4580 = vmatprep.subr.mxu1 %v5782_v28 }
 0x69b   :  { %4498 = vmatprep.mubr.f32.mxu1 %v1815_v32  ;;  %4581 = vmatpush3.msra.mxu1 %v5782_v28  ;;  %v1959_v28 = vld [vmem:[#allocation7 + $0x8] sm:$0xff] }
 0x69c   :  { %4582 = vmatprep.subr.mxu1 %v5786_v39  ;;  %4442 = vmatprep.subr.mxu0 %v1960_v17 }
 0x69d   :  { %4583 = vmatpush3.msra.mxu1 %v5786_v39  ;;  %4443 = vmatpush3.msra.mxu0 %v1960_v17  ;;  %v1958_v39 = vld [vmem:[#allocation7] sm:$0xff] }
 0x69e   :  { %4499 = vmatmul.mubr.f32.gmra.mxu1 %v1817_v37  ;;  %4584 = vmatprep.subr.mxu1 %v5790_v29 }
 0x69f   :  { %4501 = vmatprep.mubr.f32.mxu1 %v1819_v58  ;;  %4585 = vmatpush3.msra.mxu1 %v5790_v29  ;;  %v5897_v29 = vld [vmem:[%s6312_s5] ss:$0 sm:$0xff] }
 0x6a0   :  { %4586 = vmatprep.subr.mxu1 %v5794_v59  ;;  %4444 = vmatprep.subr.mxu0 %v1959_v28 }
 0x6a1   :  { %4587 = vmatpush3.msra.mxu1 %v5794_v59  ;;  %4445 = vmatpush3.msra.mxu0 %v1959_v28 }
 0x6a2   :  { %4502 = vmatmul.mubr.f32.gmra.mxu1 %v1821_v55  ;;  %4588 = vmatprep.subr.mxu1 %v5798_v61 }
 0x6a3   :  { %4589 = vmatpush3.msra.mxu1 %v5798_v61  ;;  %4446 = vmatprep.subr.mxu0 %v1958_v39 }
 0x6a4   :  { %4590 = vmatprep.subr.mxu1 %v5802_v43  ;;  %4447 = vmatpush3.msra.mxu0 %v1958_v39 }
 0x6a5   :  { %4591 = vmatpush3.msra.mxu1 %v5802_v43 }
 0x6a6   :  { %4592 = vmatprep.subr.mxu1 %v5806_v19 }
 0x6a7   :  { %4593 = vmatpush3.msra.mxu1 %v5806_v19 }
 0x6a8   :  { %4594 = vmatprep.subr.mxu1 %v5810_v44 }
 0x6a9   :  { %4595 = vmatpush3.msra.mxu1 %v5810_v44 }
 0x6aa   :  { %4596 = vmatprep.subr.mxu1 %v5814_v45 }
 0x6ab   :  { %4597 = vmatpush3.msra.mxu1 %v5814_v45 }
 0x6ac   :  { %4598 = vmatprep.subr.mxu1 %v5818_v56 }
 0x6ad   :  { %4599 = vmatpush3.msra.mxu1 %v5818_v56 }
 0x6ae   :  { %4600 = vmatprep.subr.mxu1 %v1961_v16 }
 0x6af   :  { %4601 = vmatpush3.msra.mxu1 %v1961_v16 }
 0x6b0   :  { %4602 = vmatprep.subr.mxu1 %v1960_v17 }
 0x6b1   :  { %4603 = vmatpush3.msra.mxu1 %v1960_v17 }
 0x6b2   :  { %4604 = vmatprep.subr.mxu1 %v1959_v28 }
 0x6b3   :  { %4605 = vmatpush3.msra.mxu1 %v1959_v28 }
 0x6b4   :  { %4606 = vmatprep.subr.mxu1 %v1958_v39 }
 0x6b5   :  { %4607 = vmatpush3.msra.mxu1 %v1958_v39 }
 0x736   :  { %v4406_v59 = vpop.f32.mrf.mxu1 }
 0x737   :  { %v1917_v61 = vadd.f32 %v4406_v59, %v5897_v29 }
 0x738   :  { %v1911_v43 = vpop.f32.mrf.mxu1 }
 0x739   :  { %v1912_v19 = vadd.f32 %v5897_v29, %v1911_v43  ;;  %v1951_v56 = vmax.f32 %v1917_v61, 0.0  ;;  %v5991_v61 = vld [vmem:[%s6314_s7] ss:$0 sm:$0xff] }
 0x73a   :  { %v4409_v44 = vpop.f32.mrf.mxu1 }
 0x73b   :  { %v1950_v45 = vmax.f32 %v1912_v19, 0.0  ;;  %v1927_v48 = vadd.f32 %v4409_v44, %v5897_v29 }
 0x73c   :  { %v1921_v50 = vpop.f32.mrf.mxu1 }
 0x73d   :  { %v1922_v34 = vadd.f32 %v5897_v29, %v1921_v50  ;;  %4448 = vmatprep.mubr.f32.mxu0 %v1950_v45  ;;  %v1953_v27 = vmax.f32 %v1927_v48, 0.0  ;;  %v6382_v48 = vld [vmem:[#allocation10_spill] sm:$0xff] }
 0x73e   :  { %v4412_v49 = vpop.f32.mrf.mxu1  ;;  %4449 = vmatmul.mubr.f32.vlgmr.msra.gmra.mxu0 %v1951_v56  ;;  %v570_v50 = vadd.f32 %v6382_v48, %v5991_v61 }
 0x73f   :  { %v1952_v36 = vmax.f32 %v1922_v34, 0.0  ;;  %v1937_v47 = vadd.f32 %v4412_v49, %v5897_v29 }
 0x740   :  { %v1931_v0 = vpop.f32.mrf.mxu1 }
 0x741   :  { %v1932_v2 = vadd.f32 %v5897_v29, %v1931_v0  ;;  %4451 = vmatprep.mubr.f32.mxu0 %v1952_v36  ;;  %v1955_v46 = vmax.f32 %v1937_v47, 0.0  ;;  %v6383_v47 = vld [vmem:[#allocation11_spill] sm:$0xff] }
 0x742   :  { %v4415_v12 = vpop.f32.mrf.mxu1  ;;  %4452 = vmatmul.mubr.f32.gmra.mxu0 %v1953_v27  ;;  %v565_v0 = vadd.f32 %v5991_v61, %v6383_v47  ;;  %v6394_v47 = vld [vmem:[#allocation22_spill] sm:$0xff] }
 0x743   :  { %v1954_v1 = vmax.f32 %v1932_v2, 0.0  ;;  %v1947_v23 = vadd.f32 %v4415_v12, %v5897_v29 }
 0x744   :  { %v1941_v18 = vpop.f32.mrf.mxu1 }
 0x745   :  { %v1942_v21 = vadd.f32 %v5897_v29, %v1941_v18  ;;  %4454 = vmatprep.mubr.f32.mxu0 %v1954_v1  ;;  %v1957_v32 = vmax.f32 %v1947_v23, 0.0  ;;  %v6384_v23 = vld [vmem:[#allocation12_spill] sm:$0xff] }
 0x746   :  { %4455 = vmatmul.mubr.f32.gmra.mxu0 %v1955_v46  ;;  %v604_v46 = vmax.f32 %v570_v50, 0.0  ;;  %v580_v18 = vadd.f32 %v6384_v23, %v5991_v61  ;;  %v6393_v50 = vld [vmem:[#allocation21_spill] sm:$0xff] }
 0x747   :  { %v1956_v63 = vmax.f32 %v1942_v21, 0.0 }
 0x749   :  { %4457 = vmatprep.mubr.f32.mxu0 %v1956_v63 }
 0x74a   :  { %4458 = vmatmul.mubr.f32.gmra.mxu0 %v1957_v32  ;;  %v6018_v32 = vld [vmem:[%s6315_s8] ss:$0 sm:$0xff] }
 0x74b   :  { %4512 = vmatprep.mubr.msk.f32.mxu0 %vm97_vm0, %v5557_v26 }
 0x756   :  { %v4494_v38 = vpop.f32.mrf.mxu1 }
 0x758   :  { %v2231_v37 = vpop.f32.mrf.mxu1 }
 0x75a   :  { %v4497_v15 = vpop.f32.mrf.mxu1 }
 0x75b   :  { %4504 = vmatprep.subr.mxu0 %v4497_v15 }
 0x75c   :  { %v2241_v13 = vpop.f32.mrf.mxu1  ;;  %4505 = vmatpush3.msra.mxu0 %v4497_v15 }
 0x75d   :  { %4506 = vmatprep.subr.mxu0 %v2241_v13 }
 0x75e   :  { %v4500_v5 = vpop.f32.mrf.mxu1  ;;  %4507 = vmatpush3.msra.mxu0 %v2241_v13 }
 0x75f   :  { %4508 = vmatprep.subr.mxu0 %v4494_v38 }
 0x760   :  { %v2251_v58 = vpop.f32.mrf.mxu1  ;;  %4509 = vmatpush3.msra.mxu0 %v4494_v38  ;;  %v603_v38 = vmax.f32 %v565_v0, 0.0  ;;  %v1327_v0 = vadd.f32 %v6394_v47, %v5991_v61 }
 0x761   :  { %4510 = vmatprep.subr.mxu0 %v2231_v37 }
 0x762   :  { %v4503_v25 = vpop.f32.mrf.mxu1  ;;  %4511 = vmatpush3.msra.mxu0 %v2231_v37  ;;  %v6385_v37 = vld [vmem:[#allocation13_spill] sm:$0xff] }
 0x763   :  { %4513 = vmatmul.mubr.msk.f32.vlgmr.msra.gmra.mxu0 %vm97_vm0, %v5564_v24  ;;  %4518 = vmatprep.subr.mxu0 %v4503_v25  ;;  %v6376_v24 = vld [vmem:[#allocation26_spill] sm:$0xff]  ;;  %v575_v15 = vadd.f32 %v5991_v61, %v6385_v37 }
 0x764   :  { %v2261_v26 = vpop.f32.mrf.mxu1  ;;  %4519 = vmatpush3.msra.mxu0 %v4503_v25  ;;  %4515 = vmatprep.mubr.msk.f32.mxu0 %vm97_vm0, %v5571_v10  ;;  %v6377_v10 = vld [vmem:[#allocation27_spill] sm:$0xff] }
 0x765   :  { %4520 = vmatprep.subr.mxu0 %v2261_v26 }
 0x766   :  { %4521 = vmatpush3.msra.mxu0 %v2261_v26  ;;  %v619_v26 = vmul.f32 %v6018_v32, %v604_v46  ;;  %v6395_v46 = vld [vmem:[#allocation23_spill] sm:$0xff] }
 0x767   :  { %4516 = vmatmul.mubr.msk.f32.gmra.mxu0 %vm97_vm0, %v5578_v11  ;;  %4522 = vmatprep.subr.mxu0 %v4500_v5  ;;  %v6378_v11 = vld [vmem:[#allocation28_spill] sm:$0xff]  ;;  %v1322_v23 = vadd.f32 %v5991_v61, %v6395_v46 }
 0x768   :  { %4523 = vmatpush3.msra.mxu0 %v4500_v5  ;;  %4526 = vmatprep.mubr.msk.f32.mxu0 %vm97_vm0, %v5585_v31  ;;  %v6379_v31 = vld [vmem:[#allocation29_spill] sm:$0xff]  ;;  %v606_v5 = vmax.f32 %v580_v18, 0.0 }
 0x769   :  { %4524 = vmatprep.subr.mxu0 %v2251_v58 }
 0x76a   :  { %4525 = vmatpush3.msra.mxu0 %v2251_v58  ;;  %v6386_v58 = vld [vmem:[#allocation14_spill] sm:$0xff] }
 0x76b   :  { %4527 = vmatmul.mubr.msk.f32.vlgmr.msra.gmra.mxu0 %vm97_vm0, %v5592_v30  ;;  %4532 = vmatprep.subr.mxu0 %v5664_v35  ;;  %v6380_v30 = vld [vmem:[#allocation30_spill] sm:$0xff]  ;;  %v590_v25 = vadd.f32 %v6386_v58, %v5991_v61  ;;  %v6397_v58 = vld [vmem:[#allocation25_spill] sm:$0xff] }
 0x76c   :  { %4529 = vmatprep.mubr.msk.f32.mxu0 %vm97_vm0, %v5599_v53  ;;  %4533 = vmatpush3.msra.mxu0 %v5664_v35  ;;  %v6381_v53 = vld [vmem:[#allocation31_spill] sm:$0xff] }
 0x76d   :  { %4534 = vmatprep.subr.mxu0 %v5671_v3 }
 0x76e   :  { %4535 = vmatpush3.msra.mxu0 %v5671_v3 }
 0x76f   :  { %4530 = vmatmul.mubr.msk.f32.gmra.mxu0 %vm97_vm0, %v5606_v54  ;;  %4536 = vmatprep.subr.mxu0 %v5678_v6 }
 0x770   :  { %4537 = vmatpush3.msra.mxu0 %v5678_v6 }
 0x771   :  { %4538 = vmatprep.subr.mxu0 %v5685_v4 }
 0x772   :  { %4539 = vmatpush3.msra.mxu0 %v5685_v4 }
 0x773   :  { %4540 = vmatprep.subr.mxu0 %v5692_v7 }
 0x774   :  { %4541 = vmatpush3.msra.mxu0 %v5692_v7 }
 0x775   :  { %4542 = vmatprep.subr.mxu0 %v5699_v8 }
 0x776   :  { %4543 = vmatpush3.msra.mxu0 %v5699_v8 }
 0x777   :  { %4544 = vmatprep.subr.mxu0 %v5706_v9 }
 0x778   :  { %4545 = vmatpush3.msra.mxu0 %v5706_v9 }
 0x779   :  { %4546 = vmatprep.subr.mxu0 %v5713_v14 }
 0x77a   :  { %4547 = vmatpush3.msra.mxu0 %v5713_v14  ;;  %v3601_v14 = vld [vmem:[%s6310_s3 + $0x3] ss:$0 sm:$0xff] }
 0x77b   :  { %4548 = vmatprep.subr.mxu0 %v5720_v20 }
 0x77c   :  { %4549 = vmatpush3.msra.mxu0 %v5720_v20 }
 0x77d   :  { %4550 = vmatprep.subr.mxu0 %v5727_v41 }
 0x77e   :  { %4551 = vmatpush3.msra.mxu0 %v5727_v41 }
 0x77f   :  { %4552 = vmatprep.subr.mxu0 %v6376_v24 }
 0x780   :  { %4553 = vmatpush3.msra.mxu0 %v6376_v24  ;;  %v605_v24 = vmax.f32 %v575_v15, 0.0 }
 0x781   :  { %4554 = vmatprep.subr.mxu0 %v6377_v10 }
 0x782   :  { %4555 = vmatpush3.msra.mxu0 %v6377_v10  ;;  %v6387_v10 = vld [vmem:[#allocation15_spill] sm:$0xff] }
 0x783   :  { %4556 = vmatprep.subr.mxu0 %v6378_v11 }
 0x784   :  { %4557 = vmatpush3.msra.mxu0 %v6378_v11  ;;  %v585_v11 = vadd.f32 %v5991_v61, %v6387_v10 }
 0x785   :  { %4558 = vmatprep.subr.mxu0 %v6379_v31 }
 0x786   :  { %4559 = vmatpush3.msra.mxu0 %v6379_v31  ;;  %v618_v31 = vmul.f32 %v6018_v32, %v603_v38  ;;  %v6396_v38 = vld [vmem:[#allocation24_spill] sm:$0xff] }
 0x787   :  { %4560 = vmatprep.subr.mxu0 %v6380_v30  ;;  %v1337_v37 = vadd.f32 %v6396_v38, %v5991_v61 }
 0x788   :  { %4561 = vmatpush3.msra.mxu0 %v6380_v30  ;;  %v608_v30 = vmax.f32 %v590_v25, 0.0  ;;  %v1332_v25 = vadd.f32 %v5991_v61, %v6397_v58 }
 0x789   :  { %4562 = vmatprep.subr.mxu0 %v6381_v53 }
 0x78a   :  { %4563 = vmatpush3.msra.mxu0 %v6381_v53  ;;  %v6388_v53 = vld [vmem:[#allocation16_spill] sm:$0xff] }
 0x7fe   :  { %v5955_v54 = vpop.f32.mrf.mxu0 }
 0x800   :  { %v5957_v35 = vpop.f32.mrf.mxu0 }
 0x802   :  { %v5959_v3 = vpop.f32.mrf.mxu0 }
 0x804   :  { %v5961_v6 = vpop.f32.mrf.mxu0 }
 0x806   :  { %v5963_v4 = vpop.f32.mrf.mxu0 }
 0x808   :  { %v5965_v7 = vpop.f32.mrf.mxu0 }
 0x80a   :  { %v5967_v8 = vpop.f32.mrf.mxu0 }
 0x80c   :  { %v5969_v9 = vpop.f32.mrf.mxu0 }
 0x823   :  { %v4514_v20 = vpop.f32.mrf.mxu0 }
 0x824   :  { %v2449_v41 = vadd.f32 %v4514_v20, %v3601_v14  ;;  %v621_v20 = vmul.f32 %v6018_v32, %v606_v5  ;;  %v1344_v5 = vmax.f32 %v1322_v23, 0.0 }
 0x825   :  { %v2336_v55 = vpop.f32.mrf.mxu0 }
 0x826   :  { %v5974_v33 = vmax.f32 %v2449_v41, 0.0  ;;  %v2448_v40 = vadd.f32 %v3601_v14, %v2336_v55  ;;  %v607_v41 = vmax.f32 %v585_v11, 0.0  ;;  %v6389_v55 = vld [vmem:[#allocation17_spill] sm:$0xff] }
 0x827   :  { %v4517_v60 = vpop.f32.mrf.mxu0 }
 0x828   :  { %v5976_v42 = vmax.f32 %v2448_v40, 0.0  ;;  %v2451_v57 = vadd.f32 %v4517_v60, %v3601_v14  ;;  %v2465_v22 = vmul.f32 %v5974_v33, %v5974_v33  ;;  %v595_v40 = vadd.f32 %v5991_v61, %v6389_v55 }
 0x829   :  { %v2346_v62 = vpop.f32.mrf.mxu0  ;;  %v620_v60 = vmul.f32 %v6018_v32, %v605_v24  ;;  %v1347_v24 = vmax.f32 %v1337_v37, 0.0 }
 0x82a   :  { %v5980_v51 = vmax.f32 %v2451_v57, 0.0  ;;  %v2450_v52 = vadd.f32 %v3601_v14, %v2346_v62  ;;  %2474 = vadd.xlane.f32.xlu1 %v2465_v22  ;;  %v2464_v16 = vmul.f32 %v5976_v42, %v5976_v42  ;;  %v6390_v22 = vld [vmem:[#allocation18_spill] sm:$0xff] }
 0x82b   :  { %v4528_v17 = vpop.f32.mrf.mxu0  ;;  %v1307_v62 = vadd.f32 %v6390_v22, %v5991_v61 }
 0x82c   :  { %v5984_v28 = vmax.f32 %v2450_v52, 0.0  ;;  %v2453_v39 = vadd.f32 %v4528_v17, %v3601_v14  ;;  %2472 = vadd.xlane.f32.xlu0 %v2464_v16  ;;  %v2467_v59 = vmul.f32 %v5980_v51, %v5980_v51  ;;  %v623_v52 = vmul.f32 %v6018_v32, %v608_v30  ;;  %v6391_v17 = vld [vmem:[#allocation19_spill] sm:$0xff] }
 0x82d   :  { %v2421_v43 = vpop.f32.mrf.mxu0  ;;  %v609_v16 = vmax.f32 %v595_v40, 0.0 }
 0x82e   :  { %v5993_v19 = vmax.f32 %v2453_v39, 0.0  ;;  %v2452_v44 = vadd.f32 %v3601_v14, %v2421_v43  ;;  %2478 = vadd.xlane.f32.xlu1 %v2467_v59  ;;  %v2466_v45 = vmul.f32 %v5984_v28, %v5984_v28  ;;  %v1302_v39 = vadd.f32 %v5991_v61, %v6391_v17 }
 0x82f   :  { %v4531_v56 = vpop.f32.mrf.mxu0  ;;  %v622_v59 = vmul.f32 %v6018_v32, %v607_v41  ;;  %v1341_v43 = vmax.f32 %v1307_v62, 0.0  ;;  %v6083_v62 = vld [vmem:[#allocation5 + $0x1f8] sm:$0xff] }
 0x830   :  { %v5999_v34 = vmax.f32 %v2452_v44, 0.0  ;;  %v2455_v49 = vadd.f32 %v4531_v56, %v3601_v14  ;;  %2476 = vadd.xlane.f32.xlu0 %v2466_v45  ;;  %v2469_v36 = vmul.f32 %v5993_v19, %v5993_v19  ;;  %v6392_v44 = vld [vmem:[#allocation20_spill] sm:$0xff]  ;;  %v1340_v48 = vmax.f32 %v1302_v39, 0.0  ;;  %4620 = vmatprep.subr.mxu0 %v6083_v62 }
 0x831   :  { %v2431_v27 = vpop.f32.mrf.mxu0  ;;  %v1317_v45 = vadd.f32 %v6392_v44, %v5991_v61 }
 0x832   :  { %v6005_v2 = vmax.f32 %v2455_v49, 0.0  ;;  %v2454_v12 = vadd.f32 %v3601_v14, %v2431_v27  ;;  %2482 = vadd.xlane.f32.xlu1 %v2469_v36  ;;  %v2468_v1 = vmul.f32 %v5999_v34, %v5999_v34  ;;  %v600_v14 = vadd.f32 %v6388_v53, %v5991_v61 }
 0x833   :  { %v1312_v49 = vadd.f32 %v5991_v61, %v6393_v50  ;;  %v624_v36 = vmul.f32 %v6018_v32, %v609_v16  ;;  %v1343_v27 = vmax.f32 %v1317_v45, 0.0  ;;  %v1355_v18 = vmul.f32 %v6018_v32, %v1340_v48 }
 0x834   :  { %v6011_v21 = vmax.f32 %v2454_v12, 0.0  ;;  %2480 = vadd.xlane.f32.xlu0 %v2468_v1  ;;  %v2471_v63 = vmul.f32 %v6005_v2, %v6005_v2  ;;  %v610_v57 = vmax.f32 %v600_v14, 0.0  ;;  %v1356_v12 = vmul.f32 %v6018_v32, %v1341_v43 }
 0x835   :  { %v1342_v1 = vmax.f32 %v1312_v49, 0.0  ;;  %v1358_v15 = vmul.f32 %v6018_v32, %v1343_v27  ;;  %v1359_v53 = vmul.f32 %v6018_v32, %v1344_v5 }
 0x836   :  { %2486 = vadd.xlane.f32.xlu1 %v2471_v63  ;;  %v2470_v13 = vmul.f32 %v6011_v21, %v6011_v21  ;;  %v625_v56 = vmul.f32 %v6018_v32, %v610_v57  ;;  %v1345_v63 = vmax.f32 %v1327_v0, 0.0 }
 0x838   :  { %2484 = vadd.xlane.f32.xlu0 %v2470_v13  ;;  %v6060_v13 = vld [vmem:[%s6314_s7] ss:$0 sm:$0xff]  ;;  %v1360_v11 = vmul.f32 %v6018_v32, %v1345_v63 }
 0x839   :  { %v2053_v10 = vadd.f32 %v5955_v54, %v6060_v13  ;;  %v2048_v30 = vadd.f32 %v6060_v13, %v5957_v35  ;;  %v2063_v61 = vadd.f32 %v5959_v3, %v6060_v13  ;;  %v2058_v54 = vadd.f32 %v6060_v13, %v5961_v6 }
 0x83a   :  { %628 = vadd.xlane.f32.xlu1 %v619_v26  ;;  %v1357_v26 = vmul.f32 %v6018_v32, %v1342_v1  ;;  %v2073_v35 = vadd.f32 %v5963_v4, %v6060_v13  ;;  %v2068_v3 = vadd.f32 %v6060_v13, %v5965_v7  ;;  %v2078_v17 = vadd.f32 %v6060_v13, %v5969_v9 }
 0x83b   :  { %v2087_v14 = vmax.f32 %v2053_v10, 0.0  ;;  %v2086_v41 = vmax.f32 %v2048_v30, 0.0  ;;  %v2089_v40 = vmax.f32 %v2063_v61, 0.0  ;;  %v2088_v57 = vmax.f32 %v2058_v54, 0.0 }
 0x83c   :  { %626 = vadd.xlane.f32.xlu0 %v618_v31  ;;  %v1346_v31 = vmax.f32 %v1332_v25, 0.0  ;;  %v2091_v6 = vmax.f32 %v2073_v35, 0.0  ;;  %v2090_v16 = vmax.f32 %v2068_v3, 0.0  ;;  %v2092_v43 = vmax.f32 %v2078_v17, 0.0 }
 0x83d   :  { %v2101_v22 = vmul.f32 %v6018_v32, %v2086_v41  ;;  %v2104_v4 = vmul.f32 %v6018_v32, %v2089_v40  ;;  %v2103_v7 = vmul.f32 %v6018_v32, %v2088_v57 }
 0x83e   :  { %632 = vadd.xlane.f32.xlu1 %v621_v20  ;;  %v1362_v20 = vmul.f32 %v6018_v32, %v1347_v24  ;;  %v1361_v55 = vmul.f32 %v6018_v32, %v1346_v31  ;;  %v2105_v44 = vmul.f32 %v6018_v32, %v2090_v16  ;;  %v2107_v45 = vmul.f32 %v6018_v32, %v2092_v43 }
 0x840   :  { %630 = vadd.xlane.f32.xlu0 %v620_v60  ;;  %v2102_v60 = vmul.f32 %v6018_v32, %v2087_v14 }
 0x842   :  { %636 = vadd.xlane.f32.xlu1 %v623_v52  ;;  %v2083_v52 = vadd.f32 %v5967_v8, %v6060_v13 }
 0x844   :  { %634 = vadd.xlane.f32.xlu0 %v622_v59  ;;  %v2093_v39 = vmax.f32 %v2083_v52, 0.0  ;;  %v2106_v59 = vmul.f32 %v6018_v32, %v2091_v6 }
 0x846   :  { %640 = vadd.xlane.f32.xlu1 %v625_v56  ;;  %v2108_v8 = vmul.f32 %v6018_v32, %v2093_v39 }
 0x848   :  { %638 = vadd.xlane.f32.xlu0 %v624_v36 }
 0x84a   :  { %1365 = vadd.xlane.f32.xlu1 %v1356_v12 }
 0x84c   :  { %1363 = vadd.xlane.f32.xlu0 %v1355_v18 }
 0x84e   :  { %1369 = vadd.xlane.f32.xlu1 %v1358_v15 }
 0x850   :  { %1367 = vadd.xlane.f32.xlu0 %v1357_v26 }
 0x852   :  { %1373 = vadd.xlane.f32.xlu1 %v1360_v11 }
 0x854   :  { %1371 = vadd.xlane.f32.xlu0 %v1359_v53 }
 0x856   :  { %1377 = vadd.xlane.f32.xlu1 %v1362_v20 }
 0x858   :  { %1375 = vadd.xlane.f32.xlu0 %v1361_v55 }
 0x85a   :  { %2111 = vadd.xlane.f32.xlu1 %v2102_v60 }
 0x85c   :  { %2109 = vadd.xlane.f32.xlu0 %v2101_v22 }
 0x85e   :  { %2115 = vadd.xlane.f32.xlu1 %v2104_v4 }
 0x860   :  { %2113 = vadd.xlane.f32.xlu0 %v2103_v7 }
 0x862   :  { %2119 = vadd.xlane.f32.xlu1 %v2106_v59 }
 0x864   :  { %2117 = vadd.xlane.f32.xlu0 %v2105_v44 }
 0x866   :  { %2123 = vadd.xlane.f32.xlu1 %v2108_v8 }
 0x868   :  { %2121 = vadd.xlane.f32.xlu0 %v2107_v45 }
 0x8b3   :  { %v2475_v56 = vpop.xlane.xlu1 %2474 }
 0x8b4   :  { %4881 = vrsqrt.f32 %v2475_v56  ;;  %vm2497_vm4 = vcmp.eq.f32.partialorder %v2475_v56, inf  ;;  %vm2499_vm5 = vcmp.eq.f32.partialorder %v2475_v56, 0.0  ;;  %v2500_v46 = vand.u32 2147483648, %v2475_v56 }
 0x8b5   :  { %v2473_v9 = vpop.xlane.xlu0 %2472 }
 0x8b6   :  { %4883 = vrsqrt.f32 %v2473_v9  ;;  %vm2490_vm6 = vcmp.eq.f32.partialorder %v2473_v9, inf  ;;  %vm2492_vm7 = vcmp.eq.f32.partialorder %v2473_v9, 0.0  ;;  %v2493_v37 = vand.u32 2147483648, %v2473_v9 }
 0x8b7   :  { %v2479_v48 = vpop.xlane.xlu1 %2478 }
 0x8b8   :  { %4885 = vrsqrt.f32 %v2479_v48  ;;  %vm2511_vm8 = vcmp.eq.f32.partialorder %v2479_v48, inf  ;;  %v2514_v15 = vand.u32 2147483648, %v2479_v48  ;;  %vm2513_vm9 = vcmp.eq.f32.partialorder %v2479_v48, 0.0 }
 0x8b9   :  { %v2477_v50 = vpop.xlane.xlu0 %2476 }
 0x8ba   :  { %4887 = vrsqrt.f32 %v2477_v50  ;;  %vm2504_vm10 = vcmp.eq.f32.partialorder %v2477_v50, inf  ;;  %vm2506_vm11 = vcmp.eq.f32.partialorder %v2477_v50, 0.0  ;;  %v2507_v10 = vand.u32 2147483648, %v2477_v50 }
 0x8bb   :  { %v2483_v49 = vpop.xlane.xlu1 %2482 }
 0x8bc   :  { %4889 = vrsqrt.f32 %v2483_v49  ;;  %vm2525_vm12 = vcmp.eq.f32.partialorder %v2483_v49, inf  ;;  %vm2527_vm13 = vcmp.eq.f32.partialorder %v2483_v49, 0.0  ;;  %v2528_v61 = vand.u32 2147483648, %v2483_v49 }
 0x8bd   :  { %v6096_v36 = vpop.xlane.xlu0 %2480 }
 0x8be   :  { %4891 = vrsqrt.f32 %v6096_v36  ;;  %vm2518_vm14 = vcmp.eq.f32.partialorder %v6096_v36, inf  ;;  %vm2520_vm15 = vcmp.eq.f32.partialorder %v6096_v36, 0.0  ;;  %v2521_v35 = vand.u32 2147483648, %v6096_v36 }
 0x8bf   :  { %v6099_v27 = vpop.xlane.xlu1 %2486 }
 0x8c0   :  { %4893 = vrsqrt.f32 %v6099_v27  ;;  %vm2539_vm1 = vcmp.eq.f32.partialorder %v6099_v27, inf  ;;  %vm2541_vm2 = vcmp.eq.f32.partialorder %v6099_v27, 0.0  ;;  %v2542_v52 = vand.u32 2147483648, %v6099_v27 }
 0x8c1   :  { %v4882_v47 = vpop.eup %4881  ;;  %v6102_v0 = vpop.xlane.xlu0 %2484 }
 0x8c2   :  { %v2496_v12 = vmul.f32 %v4882_v47, %v2475_v56  ;;  %4895 = vrsqrt.f32 %v6102_v0  ;;  %vm2532_vm3 = vcmp.eq.f32.partialorder %v6102_v0, inf  ;;  %v2535_v45 = vand.u32 2147483648, %v6102_v0 }
 0x8c3   :  { %v4884_v1 = vpop.eup %4883 }
 0x8c4   :  { %v2498_v23 = vsel %vm2497_vm4, %v2475_v56, %v2496_v12  ;;  %v2489_v18 = vmul.f32 %v4884_v1, %v2473_v9  ;;  %vm2534_vm4 = vcmp.eq.f32.partialorder %v6102_v0, 0.0  ;;  %v2909_v1 = vld [vmem:[#allocation5 + $0x1f0] sm:$0xff] }
 0x8c5   :  { %v4886_v63 = vpop.eup %4885  ;;  %v2501_v38 = vsel %vm2499_vm5, %v2500_v46, %v2498_v23  ;;  %v2908_v23 = vld [vmem:[#allocation5 + $0x1e8] sm:$0xff] }
 0x8c6   :  { %v2545_v5 = vmax.f32 %v2501_v38, 1e-12  ;;  %v2491_v58 = vsel %vm2490_vm6, %v2473_v9, %v2489_v18  ;;  %v2510_v25 = vmul.f32 %v4886_v63, %v2479_v48 }
 0x8c7   :  { %v4888_v26 = vpop.eup %4887  ;;  %v2494_v24 = vsel %vm2492_vm7, %v2493_v37, %v2491_v58  ;;  %v2906_v37 = vld [vmem:[#allocation5 + $0x1d8] sm:$0xff]  ;;  %v2904_v58 = vld [vmem:[#allocation5 + $0x1c8] sm:$0xff] }
 0x8c8   :  { %v2544_v11 = vmax.f32 %v2494_v24, 1e-12  ;;  %v2512_v31 = vsel %vm2511_vm8, %v2479_v48, %v2510_v25  ;;  %v2503_v30 = vmul.f32 %v4888_v26, %v2477_v50  ;;  %4897 = vrcp.f32 %v2545_v5  ;;  %v2901_v26 = vld [vmem:[#allocation5 + $0x1b0] sm:$0xff]  ;;  %v2900_v24 = vld [vmem:[#allocation5 + $0x1a8] sm:$0xff] }
 0x8c9   :  { %v4890_v53 = vpop.eup %4889  ;;  %v2515_v14 = vsel %vm2513_vm9, %v2514_v15, %v2512_v31  ;;  %v2895_v31 = vld [vmem:[#allocation5 + $0x180] sm:$0xff] }
 0x8ca   :  { %4899 = vrcp.f32 %v2544_v11  ;;  %v2547_v20 = vmax.f32 %v2515_v14, 1e-12  ;;  %v2505_v41 = vsel %vm2504_vm10, %v2477_v50, %v2503_v30  ;;  %v2524_v54 = vmul.f32 %v4890_v53, %v2483_v49  ;;  %v2896_v11 = vld [vmem:[#allocation5 + $0x188] sm:$0xff] }
 0x8cb   :  { %v4892_v55 = vpop.eup %4891  ;;  %v2508_v40 = vsel %vm2506_vm11, %v2507_v10, %v2505_v41  ;;  %v2897_v10 = vld [vmem:[#allocation5 + $0x190] sm:$0xff] }
 0x8cc   :  { %v2546_v60 = vmax.f32 %v2508_v40, 1e-12  ;;  %v2526_v57 = vsel %vm2525_vm12, %v2483_v49, %v2524_v54  ;;  %v2517_v3 = vmul.f32 %v4892_v55, %v6096_v36  ;;  %4901 = vrcp.f32 %v2547_v20 }
 0x8cd   :  { %v4894_v22 = vpop.eup %4893  ;;  %v2529_v6 = vsel %vm2527_vm13, %v2528_v61, %v2526_v57 }
 0x8ce   :  { %4903 = vrcp.f32 %v2546_v60  ;;  %v2549_v4 = vmax.f32 %v2529_v6, 1e-12  ;;  %v2519_v16 = vsel %vm2518_vm14, %v6096_v36, %v2517_v3  ;;  %v2538_v17 = vmul.f32 %v4894_v22, %v6099_v27 }
 0x8cf   :  { %v4896_v7 = vpop.eup %4895  ;;  %v2522_v39 = vsel %vm2520_vm15, %v2521_v35, %v2519_v16 }
 0x8d0   :  { %v2548_v59 = vmax.f32 %v2522_v39, 1e-12  ;;  %v2540_v43 = vsel %vm2539_vm1, %v6099_v27, %v2538_v17  ;;  %v2531_v44 = vmul.f32 %v4896_v7, %v6102_v0  ;;  %4905 = vrcp.f32 %v2549_v4 }
 0x8d1   :  { %v2543_v8 = vsel %vm2541_vm2, %v2542_v52, %v2540_v43 }
 0x8d2   :  { %4907 = vrcp.f32 %v2548_v59  ;;  %v2551_v56 = vmax.f32 %v2543_v8, 1e-12  ;;  %v2533_v9 = vsel %vm2532_vm3, %v6102_v0, %v2531_v44  ;;  %v4921_v8 = vld [vmem:[%s6307_s0] sm:$0xff] }
 0x8d3   :  { %v2536_v48 = vsel %vm2534_vm4, %v2535_v45, %v2533_v9 }
 0x8d4   :  { %v2550_v50 = vmax.f32 %v2536_v48, 1e-12  ;;  %4909 = vrcp.f32 %v2551_v56 }
 0x8d5   :  { %v4898_v49 = vpop.eup %4897 }
 0x8d6   :  { %4911 = vrcp.f32 %v2550_v50  ;;  %v6127_v47 = vmul.f32 %v4898_v49, %v5974_v33 }
 0x8d7   :  { %v4900_v36 = vpop.eup %4899 }
 0x8d8   :  { %v2553_v27 = vmul.f32 %v4900_v36, %v5976_v42  ;;  %v2907_v42 = vld [vmem:[#allocation5 + $0x1e0] sm:$0xff] }
 0x8d9   :  { %v4902_v12 = vpop.eup %4901  ;;  %v4922_v36 = vld [vmem:[%s6307_s0 + $0x8] sm:$0xff] }
 0x8da   :  { %4564 = vmatprep.mubr.f32.mxu0 %v2553_v27  ;;  %v2559_v18 = vmul.f32 %v4902_v12, %v5980_v51  ;;  %v4924_v12 = vld [vmem:[%s6307_s0 + $0x18] sm:$0xff] }
 0x8db   :  { %v4904_v46 = vpop.eup %4903  ;;  %4565 = vmatmul.mubr.f32.vlgmr.msra.gmra.mxu0 %v6127_v47 }
 0x8dc   :  { %4621 = vmatpush3.msra.mxu0 %v6083_v62  ;;  %v2557_v0 = vmul.f32 %v4904_v46, %v5984_v28  ;;  %v2905_v28 = vld [vmem:[#allocation5 + $0x1d0] sm:$0xff]  ;;  %v4926_v46 = vld [vmem:[%s6307_s0 + $0x28] sm:$0xff] }
 0x8dd   :  { %4622 = vmatprep.subr.mxu0 %v2909_v1  ;;  %v4906_v63 = vpop.eup %4905 }
 0x8de   :  { %4623 = vmatpush3.msra.mxu0 %v2909_v1  ;;  %4567 = vmatprep.mubr.f32.mxu0 %v2557_v0  ;;  %v2563_v62 = vmul.f32 %v4906_v63, %v5993_v19  ;;  %v2902_v19 = vld [vmem:[#allocation5 + $0x1b8] sm:$0xff]  ;;  %v3224_v63 = vld [vmem:[%s6311_s4 + $0x70] sm:$0xff] }
 0x8df   :  { %v4908_v33 = vpop.eup %4907  ;;  %4624 = vmatprep.subr.mxu0 %v2908_v23  ;;  %4568 = vmatmul.mubr.f32.gmra.mxu0 %v2559_v18  ;;  %v4925_v1 = vld [vmem:[%s6307_s0 + $0x20] sm:$0xff] }
 0x8e0   :  { %4625 = vmatpush3.msra.mxu0 %v2908_v23  ;;  %v2561_v38 = vmul.f32 %v4908_v33, %v5999_v34  ;;  %v2903_v34 = vld [vmem:[#allocation5 + $0x1c0] sm:$0xff]  ;;  %v4928_v23 = vld [vmem:[%s6307_s0 + $0x38] sm:$0xff] }
 0x8e1   :  { %4626 = vmatprep.subr.mxu0 %v2907_v42  ;;  %v4910_v15 = vpop.eup %4909  ;;  %v3222_v33 = vld [vmem:[%s6311_s4 + $0x60] sm:$0xff] }
 0x8e2   :  { %4627 = vmatpush3.msra.mxu0 %v2907_v42  ;;  %4570 = vmatprep.mubr.f32.mxu0 %v2561_v38  ;;  %v2567_v25 = vmul.f32 %v4910_v15, %v6005_v2  ;;  %v2898_v2 = vld [vmem:[#allocation5 + $0x198] sm:$0xff]  ;;  %v3223_v42 = vld [vmem:[%s6311_s4 + $0x68] sm:$0xff] }
 0x8e3   :  { %v4912_v5 = vpop.eup %4911  ;;  %4628 = vmatprep.subr.mxu0 %v2906_v37  ;;  %4571 = vmatmul.mubr.f32.gmra.mxu0 %v2563_v62  ;;  %v3218_v15 = vld [vmem:[%s6311_s4 + $0x40] sm:$0xff] }
 0x8e4   :  { %4629 = vmatpush3.msra.mxu0 %v2906_v37  ;;  %v2565_v51 = vmul.f32 %v4912_v5, %v6011_v21  ;;  %v2899_v21 = vld [vmem:[#allocation5 + $0x1a0] sm:$0xff]  ;;  %v3220_v37 = vld [vmem:[%s6311_s4 + $0x50] sm:$0xff] }
 0x8e5   :  { %4630 = vmatprep.subr.mxu0 %v2905_v28  ;;  %v3216_v5 = vld [vmem:[%s6311_s4 + $0x30] sm:$0xff] }
 0x8e6   :  { %4631 = vmatpush3.msra.mxu0 %v2905_v28  ;;  %4573 = vmatprep.mubr.f32.mxu0 %v2565_v51  ;;  %v3217_v28 = vld [vmem:[%s6311_s4 + $0x38] sm:$0xff] }
 0x8e7   :  { %4632 = vmatprep.subr.mxu0 %v2904_v58  ;;  %4574 = vmatmul.mubr.f32.gmra.mxu0 %v2567_v25 }
 0x8e8   :  { %4633 = vmatpush3.msra.mxu0 %v2904_v58  ;;  %4652 = vmatprep.mubr.f32.mxu0 %v2553_v27  ;;  %v3214_v58 = vld [vmem:[%s6311_s4 + $0x20] sm:$0xff] }
 0x8e9   :  { %4634 = vmatprep.subr.mxu0 %v2903_v34 }
 0x8ea   :  { %4635 = vmatpush3.msra.mxu0 %v2903_v34  ;;  %v3212_v34 = vld [vmem:[%s6311_s4 + $0x10] sm:$0xff] }
 0x8eb   :  { %4636 = vmatprep.subr.mxu0 %v2902_v19 }
 0x8ec   :  { %4637 = vmatpush3.msra.mxu0 %v2902_v19  ;;  %v3211_v19 = vld [vmem:[%s6311_s4 + $0x8] sm:$0xff] }
 0x8ed   :  { %4638 = vmatprep.subr.mxu0 %v2901_v26 }
 0x8ee   :  { %4639 = vmatpush3.msra.mxu0 %v2901_v26  ;;  %v3210_v26 = vld [vmem:[%s6311_s4] sm:$0xff] }
 0x8ef   :  { %4640 = vmatprep.subr.mxu0 %v2900_v24 }
 0x8f0   :  { %4641 = vmatpush3.msra.mxu0 %v2900_v24 }
 0x8f1   :  { %4642 = vmatprep.subr.mxu0 %v2899_v21 }
 0x8f2   :  { %4643 = vmatpush3.msra.mxu0 %v2899_v21 }
 0x8f3   :  { %4644 = vmatprep.subr.mxu0 %v2898_v2 }
 0x8f4   :  { %4645 = vmatpush3.msra.mxu0 %v2898_v2 }
 0x8f5   :  { %4646 = vmatprep.subr.mxu0 %v2897_v10 }
 0x8f6   :  { %4647 = vmatpush3.msra.mxu0 %v2897_v10 }
 0x8f7   :  { %4648 = vmatprep.subr.mxu0 %v2896_v11 }
 0x8f8   :  { %4649 = vmatpush3.msra.mxu0 %v2896_v11 }
 0x8f9   :  { %4650 = vmatprep.subr.mxu0 %v2895_v31 }
 0x8fa   :  { %4651 = vmatpush3.msra.mxu0 %v2895_v31 }
 0x8fb   :  { %4653 = vmatmul.mubr.f32.vlgmr.msra.gmra.mxu0 %v6127_v47  ;;  %v4923_v47 = vld [vmem:[%s6307_s0 + $0x10] sm:$0xff] }
 0x8fc   :  { %4655 = vmatprep.mubr.f32.mxu0 %v2557_v0  ;;  %v4927_v0 = vld [vmem:[%s6307_s0 + $0x30] sm:$0xff] }
 0x8ff   :  { %4656 = vmatmul.mubr.f32.gmra.mxu0 %v2559_v18  ;;  %v3225_v18 = vld [vmem:[%s6311_s4 + $0x78] sm:$0xff] }
 0x900   :  { %4658 = vmatprep.mubr.f32.mxu0 %v2561_v38  ;;  %v3221_v38 = vld [vmem:[%s6311_s4 + $0x58] sm:$0xff] }
 0x903   :  { %4659 = vmatmul.mubr.f32.gmra.mxu0 %v2563_v62  ;;  %v3219_v62 = vld [vmem:[%s6311_s4 + $0x48] sm:$0xff] }
 0x904   :  { %4661 = vmatprep.mubr.f32.mxu0 %v2565_v51  ;;  %v3215_v51 = vld [vmem:[%s6311_s4 + $0x28] sm:$0xff] }
 0x907   :  { %4662 = vmatmul.mubr.f32.gmra.mxu0 %v2567_v25  ;;  %v3213_v25 = vld [vmem:[%s6311_s4 + $0x18] sm:$0xff] }
 0x99b   :  { %v4566_v30 = vpop.f32.mrf.mxu0 }
 0x99c   :  { %v2663_v53 = vadd.f32 %v4566_v30, %v5897_v29 }
 0x99d   :  { %v2657_v14 = vpop.f32.mrf.mxu0 }
 0x99e   :  { %v2658_v61 = vadd.f32 %v5897_v29, %v2657_v14  ;;  %v2697_v54 = vmax.f32 %v2663_v53, 0.0 }
 0x99f   :  { %v4569_v20 = vpop.f32.mrf.mxu0 }
 0x9a0   :  { %v2696_v41 = vmax.f32 %v2658_v61, 0.0  ;;  %v2673_v55 = vadd.f32 %v4569_v20, %v5897_v29 }
 0x9a1   :  { %v2667_v40 = vpop.f32.mrf.mxu0 }
 0x9a2   :  { %v2668_v35 = vadd.f32 %v5897_v29, %v2667_v40  ;;  %4608 = vmatprep.mubr.f32.mxu1 %v2696_v41  ;;  %v2699_v3 = vmax.f32 %v2673_v55, 0.0 }
 0x9a3   :  { %v4572_v60 = vpop.f32.mrf.mxu0  ;;  %4609 = vmatmul.mubr.f32.vlgmr.msra.gmra.mxu1 %v2697_v54 }
 0x9a4   :  { %v2698_v57 = vmax.f32 %v2668_v35, 0.0  ;;  %v2683_v22 = vadd.f32 %v4572_v60, %v5897_v29 }
 0x9a5   :  { %v2677_v6 = vpop.f32.mrf.mxu0 }
 0x9a6   :  { %v2678_v52 = vadd.f32 %v5897_v29, %v2677_v6  ;;  %4611 = vmatprep.mubr.f32.mxu1 %v2698_v57  ;;  %v2701_v17 = vmax.f32 %v2683_v22, 0.0 }
 0x9a7   :  { %v4575_v4 = vpop.f32.mrf.mxu0  ;;  %4612 = vmatmul.mubr.f32.gmra.mxu1 %v2699_v3 }
 0x9a8   :  { %v2700_v16 = vmax.f32 %v2678_v52, 0.0  ;;  %v2693_v7 = vadd.f32 %v4575_v4, %v5897_v29 }
 0x9a9   :  { %v2687_v39 = vpop.f32.mrf.mxu0 }
 0x9aa   :  { %v2688_v59 = vadd.f32 %v5897_v29, %v2687_v39  ;;  %4614 = vmatprep.mubr.f32.mxu1 %v2700_v16  ;;  %v2703_v44 = vmax.f32 %v2693_v7, 0.0 }
 0x9ab   :  { %4615 = vmatmul.mubr.f32.gmra.mxu1 %v2701_v17 }
 0x9ac   :  { %v2702_v43 = vmax.f32 %v2688_v59, 0.0 }
 0x9ae   :  { %4617 = vmatprep.mubr.f32.mxu1 %v2702_v43 }
 0x9af   :  { %4618 = vmatmul.mubr.f32.gmra.mxu1 %v2703_v44 }
 0x9b0   :  { %4672 = vmatprep.mubr.msk.f32.mxu1 %vm97_vm0, %v4921_v8 }
 0x9bb   :  { %v4654_v45 = vpop.f32.mrf.mxu0 }
 0x9bd   :  { %v2977_v56 = vpop.f32.mrf.mxu0 }
 0x9bf   :  { %v4657_v9 = vpop.f32.mrf.mxu0 }
 0x9c0   :  { %4664 = vmatprep.subr.mxu1 %v4657_v9 }
 0x9c1   :  { %v2987_v48 = vpop.f32.mrf.mxu0  ;;  %4665 = vmatpush3.msra.mxu1 %v4657_v9  ;;  %v3360_v9 = vld [vmem:[#allocation7 + $0x70] sm:$0xff] }
 0x9c2   :  { %4666 = vmatprep.subr.mxu1 %v2987_v48 }
 0x9c3   :  { %v4660_v29 = vpop.f32.mrf.mxu0  ;;  %4667 = vmatpush3.msra.mxu1 %v2987_v48  ;;  %v3359_v48 = vld [vmem:[#allocation7 + $0x68] sm:$0xff] }
 0x9c4   :  { %4668 = vmatprep.subr.mxu1 %v4654_v45 }
 0x9c5   :  { %v2997_v50 = vpop.f32.mrf.mxu0  ;;  %4669 = vmatpush3.msra.mxu1 %v4654_v45 }
 0x9c6   :  { %4670 = vmatprep.subr.mxu1 %v2977_v56 }
 0x9c7   :  { %v4663_v49 = vpop.f32.mrf.mxu0  ;;  %4671 = vmatpush3.msra.mxu1 %v2977_v56  ;;  %v3361_v56 = vld [vmem:[#allocation7 + $0x78] sm:$0xff] }
 0x9c8   :  { %4673 = vmatmul.mubr.msk.f32.vlgmr.msra.gmra.mxu1 %vm97_vm0, %v4922_v36  ;;  %4678 = vmatprep.subr.mxu1 %v4663_v49 }
 0x9c9   :  { %v3007_v27 = vpop.f32.mrf.mxu0  ;;  %4679 = vmatpush3.msra.mxu1 %v4663_v49  ;;  %4675 = vmatprep.mubr.msk.f32.mxu1 %vm97_vm0, %v4923_v47 }
 0x9ca   :  { %4680 = vmatprep.subr.mxu1 %v3007_v27  ;;  %4736 = vmatprep.subr.mxu0 %v3361_v56 }
 0x9cb   :  { %4681 = vmatpush3.msra.mxu1 %v3007_v27  ;;  %4737 = vmatpush3.msra.mxu0 %v3361_v56  ;;  %v3357_v27 = vld [vmem:[#allocation7 + $0x58] sm:$0xff] }
 0x9cc   :  { %4676 = vmatmul.mubr.msk.f32.gmra.mxu1 %vm97_vm0, %v4924_v12  ;;  %4682 = vmatprep.subr.mxu1 %v4660_v29  ;;  %v3356_v12 = vld [vmem:[#allocation7 + $0x50] sm:$0xff] }
 0x9cd   :  { %4683 = vmatpush3.msra.mxu1 %v4660_v29  ;;  %4686 = vmatprep.mubr.msk.f32.mxu1 %vm97_vm0, %v4925_v1 }
 0x9ce   :  { %4684 = vmatprep.subr.mxu1 %v2997_v50  ;;  %4738 = vmatprep.subr.mxu0 %v3360_v9 }
 0x9cf   :  { %4685 = vmatpush3.msra.mxu1 %v2997_v50  ;;  %4739 = vmatpush3.msra.mxu0 %v3360_v9  ;;  %v3358_v50 = vld [vmem:[#allocation7 + $0x60] sm:$0xff] }
 0x9d0   :  { %4687 = vmatmul.mubr.msk.f32.vlgmr.msra.gmra.mxu1 %vm97_vm0, %v4926_v46  ;;  %4692 = vmatprep.subr.mxu1 %v3225_v18 }
 0x9d1   :  { %4689 = vmatprep.mubr.msk.f32.mxu1 %vm97_vm0, %v4927_v0  ;;  %4693 = vmatpush3.msra.mxu1 %v3225_v18  ;;  %v3355_v18 = vld [vmem:[#allocation7 + $0x48] sm:$0xff] }
 0x9d2   :  { %4694 = vmatprep.subr.mxu1 %v3224_v63  ;;  %4740 = vmatprep.subr.mxu0 %v3359_v48 }
 0x9d3   :  { %4695 = vmatpush3.msra.mxu1 %v3224_v63  ;;  %4741 = vmatpush3.msra.mxu0 %v3359_v48  ;;  %v3617_v48 = vld [vmem:[%s6314_s7] ss:$0 sm:$0xff] }
 0x9d4   :  { %4690 = vmatmul.mubr.msk.f32.gmra.mxu1 %vm97_vm0, %v4928_v23  ;;  %4696 = vmatprep.subr.mxu1 %v3223_v42  ;;  %vm3540_vm0 = vcmask 7168  }
 0x9d5   :  { %4697 = vmatpush3.msra.mxu1 %v3223_v42  ;;  %4742 = vmatprep.subr.mxu0 %v3358_v50 }
 0x9d6   :  { %4698 = vmatprep.subr.mxu1 %v3222_v33  ;;  %4743 = vmatpush3.msra.mxu0 %v3358_v50 }
 0x9d7   :  { %4699 = vmatpush3.msra.mxu1 %v3222_v33  ;;  %4744 = vmatprep.subr.mxu0 %v3357_v27  ;;  %v3354_v33 = vld [vmem:[#allocation7 + $0x40] sm:$0xff] }
 0x9d8   :  { %4700 = vmatprep.subr.mxu1 %v3221_v38  ;;  %4745 = vmatpush3.msra.mxu0 %v3357_v27 }
 0x9d9   :  { %4701 = vmatpush3.msra.mxu1 %v3221_v38  ;;  %4746 = vmatprep.subr.mxu0 %v3356_v12 }
 0x9da   :  { %4702 = vmatprep.subr.mxu1 %v3220_v37  ;;  %4747 = vmatpush3.msra.mxu0 %v3356_v12 }
 0x9db   :  { %4703 = vmatpush3.msra.mxu1 %v3220_v37  ;;  %4748 = vmatprep.subr.mxu0 %v3355_v18 }
 0x9dc   :  { %4704 = vmatprep.subr.mxu1 %v3219_v62  ;;  %4749 = vmatpush3.msra.mxu0 %v3355_v18 }
 0x9dd   :  { %4705 = vmatpush3.msra.mxu1 %v3219_v62  ;;  %4750 = vmatprep.subr.mxu0 %v3354_v33 }
 0x9de   :  { %4706 = vmatprep.subr.mxu1 %v3218_v15  ;;  %4751 = vmatpush3.msra.mxu0 %v3354_v33 }
 0x9df   :  { %4707 = vmatpush3.msra.mxu1 %v3218_v15 }
 0x9e0   :  { %4708 = vmatprep.subr.mxu1 %v3217_v28 }
 0x9e1   :  { %4709 = vmatpush3.msra.mxu1 %v3217_v28  ;;  %v3353_v28 = vld [vmem:[#allocation7 + $0x38] sm:$0xff] }
 0x9e2   :  { %4710 = vmatprep.subr.mxu1 %v3216_v5  ;;  %4752 = vmatprep.subr.mxu0 %v3353_v28 }
 0x9e3   :  { %4711 = vmatpush3.msra.mxu1 %v3216_v5  ;;  %4753 = vmatpush3.msra.mxu0 %v3353_v28 }
 0x9e4   :  { %4712 = vmatprep.subr.mxu1 %v3215_v51 }
 0x9e5   :  { %4713 = vmatpush3.msra.mxu1 %v3215_v51 }
 0x9e6   :  { %4714 = vmatprep.subr.mxu1 %v3214_v58 }
 0x9e7   :  { %4715 = vmatpush3.msra.mxu1 %v3214_v58  ;;  %v3352_v58 = vld [vmem:[#allocation7 + $0x30] sm:$0xff] }
 0x9e8   :  { %4716 = vmatprep.subr.mxu1 %v3213_v25  ;;  %4754 = vmatprep.subr.mxu0 %v3352_v58 }
 0x9e9   :  { %4717 = vmatpush3.msra.mxu1 %v3213_v25  ;;  %4755 = vmatpush3.msra.mxu0 %v3352_v58 }
 0x9ea   :  { %4718 = vmatprep.subr.mxu1 %v3212_v34 }
 0x9eb   :  { %4719 = vmatpush3.msra.mxu1 %v3212_v34 }
 0x9ec   :  { %4720 = vmatprep.subr.mxu1 %v3211_v19 }
 0x9ed   :  { %4721 = vmatpush3.msra.mxu1 %v3211_v19 }
 0x9ee   :  { %4722 = vmatprep.subr.mxu1 %v3210_v26 }
 0x9ef   :  { %4723 = vmatpush3.msra.mxu1 %v3210_v26 }
 0xa63   :  { %v4610_v24 = vpop.f32.mrf.mxu1 }
 0xa64   :  { %v2799_v21 = vadd.f32 %v4610_v24, %v6060_v13  ;;  %v3351_v24 = vld [vmem:[#allocation7 + $0x28] sm:$0xff] }
 0xa65   :  { %v2793_v2 = vpop.f32.mrf.mxu1  ;;  %4756 = vmatprep.subr.mxu0 %v3351_v24 }
 0xa66   :  { %v2833_v10 = vmax.f32 %v2799_v21, 0.0  ;;  %v2794_v11 = vadd.f32 %v6060_v13, %v2793_v2  ;;  %v3350_v2 = vld [vmem:[#allocation7 + $0x20] sm:$0xff]  ;;  %4757 = vmatpush3.msra.mxu0 %v3351_v24 }
 0xa67   :  { %v4613_v31 = vpop.f32.mrf.mxu1  ;;  %4758 = vmatprep.subr.mxu0 %v3350_v2 }
 0xa68   :  { %v2832_v30 = vmax.f32 %v2794_v11, 0.0  ;;  %v2809_v53 = vadd.f32 %v4613_v31, %v6060_v13  ;;  %v2848_v14 = vmul.f32 %v6018_v32, %v2833_v10  ;;  %4759 = vmatpush3.msra.mxu0 %v3350_v2  ;;  %v3349_v31 = vld [vmem:[#allocation7 + $0x18] sm:$0xff] }
 0xa69   :  { %v2803_v61 = vpop.f32.mrf.mxu1  ;;  %4760 = vmatprep.subr.mxu0 %v3349_v31 }
 0xa6a   :  { %v2835_v20 = vmax.f32 %v2809_v53, 0.0  ;;  %v2804_v41 = vadd.f32 %v6060_v13, %v2803_v61  ;;  %2857 = vadd.xlane.f32.xlu1 %v2848_v14  ;;  %v2847_v54 = vmul.f32 %v6018_v32, %v2832_v30  ;;  %4761 = vmatpush3.msra.mxu0 %v3349_v31  ;;  %v3348_v30 = vld [vmem:[#allocation7 + $0x10] sm:$0xff]  ;;  %v3347_v53 = vld [vmem:[#allocation7 + $0x8] sm:$0xff]  ;;  %v3346_v14 = vld [vmem:[#allocation7] sm:$0xff]  ;;  %v627_v31 = vpop.xlane.xlu0 %626 }
 0xa6b   :  { %v4616_v55 = vpop.f32.mrf.mxu1  ;;  %4762 = vmatprep.subr.mxu0 %v3348_v30  ;;  %v3616_v61 = vld [vmem:[%s6312_s5] ss:$0 sm:$0xff] }
 0xa6c   :  { %v2834_v40 = vmax.f32 %v2804_v41, 0.0  ;;  %v2819_v35 = vadd.f32 %v4616_v55, %v6060_v13  ;;  %2855 = vadd.xlane.f32.xlu0 %v2847_v54  ;;  %v2850_v60 = vmul.f32 %v6018_v32, %v2835_v20  ;;  %4763 = vmatpush3.msra.mxu0 %v3348_v30 }
 0xa6d   :  { %v2813_v57 = vpop.f32.mrf.mxu1  ;;  %4764 = vmatprep.subr.mxu0 %v3347_v53 }
 0xa6e   :  { %v2837_v3 = vmax.f32 %v2819_v35, 0.0  ;;  %v2814_v22 = vadd.f32 %v6060_v13, %v2813_v57  ;;  %2861 = vadd.xlane.f32.xlu1 %v2850_v60  ;;  %v2849_v6 = vmul.f32 %v6018_v32, %v2834_v40  ;;  %4765 = vmatpush3.msra.mxu0 %v3347_v53  ;;  %v631_v53 = vpop.xlane.xlu0 %630 }
 0xa6f   :  { %v4619_v52 = vpop.f32.mrf.mxu1  ;;  %4766 = vmatprep.subr.mxu0 %v3346_v14 }
 0xa70   :  { %v2836_v4 = vmax.f32 %v2814_v22, 0.0  ;;  %v2829_v16 = vadd.f32 %v4619_v52, %v6060_v13  ;;  %2859 = vadd.xlane.f32.xlu0 %v2849_v6  ;;  %v2852_v17 = vmul.f32 %v6018_v32, %v2837_v3  ;;  %4767 = vmatpush3.msra.mxu0 %v3346_v14 }
 0xa71   :  { %v2823_v7 = vpop.f32.mrf.mxu1 }
 0xa72   :  { %v2839_v39 = vmax.f32 %v2829_v16, 0.0  ;;  %v2824_v59 = vadd.f32 %v6060_v13, %v2823_v7  ;;  %2865 = vadd.xlane.f32.xlu1 %v2852_v17  ;;  %v2851_v43 = vmul.f32 %v6018_v32, %v2836_v4  ;;  %v3615_v13 = vld [vmem:[%s6310_s3 + $0x4] ss:$0 sm:$0xff] }
 0xa74   :  { %v2838_v44 = vmax.f32 %v2824_v59, 0.0  ;;  %2863 = vadd.xlane.f32.xlu0 %v2851_v43  ;;  %v2854_v8 = vmul.f32 %v6018_v32, %v2839_v39 }
 0xa76   :  { %2869 = vadd.xlane.f32.xlu1 %v2854_v8  ;;  %v2853_v45 = vmul.f32 %v6018_v32, %v2838_v44 }
 0xa78   :  { %2867 = vadd.xlane.f32.xlu0 %v2853_v45 }
 0xa88   :  { %v4674_v29 = vpop.f32.mrf.mxu1 }
 0xa89   :  { %v3195_v49 = vadd.f32 %v4674_v29, %v3615_v13 }
 0xa8a   :  { %v3082_v36 = vpop.f32.mrf.mxu1 }
 0xa8b   :  { %v3194_v32 = vadd.f32 %v3615_v13, %v3082_v36  ;;  %v3203_v46 = vmax.f32 %v3195_v49, 0.0  ;;  %v3618_v49 = vld [vmem:[%s6315_s8] ss:$0 sm:$0xff] }
 0xa8c   :  { %v4677_v47 = vpop.f32.mrf.mxu1 }
 0xa8d   :  { %v3202_v1 = vmax.f32 %v3194_v32, 0.0  ;;  %v3197_v0 = vadd.f32 %v4677_v47, %v3615_v13 }
 0xa8e   :  { %v3092_v23 = vpop.f32.mrf.mxu1 }
 0xa8f   :  { %v3196_v63 = vadd.f32 %v3615_v13, %v3092_v23  ;;  %4724 = vmatprep.mubr.f32.mxu1 %v3202_v1  ;;  %v3205_v37 = vmax.f32 %v3197_v0, 0.0 }
 0xa90   :  { %v4688_v42 = vpop.f32.mrf.mxu1  ;;  %4725 = vmatmul.mubr.f32.vlgmr.msra.gmra.mxu1 %v3203_v46 }
 0xa91   :  { %v3204_v38 = vmax.f32 %v3196_v63, 0.0  ;;  %v3199_v62 = vadd.f32 %v4688_v42, %v3615_v13 }
 0xa92   :  { %v3167_v15 = vpop.f32.mrf.mxu1 }
 0xa93   :  { %v3198_v5 = vadd.f32 %v3615_v13, %v3167_v15  ;;  %4727 = vmatprep.mubr.f32.mxu1 %v3204_v38  ;;  %v3207_v34 = vmax.f32 %v3199_v62, 0.0 }
 0xa94   :  { %v4691_v51 = vpop.f32.mrf.mxu1  ;;  %4728 = vmatmul.mubr.f32.gmra.mxu1 %v3205_v37 }
 0xa95   :  { %v3206_v25 = vmax.f32 %v3198_v5, 0.0  ;;  %v3201_v19 = vadd.f32 %v4691_v51, %v3615_v13 }
 0xa96   :  { %v3177_v26 = vpop.f32.mrf.mxu1 }
 0xa97   :  { %v3200_v21 = vadd.f32 %v3615_v13, %v3177_v26  ;;  %4730 = vmatprep.mubr.f32.mxu1 %v3206_v25  ;;  %v3209_v11 = vmax.f32 %v3201_v19, 0.0 }
 0xa98   :  { %4731 = vmatmul.mubr.f32.gmra.mxu1 %v3207_v34 }
 0xa99   :  { %v3208_v10 = vmax.f32 %v3200_v21, 0.0 }
 0xa9b   :  { %4733 = vmatprep.mubr.f32.mxu1 %v3208_v10 }
 0xa9c   :  { %4734 = vmatmul.mubr.f32.gmra.mxu1 %v3209_v11  ;;  %v629_v11 = vpop.xlane.xlu1 %628 }
 0xaa0   :  { %v633_v30 = vpop.xlane.xlu1 %632 }
 0xaa4   :  { %v637_v14 = vpop.xlane.xlu1 %636 }
 0xb50   :  { %v4726_v20 = vpop.f32.mrf.mxu1 }
 0xb51   :  { %v3305_v41 = vadd.f32 %v4726_v20, %v3616_v61  ;;  %v641_v20 = vpop.xlane.xlu1 %640 }
 0xb52   :  { %v3299_v54 = vpop.f32.mrf.mxu1 }
 0xb53   :  { %v3300_v55 = vadd.f32 %v3616_v61, %v3299_v54  ;;  %v3339_v60 = vmax.f32 %v3305_v41, 0.0 }
 0xb54   :  { %v4729_v40 = vpop.f32.mrf.mxu1 }
 0xb55   :  { %v3338_v35 = vmax.f32 %v3300_v55, 0.0  ;;  %v3315_v57 = vadd.f32 %v4729_v40, %v3616_v61  ;;  %v1366_v54 = vpop.xlane.xlu1 %1365 }
 0xb56   :  { %v3309_v3 = vpop.f32.mrf.mxu1 }
 0xb57   :  { %v3310_v22 = vadd.f32 %v3616_v61, %v3309_v3  ;;  %4768 = vmatprep.mubr.f32.mxu0 %v3338_v35  ;;  %v3341_v4 = vmax.f32 %v3315_v57, 0.0 }
 0xb58   :  { %v4732_v6 = vpop.f32.mrf.mxu1  ;;  %4769 = vmatmul.mubr.f32.vlgmr.msra.gmra.mxu0 %v3339_v60 }
 0xb59   :  { %v3340_v52 = vmax.f32 %v3310_v22, 0.0  ;;  %v3325_v16 = vadd.f32 %v4732_v6, %v3616_v61  ;;  %v1370_v40 = vpop.xlane.xlu1 %1369 }
 0xb5a   :  { %v3319_v17 = vpop.f32.mrf.mxu1 }
 0xb5b   :  { %v3320_v7 = vadd.f32 %v3616_v61, %v3319_v17  ;;  %4771 = vmatprep.mubr.f32.mxu0 %v3340_v52  ;;  %v3343_v43 = vmax.f32 %v3325_v16, 0.0 }
 0xb5c   :  { %v4735_v39 = vpop.f32.mrf.mxu1  ;;  %4772 = vmatmul.mubr.f32.gmra.mxu0 %v3341_v4 }
 0xb5d   :  { %v3342_v59 = vmax.f32 %v3320_v7, 0.0  ;;  %v3335_v44 = vadd.f32 %v4735_v39, %v3616_v61  ;;  %v1374_v60 = vpop.xlane.xlu1 %1373 }
 0xb5e   :  { %v3329_v8 = vpop.f32.mrf.mxu1 }
 0xb5f   :  { %v3330_v45 = vadd.f32 %v3616_v61, %v3329_v8  ;;  %4774 = vmatprep.mubr.f32.mxu0 %v3342_v59  ;;  %v3345_v9 = vmax.f32 %v3335_v44, 0.0  ;;  %v635_v61 = vpop.xlane.xlu0 %634 }
 0xb60   :  { %4775 = vmatmul.mubr.f32.gmra.mxu0 %v3343_v43 }
 0xb61   :  { %v3344_v56 = vmax.f32 %v3330_v45, 0.0  ;;  %v1378_v3 = vpop.xlane.xlu1 %1377 }
 0xb63   :  { %4777 = vmatprep.mubr.f32.mxu0 %v3344_v56  ;;  %v639_v41 = vpop.xlane.xlu0 %638 }
 0xb64   :  { %4778 = vmatmul.mubr.f32.gmra.mxu0 %v3345_v9 }
 0xb65   :  { %v2112_v6 = vpop.xlane.xlu1 %2111 }
 0xb67   :  { %v1364_v55 = vpop.xlane.xlu0 %1363 }
 0xb69   :  { %v2116_v4 = vpop.xlane.xlu1 %2115 }
 0xb6b   :  { %v1368_v35 = vpop.xlane.xlu0 %1367 }
 0xb6d   :  { %v2120_v17 = vpop.xlane.xlu1 %2119 }
 0xb6f   :  { %v1372_v57 = vpop.xlane.xlu0 %1371 }
 0xb71   :  { %v2124_v39 = vpop.xlane.xlu1 %2123 }
 0xb73   :  { %v1376_v22 = vpop.xlane.xlu0 %1375 }
 0xb75   :  { %v2858_v43 = vpop.xlane.xlu1 %2857 }
 0xb77   :  { %v2110_v52 = vpop.xlane.xlu0 %2109 }
 0xb79   :  { %v2862_v8 = vpop.xlane.xlu1 %2861 }
 0xb7b   :  { %v2114_v16 = vpop.xlane.xlu0 %2113 }
 0xb7d   :  { %v2866_v56 = vpop.xlane.xlu1 %2865 }
 0xb7f   :  { %v2118_v7 = vpop.xlane.xlu0 %2117 }
 0xb83   :  { %v2122_v59 = vpop.xlane.xlu0 %2121 }
 0xb87   :  { %v2856_v44 = vpop.xlane.xlu0 %2855 }
 0xb8b   :  { %v6254_v45 = vpop.xlane.xlu0 %2859 }
 0xb8f   :  { %v2864_v9 = vpop.xlane.xlu0 %2863 }
 0xc18   :  { %v4770_v13 = vpop.f32.mrf.mxu0 }
 0xc19   :  { %v3441_v29 = vadd.f32 %v4770_v13, %v3617_v48  ;;  %v2870_v13 = vpop.xlane.xlu1 %2869 }
 0xc1a   :  { %v3435_v50 = vpop.f32.mrf.mxu0 }
 0xc1b   :  { %v3475_v36 = vmax.f32 %v3441_v29, 0.0  ;;  %v3436_v27 = vadd.f32 %v3617_v48, %v3435_v50 }
 0xc1c   :  { %v4773_v32 = vpop.f32.mrf.mxu0 }
 0xc1d   :  { %v3474_v47 = vmax.f32 %v3436_v27, 0.0  ;;  %v3451_v12 = vadd.f32 %v4773_v32, %v3617_v48  ;;  %v3490_v1 = vmul.f32 %v3618_v49, %v3475_v36 }
 0xc1e   :  { %v3445_v46 = vpop.f32.mrf.mxu0 }
 0xc1f   :  { %v3477_v0 = vmax.f32 %v3451_v12, 0.0  ;;  %v3446_v23 = vadd.f32 %v3617_v48, %v3445_v46  ;;  %3499 = vadd.xlane.f32.xlu1 %v3490_v1  ;;  %v3489_v18 = vmul.f32 %v3618_v49, %v3474_v47  ;;  %v2868_v12 = vpop.xlane.xlu0 %2867 }
 0xc20   :  { %v4776_v63 = vpop.f32.mrf.mxu0 }
 0xc21   :  { %v3476_v42 = vmax.f32 %v3446_v23, 0.0  ;;  %v3461_v33 = vadd.f32 %v4776_v63, %v3617_v48  ;;  %3497 = vadd.xlane.f32.xlu0 %v3489_v18  ;;  %v3492_v38 = vmul.f32 %v3618_v49, %v3477_v0 }
 0xc22   :  { %v3455_v37 = vpop.f32.mrf.mxu0 }
 0xc23   :  { %v3479_v62 = vmax.f32 %v3461_v33, 0.0  ;;  %v3456_v15 = vadd.f32 %v3617_v48, %v3455_v37  ;;  %3503 = vadd.xlane.f32.xlu1 %v3492_v38  ;;  %v3491_v28 = vmul.f32 %v3618_v49, %v3476_v42 }
 0xc24   :  { %v4779_v5 = vpop.f32.mrf.mxu0 }
 0xc25   :  { %v3478_v51 = vmax.f32 %v3456_v15, 0.0  ;;  %v3471_v58 = vadd.f32 %v4779_v5, %v3617_v48  ;;  %3501 = vadd.xlane.f32.xlu0 %v3491_v28  ;;  %v3494_v25 = vmul.f32 %v3618_v49, %v3479_v62 }
 0xc26   :  { %v3465_v34 = vpop.f32.mrf.mxu0 }
 0xc27   :  { %v3481_v19 = vmax.f32 %v3471_v58, 0.0  ;;  %v3466_v26 = vadd.f32 %v3617_v48, %v3465_v34  ;;  %3507 = vadd.xlane.f32.xlu1 %v3494_v25  ;;  %v3493_v24 = vmul.f32 %v3618_v49, %v3478_v51  ;;  %v6256_v48 = vld [vmem:[#allocation2] ss:$0 sm:$0xff] }
 0xc28   :  { %v650_v29 = vadd.f32 %v6256_v48, %v629_v11  ;;  %v1387_v50 = vadd.f32 %v6256_v48, %v1366_v54  ;;  %v649_v36 = vadd.f32 %v6256_v48, %v627_v31  ;;  %v652_v27 = vadd.f32 %v6256_v48, %v633_v30  ;;  %v3619_v30 = vld [vmem:[#allocation2] ss:$0 sm:$0xff] }
 0xc29   :  { %v3480_v21 = vmax.f32 %v3466_v26, 0.0  ;;  %3505 = vadd.xlane.f32.xlu0 %v3493_v24  ;;  %v3496_v2 = vmul.f32 %v3618_v49, %v3481_v19  ;;  %v1389_v32 = vadd.f32 %v6256_v48, %v1370_v40  ;;  %v1388_v47 = vadd.f32 %v6256_v48, %v1368_v35 }
 0xc2a   :  { %v651_v1 = vadd.f32 %v6256_v48, %v631_v53  ;;  %v654_v46 = vadd.f32 %v6256_v48, %v637_v14  ;;  %v653_v0 = vadd.f32 %v6256_v48, %v635_v61  ;;  %v1391_v23 = vadd.f32 %v6256_v48, %v1374_v60 }
 0xc2b   :  { %3511 = vadd.xlane.f32.xlu1 %v3496_v2  ;;  %v3495_v10 = vmul.f32 %v3618_v49, %v3480_v21  ;;  %v1386_v49 = vadd.f32 %v6256_v48, %v1364_v55  ;;  %v656_v18 = vadd.f32 %v6256_v48, %v641_v20  ;;  %v1390_v63 = vadd.f32 %v6256_v48, %v1372_v57 }
 0xc2c   :  { %v1393_v42 = vadd.f32 %v6256_v48, %v1378_v3  ;;  %v1392_v33 = vadd.f32 %v6256_v48, %v1376_v22  ;;  %v655_v37 = vadd.f32 %v6256_v48, %v639_v41  ;;  %v1395_v62 = vadd.f32 %v1387_v50, %v650_v29 }
 0xc2d   :  { %3509 = vadd.xlane.f32.xlu0 %v3495_v10  ;;  %v1394_v15 = vadd.f32 %v1386_v49, %v649_v36  ;;  %v2133_v28 = vadd.f32 %v6256_v48, %v2112_v6  ;;  %v1397_v5 = vadd.f32 %v1389_v32, %v652_v27  ;;  %v1396_v51 = vadd.f32 %v1388_v47, %v651_v1 }
 0xc2e   :  { %v2132_v58 = vadd.f32 %v6256_v48, %v2110_v52  ;;  %v2135_v25 = vadd.f32 %v6256_v48, %v2116_v4  ;;  %v1399_v19 = vadd.f32 %v1391_v23, %v654_v46  ;;  %v2134_v26 = vadd.f32 %v6256_v48, %v2114_v16 }
 0xc2f   :  { %v2137_v24 = vadd.f32 %v6256_v48, %v2120_v17  ;;  %v2136_v21 = vadd.f32 %v6256_v48, %v2118_v7  ;;  %v1398_v2 = vadd.f32 %v1390_v63, %v653_v0  ;;  %v1401_v10 = vadd.f32 %v1393_v42, %v656_v18 }
 0xc30   :  { %v1400_v11 = vadd.f32 %v1392_v33, %v655_v37  ;;  %v2139_v31 = vadd.f32 %v6256_v48, %v2124_v39  ;;  %v2141_v14 = vadd.f32 %v2133_v28, %v1395_v62  ;;  %v2138_v61 = vadd.f32 %v6256_v48, %v2122_v59 }
 0xc31   :  { %v2879_v20 = vadd.f32 %v6256_v48, %v2858_v43  ;;  %v2883_v41 = vadd.f32 %v6256_v48, %v2866_v56  ;;  %v2140_v54 = vadd.f32 %v2132_v58, %v1394_v15  ;;  %v2143_v55 = vadd.f32 %v2135_v25, %v1397_v5 }
 0xc32   :  { %v2878_v40 = vadd.f32 %v6256_v48, %v2856_v44  ;;  %v2882_v35 = vadd.f32 %v6256_v48, %v2864_v9  ;;  %v2142_v57 = vadd.f32 %v2134_v26, %v1396_v51  ;;  %v2145_v3 = vadd.f32 %v2137_v24, %v1399_v19 }
 0xc33   :  { %v2144_v22 = vadd.f32 %v2136_v21, %v1398_v2  ;;  %v2147_v52 = vadd.f32 %v2139_v31, %v1401_v10  ;;  %v2881_v4 = vadd.f32 %v6256_v48, %v2862_v8  ;;  %v2885_v16 = vadd.f32 %v6256_v48, %v2870_v13 }
 0xc34   :  { %v2146_v39 = vadd.f32 %v2138_v61, %v1400_v11  ;;  %v2887_v59 = vadd.f32 %v2879_v20, %v2141_v14  ;;  %v2891_v43 = vadd.f32 %v2883_v41, %v2145_v3  ;;  %v2886_v29 = vadd.f32 %v2878_v40, %v2140_v54 }
 0xc35   :  { %v2880_v44 = vadd.f32 %v6256_v48, %v6254_v45  ;;  %v2890_v9 = vadd.f32 %v2882_v35, %v2144_v22  ;;  %v2884_v50 = vadd.f32 %v6256_v48, %v2868_v12  ;;  %v2889_v47 = vadd.f32 %v2881_v4, %v2143_v55 }
 0xc36   :  { %v2893_v13 = vadd.f32 %v2885_v16, %v2147_v52 }
 0xc37   :  { %v2888_v42 = vadd.f32 %v2880_v44, %v2142_v57  ;;  %v2892_v33 = vadd.f32 %v2884_v50, %v2146_v39 }
 0xca8   :  { %v3500_v38 = vpop.xlane.xlu1 %3499 }
 0xca9   :  { %v3521_v6 = vadd.f32 %v3619_v30, %v3500_v38 }
 0xcaa   :  { %v3498_v34 = vpop.xlane.xlu0 %3497 }
 0xcab   :  { %v3520_v17 = vadd.f32 %v3619_v30, %v3498_v34  ;;  %v3529_v36 = vadd.f32 %v3521_v6, %v2887_v59 }
 0xcac   :  { %v3504_v53 = vpop.xlane.xlu1 %3503 }
 0xcad   :  { %v3523_v27 = vadd.f32 %v3619_v30, %v3504_v53  ;;  %v3528_v1 = vadd.f32 %v3520_v17, %v2886_v29 }
 0xcae   :  { %v3502_v60 = vpop.xlane.xlu0 %3501 }
 0xcaf   :  { %v3522_v0 = vadd.f32 %v3619_v30, %v3502_v60  ;;  %v3531_v38 = vadd.f32 %v3523_v27, %v2889_v47 }
 0xcb0   :  { %v3508_v7 = vpop.xlane.xlu1 %3507 }
 0xcb1   :  { %v3525_v56 = vadd.f32 %v3619_v30, %v3508_v7  ;;  %v3530_v62 = vadd.f32 %v3522_v0, %v2888_v42 }
 0xcb2   :  { %v3506_v49 = vpop.xlane.xlu0 %3505 }
 0xcb3   :  { %v3533_v32 = vadd.f32 %v3525_v56, %v2891_v43  ;;  %v3524_v8 = vadd.f32 %v3619_v30, %v3506_v49 }
 0xcb4   :  { %v3512_v46 = vpop.xlane.xlu1 %3511 }
 0xcb5   :  { %v3537_v23 = vmul.f32 %v3533_v32, %v3529_v36  ;;  %v3532_v18 = vadd.f32 %v3524_v8, %v2890_v9  ;;  %v3527_v63 = vadd.f32 %v3619_v30, %v3512_v46 }
 0xcb6   :  { %v3510_v45 = vpop.xlane.xlu0 %3509 }
 0xcb7   :  { %3542 = vst.msk [vmem:[%s6317_s10 + $0x8] sm:$0xff] %vm3540_vm0, %v3537_v23  ;;  %v3536_v48 = vmul.f32 %v3532_v18, %v3528_v1  ;;  %v3535_v12 = vadd.f32 %v3527_v63, %v2893_v13  ;;  %v3526_v37 = vadd.f32 %v3619_v30, %v3510_v45 }
 0xcb9   :  { %3541 = vst.msk [vmem:[%s6317_s10] sm:$0xff] %vm3540_vm0, %v3536_v48  ;;  %v3539_v15 = vmul.f32 %v3535_v12, %v3531_v38  ;;  %v3534_v28 = vadd.f32 %v3526_v37, %v2892_v33 }
 0xcbb   :  { %3544 = vst.msk [vmem:[%s6317_s10 + $0x18] sm:$0xff] %vm3540_vm0, %v3539_v15  ;;  %v3538_v5 = vmul.f32 %v3534_v28, %v3530_v62 }
 0xcbd   :  { %3543 = vst.msk [vmem:[%s6317_s10 + $0x10] sm:$0xff] %vm3540_vm0, %v3538_v5 }
 0xcbe   :  { %3549 = vsyncpa [#allocation4], 1 }
 0xcbf   :  { %3550 = vsyncpa [#allocation6], 1 }

</bundles_post_ra>
